<compile_context>
chip_gen: v5e
topology: v5e:2x2
jax: 0.10.0
libtpu: 0.0.40
codegen_flags: <defaults>
</compile_context>

<pallas_src>
import functools

import jax
import jax.numpy as jnp
from jax.experimental import pallas as pl
from jax.experimental.pallas import tpu as pltpu


# bf16 MXU operands per the perf review; set to jnp.float32 for exact parity.
MXU_DTYPE = jnp.bfloat16


# ----------------------------- Pallas kernel -------------------------------

def _traffic_gru_kernel(x_ref,
                        wx1_ref, b1x_ref, wh1_ref, b1hn_ref,
                        w2_ref, b2rz_ref, b2xn_ref, b2hn_ref,
                        wfc_ref, bfc_ref,
                        out_ref,
                        gi1_scr,
                        *, seq_len, hidden, input_size):
    B = x_ref.shape[0]
    H = hidden
    T = seq_len

    # ---- hoisted weight loads (read once, reused across the unrolled loop) ----
    wh1 = wh1_ref[...]                          # (H, 3H)  [r|z|n], bf16
    w2 = w2_ref[...]                            # (2H, 4H) [r|z|x_n|h_n], bf16

    # ---- fused biases pre-broadcast to (B, ...) once (no per-step broadcast) ----
    b1hn = jnp.broadcast_to(b1hn_ref[...], (B, H))          # b_hh_n (layer 1)
    b2rz = jnp.broadcast_to(b2rz_ref[...], (B, 2 * H))      # b_ih_rz + b_hh_rz
    b2xn = jnp.broadcast_to(b2xn_ref[...], (B, H))          # b_ih_n  (layer 2)
    b2hn = jnp.broadcast_to(b2hn_ref[...], (B, H))          # b_hh_n  (layer 2)

    # ---- layer-1 input projection, hoisted out of the recurrence ----
    # gi1[:, t, :] = x_t @ Wx1 + [b_ir+b_hr | b_iz+b_hz | b_in]
    x = x_ref[...]                              # (B, T, I)
    wx1 = wx1_ref[...]                          # (I, 3H)
    if input_size == 1:
        # K = 1: outer product -> pure VPU broadcast multiply, no MXU.
        gi1 = x * wx1.reshape(1, 1, 3 * H)
    else:
        gi1 = jnp.dot(x.reshape(B * T, input_size), wx1,
                      preferred_element_type=jnp.float32).reshape(B, T, 3 * H)
    gi1_scr[...] = gi1 + b1x_ref[...].reshape(1, 1, 3 * H)   # park in VMEM scratch

    h1 = jnp.zeros((B, H), jnp.float32)
    h2 = jnp.zeros((B, H), jnp.float32)

    # T is small & static -> fully unrolled recurrence, no per-step grid cost.
    for t in range(T):
        gi1_t = gi1_scr[:, t, :]                # (B, 3H)

        # ---- layer 1: ONE MXU push, K=H, N=3H ----
        gh1 = jnp.dot(h1.astype(wh1.dtype), wh1,
                      preferred_element_type=jnp.float32)     # (B, 3H)
        rz1 = jax.nn.sigmoid(gi1_t[:, :2 * H] + gh1[:, :2 * H])
        r1 = rz1[:, :H]
        z1 = rz1[:, H:]
        n1 = jnp.tanh(gi1_t[:, 2 * H:] + r1 * (gh1[:, 2 * H:] + b1hn))
        h1 = (1.0 - z1) * n1 + z1 * h1

        # ---- layer 2: ONE MXU push, K=2H, N=4H ([h1,h2] concatenated on K) ----
        hcat = jnp.concatenate([h1, h2], axis=-1).astype(w2.dtype)   # (B, 2H)
        g2 = jnp.dot(hcat, w2, preferred_element_type=jnp.float32)   # (B, 4H)
        rz2 = jax.nn.sigmoid(g2[:, :2 * H] + b2rz)
        r2 = rz2[:, :H]
        z2 = rz2[:, H:]
        n2 = jnp.tanh(g2[:, 2 * H:3 * H] + b2xn + r2 * (g2[:, 3 * H:] + b2hn))
        h2 = (1.0 - z2) * n2 + z2 * h2

    # ---- final FC: VPU multiply + lane reduce (XLU), not an N=1 MXU matmul ----
    out_ref[...] = (jnp.sum(h2 * wfc_ref[...], axis=-1, keepdims=True)
                    + bfc_ref[...])


def traffic_gru_forward(x, params):
    """x: (B, T, I) float32 -> (B, 1) float32."""
    B, T, I = x.shape
    H = params["wh1"].shape[0]

    def full(shape):
        return pl.BlockSpec(shape, lambda i, _n=len(shape): (0,) * _n)

    grid_spec = pltpu.PrefetchScalarGridSpec(
        num_scalar_prefetch=0,
        grid=(1,),                              # single invocation; loop lives inside
        in_specs=[
            full((B, T, I)),                    # whole sequence as one VMEM block
            full(params["wx1"].shape), full(params["b1x"].shape),
            full(params["wh1"].shape), full(params["b1hn"].shape),
            full(params["w2"].shape), full(params["b2rz"].shape),
            full(params["b2xn"].shape), full(params["b2hn"].shape),
            full(params["wfc"].shape), full(params["bfc"].shape),
        ],
        out_specs=pl.BlockSpec((B, 1), lambda i: (0, 0)),
        scratch_shapes=[pltpu.VMEM((B, T, 3 * H), jnp.float32)],
    )

    param_bytes = sum(int(v.size) * v.dtype.itemsize for v in params.values())
    cost = pl.CostEstimate(
        flops=int(2 * B * T * I * 3 * H
                  + T * (2 * B * H * 3 * H + 2 * B * 2 * H * 4 * H + 40 * B * H)
                  + 2 * B * H),
        transcendentals=int(T * B * 6 * H),
        bytes_accessed=int(4 * B * T * I + param_bytes + 4 * B),
    )

    kernel = functools.partial(_traffic_gru_kernel,
                               seq_len=T, hidden=H, input_size=I)

    return pl.pallas_call(
        kernel,
        out_shape=jax.ShapeDtypeStruct((B, 1), jnp.float32),
        grid_spec=grid_spec,
        compiler_params=pltpu.CompilerParams(dimension_semantics=("arbitrary",)),
        cost_estimate=cost,
    )(x,
      params["wx1"], params["b1x"], params["wh1"], params["b1hn"],
      params["w2"], params["b2rz"], params["b2xn"], params["b2hn"],
      params["wfc"], params["bfc"])


# -------------------------- parameter construction -------------------------

def init_raw_params(key, input_size, hidden_size):
    """torch-layout GRU params, U(-1/sqrt(H), 1/sqrt(H)), gate order [r, z, n]."""
    H = hidden_size
    bound = 1.0 / float(H) ** 0.5
    keys = jax.random.split(key, 10)
    u = lambda k, shape: jax.random.uniform(k, shape, jnp.float32, -bound, bound)
    return {
        "w_ih_l0": u(keys[0], (3 * H, input_size)),
        "w_hh_l0": u(keys[1], (3 * H, H)),
        "b_ih_l0": u(keys[2], (3 * H,)),
        "b_hh_l0": u(keys[3], (3 * H,)),
        "w_ih_l1": u(keys[4], (3 * H, H)),
        "w_hh_l1": u(keys[5], (3 * H, H)),
        "b_ih_l1": u(keys[6], (3 * H,)),
        "b_hh_l1": u(keys[7], (3 * H,)),
        "w_fc":    u(keys[8], (1, H)),
        "b_fc":    u(keys[9], (1,)),
    }


def pack_params(raw, hidden_size):
    """Repack torch-layout weights into the fused, lane-concatenated kernel layout."""
    H = hidden_size
    f32 = jnp.float32

    def gate_w(w, g):   # (3H, D) -> (D, H) block for gate g, right-multiply layout
        return w[g * H:(g + 1) * H, :].T

    def gate_b(b, g):   # (3H,) -> (H,)
        return b[g * H:(g + 1) * H]

    # ---- layer 1: Wh as (H, 3H) [r|z|n]; all non-r-gated biases fold into x-side ----
    wx1 = jnp.concatenate([gate_w(raw["w_ih_l0"], g) for g in range(3)], axis=1)  # (I, 3H)
    wh1 = jnp.concatenate([gate_w(raw["w_hh_l0"], g) for g in range(3)], axis=1)  # (H, 3H)
    b1x = jnp.concatenate([
        gate_b(raw["b_ih_l0"], 0) + gate_b(raw["b_hh_l0"], 0),
        gate_b(raw["b_ih_l0"], 1) + gate_b(raw["b_hh_l0"], 1),
        gate_b(raw["b_ih_l0"], 2),
    ])[None, :]                                                                   # (1, 3H)
    b1hn = gate_b(raw["b_hh_l0"], 2)[None, :]                                     # (1, H)

    # ---- layer 2: fused (2H, 4H) with K = [h1 | h2], columns [r | z | x_n | h_n] ----
    zeros = jnp.zeros((H, H), f32)
    col_r = jnp.concatenate([gate_w(raw["w_ih_l1"], 0), gate_w(raw["w_hh_l1"], 0)], axis=0)
    col_z = jnp.concatenate([gate_w(raw["w_ih_l1"], 1), gate_w(raw["w_hh_l1"], 1)], axis=0)
    col_xn = jnp.concatenate([gate_w(raw["w_ih_l1"], 2), zeros], axis=0)
    col_hn = jnp.concatenate([zeros, gate_w(raw["w_hh_l1"], 2)], axis=0)
    w2 = jnp.concatenate([col_r, col_z, col_xn, col_hn], axis=1)                  # (2H, 4H)
    b2rz = jnp.concatenate([
        gate_b(raw["b_ih_l1"], 0) + gate_b(raw["b_hh_l1"], 0),
        gate_b(raw["b_ih_l1"], 1) + gate_b(raw["b_hh_l1"], 1),
    ])[None, :]                                                                   # (1, 2H)
    b2xn = gate_b(raw["b_ih_l1"], 2)[None, :]
    b2hn = gate_b(raw["b_hh_l1"], 2)[None, :]

    return {
        "wx1": wx1.astype(f32),              # x-side stays f32 (VPU broadcast-mul path)
        "b1x": b1x.astype(f32),
        "wh1": wh1.astype(MXU_DTYPE),        # MXU operand
        "b1hn": b1hn.astype(f32),
        "w2": w2.astype(MXU_DTYPE),          # MXU operand
        "b2rz": b2rz.astype(f32),
        "b2xn": b2xn.astype(f32),
        "b2hn": b2hn.astype(f32),
        "wfc": raw["w_fc"].astype(f32),      # (1, H)
        "bfc": raw["b_fc"][None, :].astype(f32),  # (1, 1)
    }


# ------------------------------ pure-JAX reference -------------------------

def reference_forward(x, raw, hidden_size):
    """Literal torch.nn.GRU(num_layers=2, batch_first=True) + fc semantics."""
    B, T, I = x.shape
    H = hidden_size

    def cell(x_t, h, w_ih, w_hh, b_ih, b_hh):
        gi = x_t @ w_ih.T + b_ih
        gh = h @ w_hh.T + b_hh
        r = jax.nn.sigmoid(gi[:, :H] + gh[:, :H])
        z = jax.nn.sigmoid(gi[:, H:2 * H] + gh[:, H:2 * H])
        n = jnp.tanh(gi[:, 2 * H:] + r * gh[:, 2 * H:])
        return (1.0 - z) * n + z * h

    def step(carry, x_t):
        h1, h2 = carry
        h1 = cell(x_t, h1, raw["w_ih_l0"], raw["w_hh_l0"], raw["b_ih_l0"], raw["b_hh_l0"])
        h2 = cell(h1, h2, raw["w_ih_l1"], raw["w_hh_l1"], raw["b_ih_l1"], raw["b_hh_l1"])
        return (h1, h2), None

    h0 = (jnp.zeros((B, H), jnp.float32), jnp.zeros((B, H), jnp.float32))
    (_, h2), _ = jax.lax.scan(step, h0, jnp.transpose(x, (1, 0, 2)))
    return h2 @ raw["w_fc"].T + raw["b_fc"][None, :]


# ----------------------------------- main -----------------------------------

if __name__ == "__main__":
    # Shapes consistent with TrafficGRU defaults: input_size=1, hidden_size=64.
    B, T, I, H = 8, 8, 1, 64

    key = jax.random.PRNGKey(0)
    k_x, k_p = jax.random.split(key)
    x = jax.random.normal(k_x, (B, T, I), jnp.float32)

    raw = init_raw_params(k_p, I, H)
    params = pack_params(raw, H)

    out = jax.block_until_ready(traffic_gru_forward(x, params))
    ref = jax.block_until_ready(reference_forward(x, raw, H))

    assert out.shape == (B, 1)
    # bf16 MXU operands (f32 accumulation) -> looser tolerance vs the f32 reference;
    # with MXU_DTYPE = jnp.float32 the kernel matches to 1e-4.
    tol = 1e-4 if MXU_DTYPE == jnp.float32 else 1e-2
    max_err = float(jnp.max(jnp.abs(out - ref)))
    assert jnp.allclose(out, ref, atol=tol, rtol=tol), (max_err, out, ref)

    print("KERNEL_OK")
</pallas_src>

<mosaic_0001>
module attributes {stable_mosaic.version = 11 : i64} {
  func.func @_traffic_gru_kernel(%arg0: i32, %arg1: memref<8x8x1xf32, #tpu.memory_space<vmem>>, %arg2: memref<1x192xf32, #tpu.memory_space<vmem>>, %arg3: memref<1x192xf32, #tpu.memory_space<vmem>>, %arg4: memref<64x192xbf16, #tpu.memory_space<vmem>>, %arg5: memref<1x64xf32, #tpu.memory_space<vmem>>, %arg6: memref<128x256xbf16, #tpu.memory_space<vmem>>, %arg7: memref<1x128xf32, #tpu.memory_space<vmem>>, %arg8: memref<1x64xf32, #tpu.memory_space<vmem>>, %arg9: memref<1x64xf32, #tpu.memory_space<vmem>>, %arg10: memref<1x64xf32, #tpu.memory_space<vmem>>, %arg11: memref<1x1xf32, #tpu.memory_space<vmem>>, %arg12: memref<8x1xf32, #tpu.memory_space<vmem>>, %arg13: memref<8x8x192xf32, #tpu.memory_space<vmem>>) attributes {dimension_semantics = [#tpu.dimension_semantics<arbitrary>], iteration_bounds = array<i64: 1>, scalar_prefetch = 0 : i64, scratch_operands = 1 : i64, tpu.core_type = #tpu.core_type<tc>, window_params = [{pipeline_mode = #tpu.pipeline_mode<synchronous>, transform_indices = @transform_0, window_bounds = array<i64: 8, 8, 1>}, {pipeline_mode = #tpu.pipeline_mode<synchronous>, transform_indices = @transform_1, window_bounds = array<i64: 1, 192>}, {pipeline_mode = #tpu.pipeline_mode<synchronous>, transform_indices = @transform_2, window_bounds = array<i64: 1, 192>}, {pipeline_mode = #tpu.pipeline_mode<synchronous>, transform_indices = @transform_3, window_bounds = array<i64: 64, 192>}, {pipeline_mode = #tpu.pipeline_mode<synchronous>, transform_indices = @transform_4, window_bounds = array<i64: 1, 64>}, {pipeline_mode = #tpu.pipeline_mode<synchronous>, transform_indices = @transform_5, window_bounds = array<i64: 128, 256>}, {pipeline_mode = #tpu.pipeline_mode<synchronous>, transform_indices = @transform_6, window_bounds = array<i64: 1, 128>}, {pipeline_mode = #tpu.pipeline_mode<synchronous>, transform_indices = @transform_7, window_bounds = array<i64: 1, 64>}, {pipeline_mode = #tpu.pipeline_mode<synchronous>, transform_indices = @transform_8, window_bounds = array<i64: 1, 64>}, {pipeline_mode = #tpu.pipeline_mode<synchronous>, transform_indices = @transform_9, window_bounds = array<i64: 1, 64>}, {pipeline_mode = #tpu.pipeline_mode<synchronous>, transform_indices = @transform_10, window_bounds = array<i64: 1, 1>}, {pipeline_mode = #tpu.pipeline_mode<synchronous>, transform_indices = @transform_11, window_bounds = array<i64: 8, 1>}]} {
    %c0 = arith.constant 0 : index
    %c0_0 = arith.constant 0 : index
    %0 = vector.load %arg4[%c0, %c0_0] : memref<64x192xbf16, #tpu.memory_space<vmem>>, vector<64x192xbf16>
    %c0_1 = arith.constant 0 : index
    %c0_2 = arith.constant 0 : index
    %1 = vector.load %arg6[%c0_1, %c0_2] : memref<128x256xbf16, #tpu.memory_space<vmem>>, vector<128x256xbf16>
    %c0_3 = arith.constant 0 : index
    %c0_4 = arith.constant 0 : index
    %2 = vector.load %arg5[%c0_3, %c0_4] : memref<1x64xf32, #tpu.memory_space<vmem>>, vector<1x64xf32>
    %3 = vector.shape_cast %2 : vector<1x64xf32> to vector<1x64xf32>
    %4 = vector.broadcast %3 : vector<1x64xf32> to vector<8x64xf32>
    %c0_5 = arith.constant 0 : index
    %c0_6 = arith.constant 0 : index
    %5 = vector.load %arg7[%c0_5, %c0_6] : memref<1x128xf32, #tpu.memory_space<vmem>>, vector<1x128xf32>
    %6 = vector.shape_cast %5 : vector<1x128xf32> to vector<1x128xf32>
    %7 = vector.broadcast %6 : vector<1x128xf32> to vector<8x128xf32>
    %c0_7 = arith.constant 0 : index
    %c0_8 = arith.constant 0 : index
    %8 = vector.load %arg8[%c0_7, %c0_8] : memref<1x64xf32, #tpu.memory_space<vmem>>, vector<1x64xf32>
    %9 = vector.shape_cast %8 : vector<1x64xf32> to vector<1x64xf32>
    %10 = vector.broadcast %9 : vector<1x64xf32> to vector<8x64xf32>
    %c0_9 = arith.constant 0 : index
    %c0_10 = arith.constant 0 : index
    %11 = vector.load %arg9[%c0_9, %c0_10] : memref<1x64xf32, #tpu.memory_space<vmem>>, vector<1x64xf32>
    %12 = vector.shape_cast %11 : vector<1x64xf32> to vector<1x64xf32>
    %13 = vector.broadcast %12 : vector<1x64xf32> to vector<8x64xf32>
    %c0_11 = arith.constant 0 : index
    %c0_12 = arith.constant 0 : index
    %c0_13 = arith.constant 0 : index
    %14 = vector.load %arg1[%c0_11, %c0_12, %c0_13] : memref<8x8x1xf32, #tpu.memory_space<vmem>>, vector<8x8x1xf32>
    %c0_14 = arith.constant 0 : index
    %c0_15 = arith.constant 0 : index
    %15 = vector.load %arg2[%c0_14, %c0_15] : memref<1x192xf32, #tpu.memory_space<vmem>>, vector<1x192xf32>
    %16 = vector.shape_cast %15 : vector<1x192xf32> to vector<1x1x192xf32>
    %17 = vector.broadcast %14 : vector<8x8x1xf32> to vector<8x8x192xf32>
    %18 = vector.broadcast %16 : vector<1x1x192xf32> to vector<8x8x192xf32>
    %19 = arith.mulf %17, %18 : vector<8x8x192xf32>
    %c0_16 = arith.constant 0 : index
    %c0_17 = arith.constant 0 : index
    %20 = vector.load %arg3[%c0_16, %c0_17] : memref<1x192xf32, #tpu.memory_space<vmem>>, vector<1x192xf32>
    %21 = vector.shape_cast %20 : vector<1x192xf32> to vector<1x1x192xf32>
    %22 = vector.broadcast %21 : vector<1x1x192xf32> to vector<8x8x192xf32>
    %23 = arith.addf %19, %22 : vector<8x8x192xf32>
    %c0_18 = arith.constant 0 : index
    %c0_19 = arith.constant 0 : index
    %c0_20 = arith.constant 0 : index
    %24 = vector.load %arg13[%c0_18, %c0_19, %c0_20] : memref<8x8x192xf32, #tpu.memory_space<vmem>>, vector<8x8x192xf32>
    tpu.vector_store %arg13[%c0_18, %c0_19, %c0_20], %23 {strides = array<i32>} : memref<8x8x192xf32, #tpu.memory_space<vmem>>, vector<8x8x192xf32>,
    %cst = arith.constant 0.000000e+00 : f32
    %25 = vector.broadcast %cst : f32 to vector<8x64xf32>
    %cst_21 = arith.constant 0.000000e+00 : f32
    %26 = vector.broadcast %cst_21 : f32 to vector<8x64xf32>
    %c0_22 = arith.constant 0 : index
    %c0_23 = arith.constant 0 : index
    %c0_24 = arith.constant 0 : index
    %27 = vector.load %arg13[%c0_22, %c0_23, %c0_24] : memref<8x8x192xf32, #tpu.memory_space<vmem>>, vector<8x1x192xf32>
    %28 = vector.shape_cast %27 : vector<8x1x192xf32> to vector<8x192xf32>
    %29 = arith.truncf %25 : vector<8x64xf32> to vector<8x64xbf16>
    %cst_25 = arith.constant dense<0.000000e+00> : vector<8x192xf32>
    %30 = tpu.matmul %29, %0, %cst_25 {dimension_numbers = #tpu.dot_dimension_numbers<[1], [0], [0], [1], [0, 0, 1, 1], [], []>} : vector<8x64xbf16>, vector<64x192xbf16>, vector<8x192xf32> -> vector<8x192xf32>
    %31 = vector.extract_strided_slice %28 {offsets = [0, 0], sizes = [8, 128], strides = [1, 1]} : vector<8x192xf32> to vector<8x128xf32>
    %32 = vector.extract_strided_slice %30 {offsets = [0, 0], sizes = [8, 128], strides = [1, 1]} : vector<8x192xf32> to vector<8x128xf32>
    %33 = arith.addf %31, %32 : vector<8x128xf32>
    %34 = arith.negf %33 : vector<8x128xf32>
    %35 = math.exp %34 : vector<8x128xf32>
    %cst_26 = arith.constant 1.000000e+00 : f32
    %36 = vector.broadcast %cst_26 : f32 to vector<8x128xf32>
    %37 = arith.addf %36, %35 : vector<8x128xf32>
    %38 = arith.divf %36, %37 : vector<8x128xf32>
    %39 = vector.extract_strided_slice %38 {offsets = [0, 0], sizes = [8, 64], strides = [1, 1]} : vector<8x128xf32> to vector<8x64xf32>
    %40 = vector.extract_strided_slice %38 {offsets = [0, 64], sizes = [8, 64], strides = [1, 1]} : vector<8x128xf32> to vector<8x64xf32>
    %41 = vector.extract_strided_slice %28 {offsets = [0, 128], sizes = [8, 64], strides = [1, 1]} : vector<8x192xf32> to vector<8x64xf32>
    %42 = vector.extract_strided_slice %30 {offsets = [0, 128], sizes = [8, 64], strides = [1, 1]} : vector<8x192xf32> to vector<8x64xf32>
    %43 = arith.addf %42, %4 : vector<8x64xf32>
    %44 = arith.mulf %39, %43 : vector<8x64xf32>
    %45 = arith.addf %41, %44 : vector<8x64xf32>
    %46 = math.tanh %45 : vector<8x64xf32>
    %cst_27 = arith.constant 1.000000e+00 : f32
    %47 = vector.broadcast %cst_27 : f32 to vector<8x64xf32>
    %48 = arith.subf %47, %40 : vector<8x64xf32>
    %49 = arith.mulf %48, %46 : vector<8x64xf32>
    %50 = arith.mulf %40, %25 : vector<8x64xf32>
    %51 = arith.addf %49, %50 : vector<8x64xf32>
    %52 = tpu.concatenate %51, %26 in 1 : vector<8x64xf32>, vector<8x64xf32> -> vector<8x128xf32>
    %53 = arith.truncf %52 : vector<8x128xf32> to vector<8x128xbf16>
    %cst_28 = arith.constant dense<0.000000e+00> : vector<8x256xf32>
    %54 = tpu.matmul %53, %1, %cst_28 {dimension_numbers = #tpu.dot_dimension_numbers<[1], [0], [0], [1], [0, 0, 1, 1], [], []>} : vector<8x128xbf16>, vector<128x256xbf16>, vector<8x256xf32> -> vector<8x256xf32>
    %55 = vector.extract_strided_slice %54 {offsets = [0, 0], sizes = [8, 128], strides = [1, 1]} : vector<8x256xf32> to vector<8x128xf32>
    %56 = arith.addf %55, %7 : vector<8x128xf32>
    %57 = arith.negf %56 : vector<8x128xf32>
    %58 = math.exp %57 : vector<8x128xf32>
    %cst_29 = arith.constant 1.000000e+00 : f32
    %59 = vector.broadcast %cst_29 : f32 to vector<8x128xf32>
    %60 = arith.addf %59, %58 : vector<8x128xf32>
    %61 = arith.divf %59, %60 : vector<8x128xf32>
    %62 = vector.extract_strided_slice %61 {offsets = [0, 0], sizes = [8, 64], strides = [1, 1]} : vector<8x128xf32> to vector<8x64xf32>
    %63 = vector.extract_strided_slice %61 {offsets = [0, 64], sizes = [8, 64], strides = [1, 1]} : vector<8x128xf32> to vector<8x64xf32>
    %64 = vector.extract_strided_slice %54 {offsets = [0, 128], sizes = [8, 64], strides = [1, 1]} : vector<8x256xf32> to vector<8x64xf32>
    %65 = arith.addf %64, %10 : vector<8x64xf32>
    %66 = vector.extract_strided_slice %54 {offsets = [0, 192], sizes = [8, 64], strides = [1, 1]} : vector<8x256xf32> to vector<8x64xf32>
    %67 = arith.addf %66, %13 : vector<8x64xf32>
    %68 = arith.mulf %62, %67 : vector<8x64xf32>
    %69 = arith.addf %65, %68 : vector<8x64xf32>
    %70 = math.tanh %69 : vector<8x64xf32>
    %cst_30 = arith.constant 1.000000e+00 : f32
    %71 = vector.broadcast %cst_30 : f32 to vector<8x64xf32>
    %72 = arith.subf %71, %63 : vector<8x64xf32>
    %73 = arith.mulf %72, %70 : vector<8x64xf32>
    %74 = arith.mulf %63, %26 : vector<8x64xf32>
    %75 = arith.addf %73, %74 : vector<8x64xf32>
    %c0_31 = arith.constant 0 : index
    %c1 = arith.constant 1 : index
    %c0_32 = arith.constant 0 : index
    %76 = vector.load %arg13[%c0_31, %c1, %c0_32] : memref<8x8x192xf32, #tpu.memory_space<vmem>>, vector<8x1x192xf32>
    %77 = vector.shape_cast %76 : vector<8x1x192xf32> to vector<8x192xf32>
    %78 = arith.truncf %51 : vector<8x64xf32> to vector<8x64xbf16>
    %cst_33 = arith.constant dense<0.000000e+00> : vector<8x192xf32>
    %79 = tpu.matmul %78, %0, %cst_33 {dimension_numbers = #tpu.dot_dimension_numbers<[1], [0], [0], [1], [0, 0, 1, 1], [], []>} : vector<8x64xbf16>, vector<64x192xbf16>, vector<8x192xf32> -> vector<8x192xf32>
    %80 = vector.extract_strided_slice %77 {offsets = [0, 0], sizes = [8, 128], strides = [1, 1]} : vector<8x192xf32> to vector<8x128xf32>
    %81 = vector.extract_strided_slice %79 {offsets = [0, 0], sizes = [8, 128], strides = [1, 1]} : vector<8x192xf32> to vector<8x128xf32>
    %82 = arith.addf %80, %81 : vector<8x128xf32>
    %83 = arith.negf %82 : vector<8x128xf32>
    %84 = math.exp %83 : vector<8x128xf32>
    %cst_34 = arith.constant 1.000000e+00 : f32
    %85 = vector.broadcast %cst_34 : f32 to vector<8x128xf32>
    %86 = arith.addf %85, %84 : vector<8x128xf32>
    %87 = arith.divf %85, %86 : vector<8x128xf32>
    %88 = vector.extract_strided_slice %87 {offsets = [0, 0], sizes = [8, 64], strides = [1, 1]} : vector<8x128xf32> to vector<8x64xf32>
    %89 = vector.extract_strided_slice %87 {offsets = [0, 64], sizes = [8, 64], strides = [1, 1]} : vector<8x128xf32> to vector<8x64xf32>
    %90 = vector.extract_strided_slice %77 {offsets = [0, 128], sizes = [8, 64], strides = [1, 1]} : vector<8x192xf32> to vector<8x64xf32>
    %91 = vector.extract_strided_slice %79 {offsets = [0, 128], sizes = [8, 64], strides = [1, 1]} : vector<8x192xf32> to vector<8x64xf32>
    %92 = arith.addf %91, %4 : vector<8x64xf32>
    %93 = arith.mulf %88, %92 : vector<8x64xf32>
    %94 = arith.addf %90, %93 : vector<8x64xf32>
    %95 = math.tanh %94 : vector<8x64xf32>
    %cst_35 = arith.constant 1.000000e+00 : f32
    %96 = vector.broadcast %cst_35 : f32 to vector<8x64xf32>
    %97 = arith.subf %96, %89 : vector<8x64xf32>
    %98 = arith.mulf %97, %95 : vector<8x64xf32>
    %99 = arith.mulf %89, %51 : vector<8x64xf32>
    %100 = arith.addf %98, %99 : vector<8x64xf32>
    %101 = tpu.concatenate %100, %75 in 1 : vector<8x64xf32>, vector<8x64xf32> -> vector<8x128xf32>
    %102 = arith.truncf %101 : vector<8x128xf32> to vector<8x128xbf16>
    %cst_36 = arith.constant dense<0.000000e+00> : vector<8x256xf32>
    %103 = tpu.matmul %102, %1, %cst_36 {dimension_numbers = #tpu.dot_dimension_numbers<[1], [0], [0], [1], [0, 0, 1, 1], [], []>} : vector<8x128xbf16>, vector<128x256xbf16>, vector<8x256xf32> -> vector<8x256xf32>
    %104 = vector.extract_strided_slice %103 {offsets = [0, 0], sizes = [8, 128], strides = [1, 1]} : vector<8x256xf32> to vector<8x128xf32>
    %105 = arith.addf %104, %7 : vector<8x128xf32>
    %106 = arith.negf %105 : vector<8x128xf32>
    %107 = math.exp %106 : vector<8x128xf32>
    %cst_37 = arith.constant 1.000000e+00 : f32
    %108 = vector.broadcast %cst_37 : f32 to vector<8x128xf32>
    %109 = arith.addf %108, %107 : vector<8x128xf32>
    %110 = arith.divf %108, %109 : vector<8x128xf32>
    %111 = vector.extract_strided_slice %110 {offsets = [0, 0], sizes = [8, 64], strides = [1, 1]} : vector<8x128xf32> to vector<8x64xf32>
    %112 = vector.extract_strided_slice %110 {offsets = [0, 64], sizes = [8, 64], strides = [1, 1]} : vector<8x128xf32> to vector<8x64xf32>
    %113 = vector.extract_strided_slice %103 {offsets = [0, 128], sizes = [8, 64], strides = [1, 1]} : vector<8x256xf32> to vector<8x64xf32>
    %114 = arith.addf %113, %10 : vector<8x64xf32>
    %115 = vector.extract_strided_slice %103 {offsets = [0, 192], sizes = [8, 64], strides = [1, 1]} : vector<8x256xf32> to vector<8x64xf32>
    %116 = arith.addf %115, %13 : vector<8x64xf32>
    %117 = arith.mulf %111, %116 : vector<8x64xf32>
    %118 = arith.addf %114, %117 : vector<8x64xf32>
    %119 = math.tanh %118 : vector<8x64xf32>
    %cst_38 = arith.constant 1.000000e+00 : f32
    %120 = vector.broadcast %cst_38 : f32 to vector<8x64xf32>
    %121 = arith.subf %120, %112 : vector<8x64xf32>
    %122 = arith.mulf %121, %119 : vector<8x64xf32>
    %123 = arith.mulf %112, %75 : vector<8x64xf32>
    %124 = arith.addf %122, %123 : vector<8x64xf32>
    %c0_39 = arith.constant 0 : index
    %c2 = arith.constant 2 : index
    %c0_40 = arith.constant 0 : index
    %125 = vector.load %arg13[%c0_39, %c2, %c0_40] : memref<8x8x192xf32, #tpu.memory_space<vmem>>, vector<8x1x192xf32>
    %126 = vector.shape_cast %125 : vector<8x1x192xf32> to vector<8x192xf32>
    %127 = arith.truncf %100 : vector<8x64xf32> to vector<8x64xbf16>
    %cst_41 = arith.constant dense<0.000000e+00> : vector<8x192xf32>
    %128 = tpu.matmul %127, %0, %cst_41 {dimension_numbers = #tpu.dot_dimension_numbers<[1], [0], [0], [1], [0, 0, 1, 1], [], []>} : vector<8x64xbf16>, vector<64x192xbf16>, vector<8x192xf32> -> vector<8x192xf32>
    %129 = vector.extract_strided_slice %126 {offsets = [0, 0], sizes = [8, 128], strides = [1, 1]} : vector<8x192xf32> to vector<8x128xf32>
    %130 = vector.extract_strided_slice %128 {offsets = [0, 0], sizes = [8, 128], strides = [1, 1]} : vector<8x192xf32> to vector<8x128xf32>
    %131 = arith.addf %129, %130 : vector<8x128xf32>
    %132 = arith.negf %131 : vector<8x128xf32>
    %133 = math.exp %132 : vector<8x128xf32>
    %cst_42 = arith.constant 1.000000e+00 : f32
    %134 = vector.broadcast %cst_42 : f32 to vector<8x128xf32>
    %135 = arith.addf %134, %133 : vector<8x128xf32>
    %136 = arith.divf %134, %135 : vector<8x128xf32>
    %137 = vector.extract_strided_slice %136 {offsets = [0, 0], sizes = [8, 64], strides = [1, 1]} : vector<8x128xf32> to vector<8x64xf32>
    %138 = vector.extract_strided_slice %136 {offsets = [0, 64], sizes = [8, 64], strides = [1, 1]} : vector<8x128xf32> to vector<8x64xf32>
    %139 = vector.extract_strided_slice %126 {offsets = [0, 128], sizes = [8, 64], strides = [1, 1]} : vector<8x192xf32> to vector<8x64xf32>
    %140 = vector.extract_strided_slice %128 {offsets = [0, 128], sizes = [8, 64], strides = [1, 1]} : vector<8x192xf32> to vector<8x64xf32>
    %141 = arith.addf %140, %4 : vector<8x64xf32>
    %142 = arith.mulf %137, %141 : vector<8x64xf32>
    %143 = arith.addf %139, %142 : vector<8x64xf32>
    %144 = math.tanh %143 : vector<8x64xf32>
    %cst_43 = arith.constant 1.000000e+00 : f32
    %145 = vector.broadcast %cst_43 : f32 to vector<8x64xf32>
    %146 = arith.subf %145, %138 : vector<8x64xf32>
    %147 = arith.mulf %146, %144 : vector<8x64xf32>
    %148 = arith.mulf %138, %100 : vector<8x64xf32>
    %149 = arith.addf %147, %148 : vector<8x64xf32>
    %150 = tpu.concatenate %149, %124 in 1 : vector<8x64xf32>, vector<8x64xf32> -> vector<8x128xf32>
    %151 = arith.truncf %150 : vector<8x128xf32> to vector<8x128xbf16>
    %cst_44 = arith.constant dense<0.000000e+00> : vector<8x256xf32>
    %152 = tpu.matmul %151, %1, %cst_44 {dimension_numbers = #tpu.dot_dimension_numbers<[1], [0], [0], [1], [0, 0, 1, 1], [], []>} : vector<8x128xbf16>, vector<128x256xbf16>, vector<8x256xf32> -> vector<8x256xf32>
    %153 = vector.extract_strided_slice %152 {offsets = [0, 0], sizes = [8, 128], strides = [1, 1]} : vector<8x256xf32> to vector<8x128xf32>
    %154 = arith.addf %153, %7 : vector<8x128xf32>
    %155 = arith.negf %154 : vector<8x128xf32>
    %156 = math.exp %155 : vector<8x128xf32>
    %cst_45 = arith.constant 1.000000e+00 : f32
    %157 = vector.broadcast %cst_45 : f32 to vector<8x128xf32>
    %158 = arith.addf %157, %156 : vector<8x128xf32>
    %159 = arith.divf %157, %158 : vector<8x128xf32>
    %160 = vector.extract_strided_slice %159 {offsets = [0, 0], sizes = [8, 64], strides = [1, 1]} : vector<8x128xf32> to vector<8x64xf32>
    %161 = vector.extract_strided_slice %159 {offsets = [0, 64], sizes = [8, 64], strides = [1, 1]} : vector<8x128xf32> to vector<8x64xf32>
    %162 = vector.extract_strided_slice %152 {offsets = [0, 128], sizes = [8, 64], strides = [1, 1]} : vector<8x256xf32> to vector<8x64xf32>
    %163 = arith.addf %162, %10 : vector<8x64xf32>
    %164 = vector.extract_strided_slice %152 {offsets = [0, 192], sizes = [8, 64], strides = [1, 1]} : vector<8x256xf32> to vector<8x64xf32>
    %165 = arith.addf %164, %13 : vector<8x64xf32>
    %166 = arith.mulf %160, %165 : vector<8x64xf32>
    %167 = arith.addf %163, %166 : vector<8x64xf32>
    %168 = math.tanh %167 : vector<8x64xf32>
    %cst_46 = arith.constant 1.000000e+00 : f32
    %169 = vector.broadcast %cst_46 : f32 to vector<8x64xf32>
    %170 = arith.subf %169, %161 : vector<8x64xf32>
    %171 = arith.mulf %170, %168 : vector<8x64xf32>
    %172 = arith.mulf %161, %124 : vector<8x64xf32>
    %173 = arith.addf %171, %172 : vector<8x64xf32>
    %c0_47 = arith.constant 0 : index
    %c3 = arith.constant 3 : index
    %c0_48 = arith.constant 0 : index
    %174 = vector.load %arg13[%c0_47, %c3, %c0_48] : memref<8x8x192xf32, #tpu.memory_space<vmem>>, vector<8x1x192xf32>
    %175 = vector.shape_cast %174 : vector<8x1x192xf32> to vector<8x192xf32>
    %176 = arith.truncf %149 : vector<8x64xf32> to vector<8x64xbf16>
    %cst_49 = arith.constant dense<0.000000e+00> : vector<8x192xf32>
    %177 = tpu.matmul %176, %0, %cst_49 {dimension_numbers = #tpu.dot_dimension_numbers<[1], [0], [0], [1], [0, 0, 1, 1], [], []>} : vector<8x64xbf16>, vector<64x192xbf16>, vector<8x192xf32> -> vector<8x192xf32>
    %178 = vector.extract_strided_slice %175 {offsets = [0, 0], sizes = [8, 128], strides = [1, 1]} : vector<8x192xf32> to vector<8x128xf32>
    %179 = vector.extract_strided_slice %177 {offsets = [0, 0], sizes = [8, 128], strides = [1, 1]} : vector<8x192xf32> to vector<8x128xf32>
    %180 = arith.addf %178, %179 : vector<8x128xf32>
    %181 = arith.negf %180 : vector<8x128xf32>
    %182 = math.exp %181 : vector<8x128xf32>
    %cst_50 = arith.constant 1.000000e+00 : f32
    %183 = vector.broadcast %cst_50 : f32 to vector<8x128xf32>
    %184 = arith.addf %183, %182 : vector<8x128xf32>
    %185 = arith.divf %183, %184 : vector<8x128xf32>
    %186 = vector.extract_strided_slice %185 {offsets = [0, 0], sizes = [8, 64], strides = [1, 1]} : vector<8x128xf32> to vector<8x64xf32>
    %187 = vector.extract_strided_slice %185 {offsets = [0, 64], sizes = [8, 64], strides = [1, 1]} : vector<8x128xf32> to vector<8x64xf32>
    %188 = vector.extract_strided_slice %175 {offsets = [0, 128], sizes = [8, 64], strides = [1, 1]} : vector<8x192xf32> to vector<8x64xf32>
    %189 = vector.extract_strided_slice %177 {offsets = [0, 128], sizes = [8, 64], strides = [1, 1]} : vector<8x192xf32> to vector<8x64xf32>
    %190 = arith.addf %189, %4 : vector<8x64xf32>
    %191 = arith.mulf %186, %190 : vector<8x64xf32>
    %192 = arith.addf %188, %191 : vector<8x64xf32>
    %193 = math.tanh %192 : vector<8x64xf32>
    %cst_51 = arith.constant 1.000000e+00 : f32
    %194 = vector.broadcast %cst_51 : f32 to vector<8x64xf32>
    %195 = arith.subf %194, %187 : vector<8x64xf32>
    %196 = arith.mulf %195, %193 : vector<8x64xf32>
    %197 = arith.mulf %187, %149 : vector<8x64xf32>
    %198 = arith.addf %196, %197 : vector<8x64xf32>
    %199 = tpu.concatenate %198, %173 in 1 : vector<8x64xf32>, vector<8x64xf32> -> vector<8x128xf32>
    %200 = arith.truncf %199 : vector<8x128xf32> to vector<8x128xbf16>
    %cst_52 = arith.constant dense<0.000000e+00> : vector<8x256xf32>
    %201 = tpu.matmul %200, %1, %cst_52 {dimension_numbers = #tpu.dot_dimension_numbers<[1], [0], [0], [1], [0, 0, 1, 1], [], []>} : vector<8x128xbf16>, vector<128x256xbf16>, vector<8x256xf32> -> vector<8x256xf32>
    %202 = vector.extract_strided_slice %201 {offsets = [0, 0], sizes = [8, 128], strides = [1, 1]} : vector<8x256xf32> to vector<8x128xf32>
    %203 = arith.addf %202, %7 : vector<8x128xf32>
    %204 = arith.negf %203 : vector<8x128xf32>
    %205 = math.exp %204 : vector<8x128xf32>
    %cst_53 = arith.constant 1.000000e+00 : f32
    %206 = vector.broadcast %cst_53 : f32 to vector<8x128xf32>
    %207 = arith.addf %206, %205 : vector<8x128xf32>
    %208 = arith.divf %206, %207 : vector<8x128xf32>
    %209 = vector.extract_strided_slice %208 {offsets = [0, 0], sizes = [8, 64], strides = [1, 1]} : vector<8x128xf32> to vector<8x64xf32>
    %210 = vector.extract_strided_slice %208 {offsets = [0, 64], sizes = [8, 64], strides = [1, 1]} : vector<8x128xf32> to vector<8x64xf32>
    %211 = vector.extract_strided_slice %201 {offsets = [0, 128], sizes = [8, 64], strides = [1, 1]} : vector<8x256xf32> to vector<8x64xf32>
    %212 = arith.addf %211, %10 : vector<8x64xf32>
    %213 = vector.extract_strided_slice %201 {offsets = [0, 192], sizes = [8, 64], strides = [1, 1]} : vector<8x256xf32> to vector<8x64xf32>
    %214 = arith.addf %213, %13 : vector<8x64xf32>
    %215 = arith.mulf %209, %214 : vector<8x64xf32>
    %216 = arith.addf %212, %215 : vector<8x64xf32>
    %217 = math.tanh %216 : vector<8x64xf32>
    %cst_54 = arith.constant 1.000000e+00 : f32
    %218 = vector.broadcast %cst_54 : f32 to vector<8x64xf32>
    %219 = arith.subf %218, %210 : vector<8x64xf32>
    %220 = arith.mulf %219, %217 : vector<8x64xf32>
    %221 = arith.mulf %210, %173 : vector<8x64xf32>
    %222 = arith.addf %220, %221 : vector<8x64xf32>
    %c0_55 = arith.constant 0 : index
    %c4 = arith.constant 4 : index
    %c0_56 = arith.constant 0 : index
    %223 = vector.load %arg13[%c0_55, %c4, %c0_56] : memref<8x8x192xf32, #tpu.memory_space<vmem>>, vector<8x1x192xf32>
    %224 = vector.shape_cast %223 : vector<8x1x192xf32> to vector<8x192xf32>
    %225 = arith.truncf %198 : vector<8x64xf32> to vector<8x64xbf16>
    %cst_57 = arith.constant dense<0.000000e+00> : vector<8x192xf32>
    %226 = tpu.matmul %225, %0, %cst_57 {dimension_numbers = #tpu.dot_dimension_numbers<[1], [0], [0], [1], [0, 0, 1, 1], [], []>} : vector<8x64xbf16>, vector<64x192xbf16>, vector<8x192xf32> -> vector<8x192xf32>
    %227 = vector.extract_strided_slice %224 {offsets = [0, 0], sizes = [8, 128], strides = [1, 1]} : vector<8x192xf32> to vector<8x128xf32>
    %228 = vector.extract_strided_slice %226 {offsets = [0, 0], sizes = [8, 128], strides = [1, 1]} : vector<8x192xf32> to vector<8x128xf32>
    %229 = arith.addf %227, %228 : vector<8x128xf32>
    %230 = arith.negf %229 : vector<8x128xf32>
    %231 = math.exp %230 : vector<8x128xf32>
    %cst_58 = arith.constant 1.000000e+00 : f32
    %232 = vector.broadcast %cst_58 : f32 to vector<8x128xf32>
    %233 = arith.addf %232, %231 : vector<8x128xf32>
    %234 = arith.divf %232, %233 : vector<8x128xf32>
    %235 = vector.extract_strided_slice %234 {offsets = [0, 0], sizes = [8, 64], strides = [1, 1]} : vector<8x128xf32> to vector<8x64xf32>
    %236 = vector.extract_strided_slice %234 {offsets = [0, 64], sizes = [8, 64], strides = [1, 1]} : vector<8x128xf32> to vector<8x64xf32>
    %237 = vector.extract_strided_slice %224 {offsets = [0, 128], sizes = [8, 64], strides = [1, 1]} : vector<8x192xf32> to vector<8x64xf32>
    %238 = vector.extract_strided_slice %226 {offsets = [0, 128], sizes = [8, 64], strides = [1, 1]} : vector<8x192xf32> to vector<8x64xf32>
    %239 = arith.addf %238, %4 : vector<8x64xf32>
    %240 = arith.mulf %235, %239 : vector<8x64xf32>
    %241 = arith.addf %237, %240 : vector<8x64xf32>
    %242 = math.tanh %241 : vector<8x64xf32>
    %cst_59 = arith.constant 1.000000e+00 : f32
    %243 = vector.broadcast %cst_59 : f32 to vector<8x64xf32>
    %244 = arith.subf %243, %236 : vector<8x64xf32>
    %245 = arith.mulf %244, %242 : vector<8x64xf32>
    %246 = arith.mulf %236, %198 : vector<8x64xf32>
    %247 = arith.addf %245, %246 : vector<8x64xf32>
    %248 = tpu.concatenate %247, %222 in 1 : vector<8x64xf32>, vector<8x64xf32> -> vector<8x128xf32>
    %249 = arith.truncf %248 : vector<8x128xf32> to vector<8x128xbf16>
    %cst_60 = arith.constant dense<0.000000e+00> : vector<8x256xf32>
    %250 = tpu.matmul %249, %1, %cst_60 {dimension_numbers = #tpu.dot_dimension_numbers<[1], [0], [0], [1], [0, 0, 1, 1], [], []>} : vector<8x128xbf16>, vector<128x256xbf16>, vector<8x256xf32> -> vector<8x256xf32>
    %251 = vector.extract_strided_slice %250 {offsets = [0, 0], sizes = [8, 128], strides = [1, 1]} : vector<8x256xf32> to vector<8x128xf32>
    %252 = arith.addf %251, %7 : vector<8x128xf32>
    %253 = arith.negf %252 : vector<8x128xf32>
    %254 = math.exp %253 : vector<8x128xf32>
    %cst_61 = arith.constant 1.000000e+00 : f32
    %255 = vector.broadcast %cst_61 : f32 to vector<8x128xf32>
    %256 = arith.addf %255, %254 : vector<8x128xf32>
    %257 = arith.divf %255, %256 : vector<8x128xf32>
    %258 = vector.extract_strided_slice %257 {offsets = [0, 0], sizes = [8, 64], strides = [1, 1]} : vector<8x128xf32> to vector<8x64xf32>
    %259 = vector.extract_strided_slice %257 {offsets = [0, 64], sizes = [8, 64], strides = [1, 1]} : vector<8x128xf32> to vector<8x64xf32>
    %260 = vector.extract_strided_slice %250 {offsets = [0, 128], sizes = [8, 64], strides = [1, 1]} : vector<8x256xf32> to vector<8x64xf32>
    %261 = arith.addf %260, %10 : vector<8x64xf32>
    %262 = vector.extract_strided_slice %250 {offsets = [0, 192], sizes = [8, 64], strides = [1, 1]} : vector<8x256xf32> to vector<8x64xf32>
    %263 = arith.addf %262, %13 : vector<8x64xf32>
    %264 = arith.mulf %258, %263 : vector<8x64xf32>
    %265 = arith.addf %261, %264 : vector<8x64xf32>
    %266 = math.tanh %265 : vector<8x64xf32>
    %cst_62 = arith.constant 1.000000e+00 : f32
    %267 = vector.broadcast %cst_62 : f32 to vector<8x64xf32>
    %268 = arith.subf %267, %259 : vector<8x64xf32>
    %269 = arith.mulf %268, %266 : vector<8x64xf32>
    %270 = arith.mulf %259, %222 : vector<8x64xf32>
    %271 = arith.addf %269, %270 : vector<8x64xf32>
    %c0_63 = arith.constant 0 : index
    %c5 = arith.constant 5 : index
    %c0_64 = arith.constant 0 : index
    %272 = vector.load %arg13[%c0_63, %c5, %c0_64] : memref<8x8x192xf32, #tpu.memory_space<vmem>>, vector<8x1x192xf32>
    %273 = vector.shape_cast %272 : vector<8x1x192xf32> to vector<8x192xf32>
    %274 = arith.truncf %247 : vector<8x64xf32> to vector<8x64xbf16>
    %cst_65 = arith.constant dense<0.000000e+00> : vector<8x192xf32>
    %275 = tpu.matmul %274, %0, %cst_65 {dimension_numbers = #tpu.dot_dimension_numbers<[1], [0], [0], [1], [0, 0, 1, 1], [], []>} : vector<8x64xbf16>, vector<64x192xbf16>, vector<8x192xf32> -> vector<8x192xf32>
    %276 = vector.extract_strided_slice %273 {offsets = [0, 0], sizes = [8, 128], strides = [1, 1]} : vector<8x192xf32> to vector<8x128xf32>
    %277 = vector.extract_strided_slice %275 {offsets = [0, 0], sizes = [8, 128], strides = [1, 1]} : vector<8x192xf32> to vector<8x128xf32>
    %278 = arith.addf %276, %277 : vector<8x128xf32>
    %279 = arith.negf %278 : vector<8x128xf32>
    %280 = math.exp %279 : vector<8x128xf32>
    %cst_66 = arith.constant 1.000000e+00 : f32
    %281 = vector.broadcast %cst_66 : f32 to vector<8x128xf32>
    %282 = arith.addf %281, %280 : vector<8x128xf32>
    %283 = arith.divf %281, %282 : vector<8x128xf32>
    %284 = vector.extract_strided_slice %283 {offsets = [0, 0], sizes = [8, 64], strides = [1, 1]} : vector<8x128xf32> to vector<8x64xf32>
    %285 = vector.extract_strided_slice %283 {offsets = [0, 64], sizes = [8, 64], strides = [1, 1]} : vector<8x128xf32> to vector<8x64xf32>
    %286 = vector.extract_strided_slice %273 {offsets = [0, 128], sizes = [8, 64], strides = [1, 1]} : vector<8x192xf32> to vector<8x64xf32>
    %287 = vector.extract_strided_slice %275 {offsets = [0, 128], sizes = [8, 64], strides = [1, 1]} : vector<8x192xf32> to vector<8x64xf32>
    %288 = arith.addf %287, %4 : vector<8x64xf32>
    %289 = arith.mulf %284, %288 : vector<8x64xf32>
    %290 = arith.addf %286, %289 : vector<8x64xf32>
    %291 = math.tanh %290 : vector<8x64xf32>
    %cst_67 = arith.constant 1.000000e+00 : f32
    %292 = vector.broadcast %cst_67 : f32 to vector<8x64xf32>
    %293 = arith.subf %292, %285 : vector<8x64xf32>
    %294 = arith.mulf %293, %291 : vector<8x64xf32>
    %295 = arith.mulf %285, %247 : vector<8x64xf32>
    %296 = arith.addf %294, %295 : vector<8x64xf32>
    %297 = tpu.concatenate %296, %271 in 1 : vector<8x64xf32>, vector<8x64xf32> -> vector<8x128xf32>
    %298 = arith.truncf %297 : vector<8x128xf32> to vector<8x128xbf16>
    %cst_68 = arith.constant dense<0.000000e+00> : vector<8x256xf32>
    %299 = tpu.matmul %298, %1, %cst_68 {dimension_numbers = #tpu.dot_dimension_numbers<[1], [0], [0], [1], [0, 0, 1, 1], [], []>} : vector<8x128xbf16>, vector<128x256xbf16>, vector<8x256xf32> -> vector<8x256xf32>
    %300 = vector.extract_strided_slice %299 {offsets = [0, 0], sizes = [8, 128], strides = [1, 1]} : vector<8x256xf32> to vector<8x128xf32>
    %301 = arith.addf %300, %7 : vector<8x128xf32>
    %302 = arith.negf %301 : vector<8x128xf32>
    %303 = math.exp %302 : vector<8x128xf32>
    %cst_69 = arith.constant 1.000000e+00 : f32
    %304 = vector.broadcast %cst_69 : f32 to vector<8x128xf32>
    %305 = arith.addf %304, %303 : vector<8x128xf32>
    %306 = arith.divf %304, %305 : vector<8x128xf32>
    %307 = vector.extract_strided_slice %306 {offsets = [0, 0], sizes = [8, 64], strides = [1, 1]} : vector<8x128xf32> to vector<8x64xf32>
    %308 = vector.extract_strided_slice %306 {offsets = [0, 64], sizes = [8, 64], strides = [1, 1]} : vector<8x128xf32> to vector<8x64xf32>
    %309 = vector.extract_strided_slice %299 {offsets = [0, 128], sizes = [8, 64], strides = [1, 1]} : vector<8x256xf32> to vector<8x64xf32>
    %310 = arith.addf %309, %10 : vector<8x64xf32>
    %311 = vector.extract_strided_slice %299 {offsets = [0, 192], sizes = [8, 64], strides = [1, 1]} : vector<8x256xf32> to vector<8x64xf32>
    %312 = arith.addf %311, %13 : vector<8x64xf32>
    %313 = arith.mulf %307, %312 : vector<8x64xf32>
    %314 = arith.addf %310, %313 : vector<8x64xf32>
    %315 = math.tanh %314 : vector<8x64xf32>
    %cst_70 = arith.constant 1.000000e+00 : f32
    %316 = vector.broadcast %cst_70 : f32 to vector<8x64xf32>
    %317 = arith.subf %316, %308 : vector<8x64xf32>
    %318 = arith.mulf %317, %315 : vector<8x64xf32>
    %319 = arith.mulf %308, %271 : vector<8x64xf32>
    %320 = arith.addf %318, %319 : vector<8x64xf32>
    %c0_71 = arith.constant 0 : index
    %c6 = arith.constant 6 : index
    %c0_72 = arith.constant 0 : index
    %321 = vector.load %arg13[%c0_71, %c6, %c0_72] : memref<8x8x192xf32, #tpu.memory_space<vmem>>, vector<8x1x192xf32>
    %322 = vector.shape_cast %321 : vector<8x1x192xf32> to vector<8x192xf32>
    %323 = arith.truncf %296 : vector<8x64xf32> to vector<8x64xbf16>
    %cst_73 = arith.constant dense<0.000000e+00> : vector<8x192xf32>
    %324 = tpu.matmul %323, %0, %cst_73 {dimension_numbers = #tpu.dot_dimension_numbers<[1], [0], [0], [1], [0, 0, 1, 1], [], []>} : vector<8x64xbf16>, vector<64x192xbf16>, vector<8x192xf32> -> vector<8x192xf32>
    %325 = vector.extract_strided_slice %322 {offsets = [0, 0], sizes = [8, 128], strides = [1, 1]} : vector<8x192xf32> to vector<8x128xf32>
    %326 = vector.extract_strided_slice %324 {offsets = [0, 0], sizes = [8, 128], strides = [1, 1]} : vector<8x192xf32> to vector<8x128xf32>
    %327 = arith.addf %325, %326 : vector<8x128xf32>
    %328 = arith.negf %327 : vector<8x128xf32>
    %329 = math.exp %328 : vector<8x128xf32>
    %cst_74 = arith.constant 1.000000e+00 : f32
    %330 = vector.broadcast %cst_74 : f32 to vector<8x128xf32>
    %331 = arith.addf %330, %329 : vector<8x128xf32>
    %332 = arith.divf %330, %331 : vector<8x128xf32>
    %333 = vector.extract_strided_slice %332 {offsets = [0, 0], sizes = [8, 64], strides = [1, 1]} : vector<8x128xf32> to vector<8x64xf32>
    %334 = vector.extract_strided_slice %332 {offsets = [0, 64], sizes = [8, 64], strides = [1, 1]} : vector<8x128xf32> to vector<8x64xf32>
    %335 = vector.extract_strided_slice %322 {offsets = [0, 128], sizes = [8, 64], strides = [1, 1]} : vector<8x192xf32> to vector<8x64xf32>
    %336 = vector.extract_strided_slice %324 {offsets = [0, 128], sizes = [8, 64], strides = [1, 1]} : vector<8x192xf32> to vector<8x64xf32>
    %337 = arith.addf %336, %4 : vector<8x64xf32>
    %338 = arith.mulf %333, %337 : vector<8x64xf32>
    %339 = arith.addf %335, %338 : vector<8x64xf32>
    %340 = math.tanh %339 : vector<8x64xf32>
    %cst_75 = arith.constant 1.000000e+00 : f32
    %341 = vector.broadcast %cst_75 : f32 to vector<8x64xf32>
    %342 = arith.subf %341, %334 : vector<8x64xf32>
    %343 = arith.mulf %342, %340 : vector<8x64xf32>
    %344 = arith.mulf %334, %296 : vector<8x64xf32>
    %345 = arith.addf %343, %344 : vector<8x64xf32>
    %346 = tpu.concatenate %345, %320 in 1 : vector<8x64xf32>, vector<8x64xf32> -> vector<8x128xf32>
    %347 = arith.truncf %346 : vector<8x128xf32> to vector<8x128xbf16>
    %cst_76 = arith.constant dense<0.000000e+00> : vector<8x256xf32>
    %348 = tpu.matmul %347, %1, %cst_76 {dimension_numbers = #tpu.dot_dimension_numbers<[1], [0], [0], [1], [0, 0, 1, 1], [], []>} : vector<8x128xbf16>, vector<128x256xbf16>, vector<8x256xf32> -> vector<8x256xf32>
    %349 = vector.extract_strided_slice %348 {offsets = [0, 0], sizes = [8, 128], strides = [1, 1]} : vector<8x256xf32> to vector<8x128xf32>
    %350 = arith.addf %349, %7 : vector<8x128xf32>
    %351 = arith.negf %350 : vector<8x128xf32>
    %352 = math.exp %351 : vector<8x128xf32>
    %cst_77 = arith.constant 1.000000e+00 : f32
    %353 = vector.broadcast %cst_77 : f32 to vector<8x128xf32>
    %354 = arith.addf %353, %352 : vector<8x128xf32>
    %355 = arith.divf %353, %354 : vector<8x128xf32>
    %356 = vector.extract_strided_slice %355 {offsets = [0, 0], sizes = [8, 64], strides = [1, 1]} : vector<8x128xf32> to vector<8x64xf32>
    %357 = vector.extract_strided_slice %355 {offsets = [0, 64], sizes = [8, 64], strides = [1, 1]} : vector<8x128xf32> to vector<8x64xf32>
    %358 = vector.extract_strided_slice %348 {offsets = [0, 128], sizes = [8, 64], strides = [1, 1]} : vector<8x256xf32> to vector<8x64xf32>
    %359 = arith.addf %358, %10 : vector<8x64xf32>
    %360 = vector.extract_strided_slice %348 {offsets = [0, 192], sizes = [8, 64], strides = [1, 1]} : vector<8x256xf32> to vector<8x64xf32>
    %361 = arith.addf %360, %13 : vector<8x64xf32>
    %362 = arith.mulf %356, %361 : vector<8x64xf32>
    %363 = arith.addf %359, %362 : vector<8x64xf32>
    %364 = math.tanh %363 : vector<8x64xf32>
    %cst_78 = arith.constant 1.000000e+00 : f32
    %365 = vector.broadcast %cst_78 : f32 to vector<8x64xf32>
    %366 = arith.subf %365, %357 : vector<8x64xf32>
    %367 = arith.mulf %366, %364 : vector<8x64xf32>
    %368 = arith.mulf %357, %320 : vector<8x64xf32>
    %369 = arith.addf %367, %368 : vector<8x64xf32>
    %c0_79 = arith.constant 0 : index
    %c7 = arith.constant 7 : index
    %c0_80 = arith.constant 0 : index
    %370 = vector.load %arg13[%c0_79, %c7, %c0_80] : memref<8x8x192xf32, #tpu.memory_space<vmem>>, vector<8x1x192xf32>
    %371 = vector.shape_cast %370 : vector<8x1x192xf32> to vector<8x192xf32>
    %372 = arith.truncf %345 : vector<8x64xf32> to vector<8x64xbf16>
    %cst_81 = arith.constant dense<0.000000e+00> : vector<8x192xf32>
    %373 = tpu.matmul %372, %0, %cst_81 {dimension_numbers = #tpu.dot_dimension_numbers<[1], [0], [0], [1], [0, 0, 1, 1], [], []>} : vector<8x64xbf16>, vector<64x192xbf16>, vector<8x192xf32> -> vector<8x192xf32>
    %374 = vector.extract_strided_slice %371 {offsets = [0, 0], sizes = [8, 128], strides = [1, 1]} : vector<8x192xf32> to vector<8x128xf32>
    %375 = vector.extract_strided_slice %373 {offsets = [0, 0], sizes = [8, 128], strides = [1, 1]} : vector<8x192xf32> to vector<8x128xf32>
    %376 = arith.addf %374, %375 : vector<8x128xf32>
    %377 = arith.negf %376 : vector<8x128xf32>
    %378 = math.exp %377 : vector<8x128xf32>
    %cst_82 = arith.constant 1.000000e+00 : f32
    %379 = vector.broadcast %cst_82 : f32 to vector<8x128xf32>
    %380 = arith.addf %379, %378 : vector<8x128xf32>
    %381 = arith.divf %379, %380 : vector<8x128xf32>
    %382 = vector.extract_strided_slice %381 {offsets = [0, 0], sizes = [8, 64], strides = [1, 1]} : vector<8x128xf32> to vector<8x64xf32>
    %383 = vector.extract_strided_slice %381 {offsets = [0, 64], sizes = [8, 64], strides = [1, 1]} : vector<8x128xf32> to vector<8x64xf32>
    %384 = vector.extract_strided_slice %371 {offsets = [0, 128], sizes = [8, 64], strides = [1, 1]} : vector<8x192xf32> to vector<8x64xf32>
    %385 = vector.extract_strided_slice %373 {offsets = [0, 128], sizes = [8, 64], strides = [1, 1]} : vector<8x192xf32> to vector<8x64xf32>
    %386 = arith.addf %385, %4 : vector<8x64xf32>
    %387 = arith.mulf %382, %386 : vector<8x64xf32>
    %388 = arith.addf %384, %387 : vector<8x64xf32>
    %389 = math.tanh %388 : vector<8x64xf32>
    %cst_83 = arith.constant 1.000000e+00 : f32
    %390 = vector.broadcast %cst_83 : f32 to vector<8x64xf32>
    %391 = arith.subf %390, %383 : vector<8x64xf32>
    %392 = arith.mulf %391, %389 : vector<8x64xf32>
    %393 = arith.mulf %383, %345 : vector<8x64xf32>
    %394 = arith.addf %392, %393 : vector<8x64xf32>
    %395 = tpu.concatenate %394, %369 in 1 : vector<8x64xf32>, vector<8x64xf32> -> vector<8x128xf32>
    %396 = arith.truncf %395 : vector<8x128xf32> to vector<8x128xbf16>
    %cst_84 = arith.constant dense<0.000000e+00> : vector<8x256xf32>
    %397 = tpu.matmul %396, %1, %cst_84 {dimension_numbers = #tpu.dot_dimension_numbers<[1], [0], [0], [1], [0, 0, 1, 1], [], []>} : vector<8x128xbf16>, vector<128x256xbf16>, vector<8x256xf32> -> vector<8x256xf32>
    %398 = vector.extract_strided_slice %397 {offsets = [0, 0], sizes = [8, 128], strides = [1, 1]} : vector<8x256xf32> to vector<8x128xf32>
    %399 = arith.addf %398, %7 : vector<8x128xf32>
    %400 = arith.negf %399 : vector<8x128xf32>
    %401 = math.exp %400 : vector<8x128xf32>
    %cst_85 = arith.constant 1.000000e+00 : f32
    %402 = vector.broadcast %cst_85 : f32 to vector<8x128xf32>
    %403 = arith.addf %402, %401 : vector<8x128xf32>
    %404 = arith.divf %402, %403 : vector<8x128xf32>
    %405 = vector.extract_strided_slice %404 {offsets = [0, 0], sizes = [8, 64], strides = [1, 1]} : vector<8x128xf32> to vector<8x64xf32>
    %406 = vector.extract_strided_slice %404 {offsets = [0, 64], sizes = [8, 64], strides = [1, 1]} : vector<8x128xf32> to vector<8x64xf32>
    %407 = vector.extract_strided_slice %397 {offsets = [0, 128], sizes = [8, 64], strides = [1, 1]} : vector<8x256xf32> to vector<8x64xf32>
    %408 = arith.addf %407, %10 : vector<8x64xf32>
    %409 = vector.extract_strided_slice %397 {offsets = [0, 192], sizes = [8, 64], strides = [1, 1]} : vector<8x256xf32> to vector<8x64xf32>
    %410 = arith.addf %409, %13 : vector<8x64xf32>
    %411 = arith.mulf %405, %410 : vector<8x64xf32>
    %412 = arith.addf %408, %411 : vector<8x64xf32>
    %413 = math.tanh %412 : vector<8x64xf32>
    %cst_86 = arith.constant 1.000000e+00 : f32
    %414 = vector.broadcast %cst_86 : f32 to vector<8x64xf32>
    %415 = arith.subf %414, %406 : vector<8x64xf32>
    %416 = arith.mulf %415, %413 : vector<8x64xf32>
    %417 = arith.mulf %406, %369 : vector<8x64xf32>
    %418 = arith.addf %416, %417 : vector<8x64xf32>
    %c0_87 = arith.constant 0 : index
    %c0_88 = arith.constant 0 : index
    %419 = vector.load %arg10[%c0_87, %c0_88] : memref<1x64xf32, #tpu.memory_space<vmem>>, vector<1x64xf32>
    %420 = vector.broadcast %419 : vector<1x64xf32> to vector<8x64xf32>
    %421 = arith.mulf %418, %420 : vector<8x64xf32>
    %cst_89 = arith.constant dense<0.000000e+00> : vector<8xf32>
    %422 = vector.multi_reduction <add>, %421, %cst_89 [1] : vector<8x64xf32> to vector<8xf32>
    %423 = vector.shape_cast %422 : vector<8xf32> to vector<8x1xf32>
    %c0_90 = arith.constant 0 : index
    %c0_91 = arith.constant 0 : index
    %424 = vector.load %arg11[%c0_90, %c0_91] : memref<1x1xf32, #tpu.memory_space<vmem>>, vector<1x1xf32>
    %425 = vector.broadcast %424 : vector<1x1xf32> to vector<8x1xf32>
    %426 = arith.addf %423, %425 : vector<8x1xf32>
    %c0_92 = arith.constant 0 : index
    %c0_93 = arith.constant 0 : index
    %427 = vector.load %arg12[%c0_92, %c0_93] : memref<8x1xf32, #tpu.memory_space<vmem>>, vector<8x1xf32>
    tpu.vector_store %arg12[%c0_92, %c0_93], %426 {strides = array<i32>} : memref<8x1xf32, #tpu.memory_space<vmem>>, vector<8x1xf32>,
    return
  }
  func.func @transform_0(%arg0: i32) -> (i32, i32, i32) {
    %c0_i32 = arith.constant 0 : i32
    %c0_i32_0 = arith.constant 0 : i32
    %c0_i32_1 = arith.constant 0 : i32
    %c0_i32_2 = arith.constant 0 : i32
    return %c0_i32, %c0_i32_0, %c0_i32_1 : i32, i32, i32
  }
  func.func @transform_1(%arg0: i32) -> (i32, i32) {
    %c0_i32 = arith.constant 0 : i32
    %c0_i32_0 = arith.constant 0 : i32
    %c0_i32_1 = arith.constant 0 : i32
    return %c0_i32, %c0_i32_0 : i32, i32
  }
  func.func @transform_2(%arg0: i32) -> (i32, i32) {
    %c0_i32 = arith.constant 0 : i32
    %c0_i32_0 = arith.constant 0 : i32
    %c0_i32_1 = arith.constant 0 : i32
    return %c0_i32, %c0_i32_0 : i32, i32
  }
  func.func @transform_3(%arg0: i32) -> (i32, i32) {
    %c0_i32 = arith.constant 0 : i32
    %c0_i32_0 = arith.constant 0 : i32
    %c0_i32_1 = arith.constant 0 : i32
    return %c0_i32, %c0_i32_0 : i32, i32
  }
  func.func @transform_4(%arg0: i32) -> (i32, i32) {
    %c0_i32 = arith.constant 0 : i32
    %c0_i32_0 = arith.constant 0 : i32
    %c0_i32_1 = arith.constant 0 : i32
    return %c0_i32, %c0_i32_0 : i32, i32
  }
  func.func @transform_5(%arg0: i32) -> (i32, i32) {
    %c0_i32 = arith.constant 0 : i32
    %c0_i32_0 = arith.constant 0 : i32
    %c0_i32_1 = arith.constant 0 : i32
    return %c0_i32, %c0_i32_0 : i32, i32
  }
  func.func @transform_6(%arg0: i32) -> (i32, i32) {
    %c0_i32 = arith.constant 0 : i32
    %c0_i32_0 = arith.constant 0 : i32
    %c0_i32_1 = arith.constant 0 : i32
    return %c0_i32, %c0_i32_0 : i32, i32
  }
  func.func @transform_7(%arg0: i32) -> (i32, i32) {
    %c0_i32 = arith.constant 0 : i32
    %c0_i32_0 = arith.constant 0 : i32
    %c0_i32_1 = arith.constant 0 : i32
    return %c0_i32, %c0_i32_0 : i32, i32
  }
  func.func @transform_8(%arg0: i32) -> (i32, i32) {
    %c0_i32 = arith.constant 0 : i32
    %c0_i32_0 = arith.constant 0 : i32
    %c0_i32_1 = arith.constant 0 : i32
    return %c0_i32, %c0_i32_0 : i32, i32
  }
  func.func @transform_9(%arg0: i32) -> (i32, i32) {
    %c0_i32 = arith.constant 0 : i32
    %c0_i32_0 = arith.constant 0 : i32
    %c0_i32_1 = arith.constant 0 : i32
    return %c0_i32, %c0_i32_0 : i32, i32
  }
  func.func @transform_10(%arg0: i32) -> (i32, i32) {
    %c0_i32 = arith.constant 0 : i32
    %c0_i32_0 = arith.constant 0 : i32
    %c0_i32_1 = arith.constant 0 : i32
    return %c0_i32, %c0_i32_0 : i32, i32
  }
  func.func @transform_11(%arg0: i32) -> (i32, i32) {
    %c0_i32 = arith.constant 0 : i32
    %c0_i32_0 = arith.constant 0 : i32
    %c0_i32_1 = arith.constant 0 : i32
    return %c0_i32, %c0_i32_0 : i32, i32
  }
}

</mosaic_0001>

<bundles_post_ra>
// kernel: tpu_custom_call.1
= control target key start
LH: loop header
LB: loop body
LE: loop exit
PB: predicated region body
PF: predicated region fallthrough
CT: control target
= control target key end

     0   :  { %s7561_s0 = inlined_call_operand.vmem [shape: f32[8,8,1], index: 0, kind: input, shape index: {}]   ;;  %s7562_s1 = inlined_call_operand.vmem [shape: f32[1,192], index: 1, kind: input, shape index: {}]   ;;  %s7563_s2 = inlined_call_operand.vmem [shape: f32[1,192], index: 2, kind: input, shape index: {}]   ;;  %s7564_s3 = inlined_call_operand.vmem [shape: bf16[64,192], index: 3, kind: input, shape index: {}]   ;;  %s7565_s4 = inlined_call_operand.vmem [shape: f32[1,64], index: 4, kind: input, shape index: {}]   ;;  %s7566_s5 = inlined_call_operand.hbm [shape: bf16[128,256], index: 5, kind: input, shape index: {}]   ;;  %s7567_s6 = inlined_call_operand.vmem [shape: f32[1,128], index: 6, kind: input, shape index: {}]   ;;  %s7568_s7 = inlined_call_operand.vmem [shape: f32[1,64], index: 7, kind: input, shape index: {}]   ;;  %s7569_s8 = inlined_call_operand.vmem [shape: f32[1,64], index: 8, kind: input, shape index: {}]   ;;  %s7570_s9 = inlined_call_operand.vmem [shape: f32[1,64], index: 9, kind: input, shape index: {}]   ;;  %s7571_s10 = inlined_call_operand.<no memory space> [shape: f32[1,1], index: 10, kind: input, shape index: {}]   ;;  %s7572_s11 = inlined_call_operand.vmem [shape: f32[8,1], index: 11, kind: output, shape index: {}]  }
   0x1   :  { %v16_v0 = vstv %s7571_s10 }
   0x2   :  { %17 = vst [vmem:[#allocation3] sm:$0x1] %v16_v0 }
   0x3   :  { %18 = vsyncpa [#allocation5], 0  ;;  %s33_s21 = sshll.u32 %s7566_s5, 4  ;;  %s4860_s22 = smov [#allocation4]   ;;  %s34_s21 = int_to_ptr.hbm [resolvable:$true] %s33_s21 }
   0x4   :  { %s35_s23 = sshll.u32 %s4860_s22, 4  ;;  %s4861_s24 = smov 128   ;;  %s36_s23 = int_to_ptr.vmem [resolvable:$true] %s35_s23 }
   0x5   :  { %s4862_s25 = smov 8  }
   0x6   :  { %41 = dma.hbm_to_vmem [thread:$0]  %s34_s21, 2048, %s36_s23, [#allocation5], %s4861_s24, %s4861_s24, %s4862_s25  }
   0x7   :  { %4858 = dma.done.wait [#allocation5], 2048  }
   0x8   :  { %4859 = vsyncadd [#allocation5], 4294965248  ;;  %v4863_v1 = vmov 0   ;;  %v97_v2 = vld [vmem:[%s7561_s0 + $0x8] sm:$0xff]  ;;  %v4193_v3 = vld [vmem:[%s7564_s3 + $0x30] sm:$0xf] }
   0x9   :  { %4384 = vset.pattern.permute.xlu0 %v4863_v1  ;;  %4385 = vset.pattern.permute.xlu1 %v4863_v1  ;;  %v4362_v4 = vld [vmem:[%s7564_s3 + $0x34] sm:$0xf0]  ;;  %v4185_v6 = vld [vmem:[%s7564_s3 + $0x20] sm:$0xf]  ;;  %v4360_v7 = vld [vmem:[%s7564_s3 + $0x24] sm:$0xf0] }
   0xa   :  { %4386 = vset.pattern.permute.xlu2 %v4863_v1  ;;  %112 = vperm.xlu0 %4384, %v97_v2   ;;  %v4940_v5 = vor.u32 %v4362_v4, %v4193_v3  ;;  %v96_v8 = vld [vmem:[%s7561_s0] sm:$0xff]  ;;  %v4952_v9 = vor.u32 %v4360_v7, %v4185_v6  ;;  %v4177_v10 = vld [vmem:[%s7564_s3 + $0x10] sm:$0xf]  ;;  %v4358_v11 = vld [vmem:[%s7564_s3 + $0x14] sm:$0xf0]  ;;  %vm7573_vm0 = vcmask 523264  }
   0xb   :  { %107 = vperm.xlu1 %4385, %v96_v8   ;;  %v4361_v12 = vld [vmem:[%s7564_s3 + $0x34] sm:$0xf]  ;;  %v4195_v13 = vld [vmem:[%s7564_s3 + $0x38] sm:$0xf0]  ;;  %v4359_v15 = vld [vmem:[%s7564_s3 + $0x24] sm:$0xf]  ;;  %v4979_v18 = vor.u32 %v4358_v11, %v4177_v10 }
   0xc   :  { %7655 = vst [vmem:[#allocation7_spill] sm:$0xff] %v4940_v5  ;;  %267 = vmatpush.bf16.msra.mxu2 %v4940_v5  ;;  %838 = vmatpush.bf16.msra.mxu0 %v4940_v5  ;;  %v4967_v14 = vor.u32 %v4361_v12, %v4195_v13  ;;  %v4187_v16 = vld [vmem:[%s7564_s3 + $0x28] sm:$0xf0]  ;;  %v98_v17 = vld [vmem:[%s7561_s0 + $0x10] sm:$0xff]  ;;  %v4169_v19 = vld [vmem:[%s7564_s3] sm:$0xf] }
   0xd   :  { %7656 = vst [vmem:[#allocation8_spill] sm:$0xff] %v4952_v9  ;;  %v100_v20 = vld [vmem:[%s7561_s0 + $0x20] sm:$0xff]  ;;  %v4356_v21 = vld [vmem:[%s7564_s3 + $0x4] sm:$0xf0]  ;;  %v99_v22 = vld [vmem:[%s7561_s0 + $0x18] sm:$0xff]  ;;  %v4994_v23 = vor.u32 %v4359_v15, %v4187_v16  ;;  %s4864_s13 = smov 64  }
   0xe   :  { %7657 = vst [vmem:[#allocation9_spill] sm:$0xff] %v4967_v14  ;;  %280 = vmatpush.bf16.msra.mxu3 %v4967_v14  ;;  %127 = vperm.xlu2 %4386, %v100_v20   ;;  %v4357_v24 = vld [vmem:[%s7564_s3 + $0x14] sm:$0xf]  ;;  %v4179_v25 = vld [vmem:[%s7564_s3 + $0x18] sm:$0xf0]  ;;  %v5005_v26 = vor.u32 %v4356_v21, %v4169_v19  ;;  %v101_v30 = vld [vmem:[%s7561_s0 + $0x28] sm:$0xff] }
   0xf   :  { %7658 = vst [vmem:[#allocation10_spill] sm:$0xff] %v4979_v18  ;;  %851 = vmatpush.bf16.msra.mxu1 %v4967_v14  ;;  %v5008_v27 = vor.u32 %v4357_v24, %v4179_v25  ;;  %v4355_v28 = vld [vmem:[%s7564_s3 + $0x4] sm:$0xf]  ;;  %v4171_v29 = vld [vmem:[%s7564_s3 + $0x8] sm:$0xf0]  ;;  %v102_v31 = vld [vmem:[%s7561_s0 + $0x30] sm:$0xff] }
  0x10   :  { %268 = vmatpush.bf16.msra.mxu2 %v4952_v9  ;;  %7659 = vst [vmem:[#allocation11_spill] sm:$0xff] %v4994_v23  ;;  %839 = vmatpush.bf16.msra.mxu0 %v4952_v9  ;;  %v103_v32 = vld [vmem:[%s7561_s0 + $0x38] sm:$0xff]  ;;  %v5029_v33 = vor.u32 %v4355_v28, %v4171_v29  ;;  %v104_v34 = vld [vmem:[%s7562_s1] sm:$0x3] }
  0x11   :  { %7660 = vst [vmem:[#allocation12_spill] sm:$0xff] %v5005_v26  ;;  %v166_v35 = vld [vmem:[%s7563_s2] sm:$0x3]  ;;  %v146_v36 = vperm.slane %v104_v34, 0  ;;  %v147_v37 = vperm.slane %v104_v34, 1 }
  0x12   :  { %117 = vperm.xlu0 %4384, %v98_v17   ;;  %281 = vmatpush.bf16.msra.mxu3 %v4994_v23  ;;  %7661 = vst [vmem:[#allocation13_spill] sm:$0xff] %v5008_v27  ;;  %v168_v39 = vperm.slane %v166_v35, 0  ;;  %v169_v40 = vperm.slane %v166_v35, 1 }
  0x13   :  { %122 = vperm.xlu1 %4385, %v99_v22   ;;  %852 = vmatpush.bf16.msra.mxu1 %v4994_v23  ;;  %7662 = vst [vmem:[#allocation14_spill] sm:$0xff] %v5029_v33 }
  0x14   :  { %269 = vmatpush.bf16.msra.mxu2 %v4979_v18  ;;  %840 = vmatpush.bf16.msra.mxu0 %v4979_v18 }
  0x16   :  { %282 = vmatpush.bf16.msra.mxu3 %v5008_v27  ;;  %132 = vperm.xlu2 %4386, %v101_v30  }
  0x17   :  { %853 = vmatpush.bf16.msra.mxu1 %v5008_v27 }
  0x18   :  { %270 = vmatpush.bf16.msra.mxu2 %v5005_v26  ;;  %841 = vmatpush.bf16.msra.mxu0 %v5005_v26 }
  0x1a   :  { %137 = vperm.xlu0 %4384, %v102_v31   ;;  %283 = vmatpush.bf16.msra.mxu3 %v5029_v33 }
  0x1b   :  { %271 = vmatmul.bf16.vlgmr.msra.gmra.mxu2 %v4863_v1  ;;  %142 = vperm.xlu1 %4385, %v103_v32  }
  0x1c   :  { %854 = vmatpush.bf16.msra.mxu1 %v5029_v33 }
  0x1d   :  { %284 = vmatmul.bf16.vlgmr.msra.gmra.mxu3 %v4863_v1 }
  0x68   :  { %v128_v38 = vpop.permute.xlu2 %127 }
  0x69   :  { %v158_v41 = vmul.f32 %v146_v36, %v128_v38  ;;  %v159_v42 = vmul.f32 %v147_v37, %v128_v38 }
  0x6b   :  { %v180_v43 = vadd.f32 %v168_v39, %v158_v41  ;;  %v181_v44 = vadd.f32 %v169_v40, %v159_v42 }
  0x6d   :  { %197 = vst [vmem:[#allocation2 + $0x40] sm:$0xff] %v180_v43 }
  0x6e   :  { %198 = vst.msk [vmem:[#allocation2 + $0x48] sm:$0xff] %vm7573_vm0, %v181_v44 }
  0x70   :  { %v133_v45 = vpop.permute.xlu2 %132 }
  0x71   :  { %v160_v46 = vmul.f32 %v146_v36, %v133_v45  ;;  %v161_v47 = vmul.f32 %v147_v37, %v133_v45 }
  0x73   :  { %v182_v48 = vadd.f32 %v168_v39, %v160_v46  ;;  %v183_v49 = vadd.f32 %v169_v40, %v161_v47 }
  0x75   :  { %199 = vst [vmem:[#allocation2 + $0x50] sm:$0xff] %v182_v48  ;;  %v5053_v22 = vld [vmem:[#allocation2 + $0x40] ss:$8 sm:$0x3] }
  0x76   :  { %200 = vst.msk [vmem:[#allocation2 + $0x58] sm:$0xff] %vm7573_vm0, %v183_v49 }
  0x7c   :  { %v113_v50 = vpop.permute.xlu0 %112 }
  0x7d   :  { %v152_v51 = vmul.f32 %v146_v36, %v113_v50  ;;  %v153_v52 = vmul.f32 %v147_v37, %v113_v50  ;;  %v108_v53 = vpop.permute.xlu1 %107  ;;  %v5051_v21 = vld [vmem:[#allocation2 + $0x50] ss:$8 sm:$0x3] }
  0x7e   :  { %v150_v56 = vmul.f32 %v146_v36, %v108_v53  ;;  %v151_v57 = vmul.f32 %v147_v37, %v108_v53  ;;  %v5072_v53 = vld [vmem:[%s7565_s4] ss:$0 sm:$0xff] }
  0x7f   :  { %v174_v54 = vadd.f32 %v168_v39, %v152_v51  ;;  %v175_v55 = vadd.f32 %v169_v40, %v153_v52 }
  0x80   :  { %v172_v58 = vadd.f32 %v168_v39, %v150_v56  ;;  %v173_v59 = vadd.f32 %v169_v40, %v151_v57 }
  0x81   :  { %191 = vst [vmem:[#allocation2 + $0x10] sm:$0xff] %v174_v54 }
  0x82   :  { %192 = vst.msk [vmem:[#allocation2 + $0x18] sm:$0xff] %vm7573_vm0, %v175_v55 }
  0x83   :  { %188 = vst [vmem:[#allocation2] sm:$0xff] %v172_v58 }
  0x84   :  { %v118_v60 = vpop.permute.xlu0 %117  ;;  %190 = vst.msk [vmem:[#allocation2 + $0x8] sm:$0xff] %vm7573_vm0, %v173_v59 }
  0x85   :  { %v154_v61 = vmul.f32 %v146_v36, %v118_v60  ;;  %v155_v62 = vmul.f32 %v147_v37, %v118_v60  ;;  %v123_v63 = vpop.permute.xlu1 %122 }
  0x86   :  { %v156_v2 = vmul.f32 %v146_v36, %v123_v63  ;;  %v157_v3 = vmul.f32 %v147_v37, %v123_v63 }
  0x87   :  { %v176_v0 = vadd.f32 %v168_v39, %v154_v61  ;;  %v177_v1 = vadd.f32 %v169_v40, %v155_v62 }
  0x88   :  { %v178_v4 = vadd.f32 %v168_v39, %v156_v2  ;;  %v179_v6 = vadd.f32 %v169_v40, %v157_v3 }
  0x89   :  { %193 = vst [vmem:[#allocation2 + $0x20] sm:$0xff] %v176_v0  ;;  %v5055_v25 = vld [vmem:[#allocation2 + $0x10] ss:$8 sm:$0x3] }
  0x8a   :  { %194 = vst.msk [vmem:[#allocation2 + $0x28] sm:$0xff] %vm7573_vm0, %v177_v1 }
  0x8b   :  { %195 = vst [vmem:[#allocation2 + $0x30] sm:$0xff] %v178_v4  ;;  %v5049_v20 = vld [vmem:[#allocation2] ss:$8 sm:$0x3]  ;;  %v497_v4 = vrot.slane %v5055_v25, 1 }
  0x8c   :  { %v138_v7 = vpop.permute.xlu0 %137  ;;  %196 = vst.msk [vmem:[#allocation2 + $0x38] sm:$0xff] %vm7573_vm0, %v179_v6  ;;  %v496_v3 = vrot.slane %v5049_v20, 1 }
  0x8d   :  { %v162_v8 = vmul.f32 %v146_v36, %v138_v7  ;;  %v163_v10 = vmul.f32 %v147_v37, %v138_v7  ;;  %v143_v11 = vpop.permute.xlu1 %142 }
  0x8e   :  { %v164_v15 = vmul.f32 %v146_v36, %v143_v11  ;;  %v165_v16 = vmul.f32 %v147_v37, %v143_v11 }
  0x8f   :  { %v184_v12 = vadd.f32 %v168_v39, %v162_v8  ;;  %v185_v13 = vadd.f32 %v169_v40, %v163_v10 }
  0x90   :  { %v186_v17 = vadd.f32 %v168_v39, %v164_v15  ;;  %v187_v19 = vadd.f32 %v169_v40, %v165_v16 }
  0x91   :  { %201 = vst [vmem:[#allocation2 + $0x60] sm:$0xff] %v184_v12  ;;  %v5060_v36 = vld [vmem:[#allocation2 + $0x20] ss:$8 sm:$0x3] }
  0x92   :  { %202 = vst.msk [vmem:[#allocation2 + $0x68] sm:$0xff] %vm7573_vm0, %v185_v13  ;;  %v498_v8 = vrot.slane %v5060_v36, 1 }
  0x93   :  { %203 = vst [vmem:[#allocation2 + $0x70] sm:$0xff] %v186_v17  ;;  %v5057_v28 = vld [vmem:[#allocation2 + $0x30] ss:$8 sm:$0x3] }
  0x94   :  { %204 = vst.msk [vmem:[#allocation2 + $0x78] sm:$0xff] %vm7573_vm0, %v187_v19 }
  0x99   :  { %v5075_v55 = vld [vmem:[#allocation2 + $0x60] ss:$8 sm:$0x3] }
  0x9b   :  { %v5067_v43 = vld [vmem:[#allocation2 + $0x70] ss:$8 sm:$0x3] }
  0x9e   :  { %v272_v24 = vpop.f32.mrf.mxu2 }
  0x9f   :  { %v290_v29 = vrot.slane %v272_v24, 1  ;;  %v291_v30 = vrot.slane %v272_v24, 2  ;;  %v292_v31 = vrot.slane %v272_v24, 3  ;;  %v293_v32 = vrot.slane %v272_v24, 4 }
  0xa0   :  { %v294_v34 = vrot.slane %v272_v24, 5  ;;  %v304_v35 = vadd.f32 %v272_v24, %v5049_v20  ;;  %v296_v44 = vrot.slane %v272_v24, 7  ;;  %v285_v45 = vpop.f32.mrf.mxu3  ;;  %v295_v48 = vrot.slane %v272_v24, 6 }
  0xa1   :  { %v306_v37 = vadd.f32 %v291_v30, %v5060_v36  ;;  %v305_v38 = vadd.f32 %v290_v29, %v5055_v25  ;;  %v308_v39 = vadd.f32 %v293_v32, %v5053_v22  ;;  %v307_v40 = vadd.f32 %v292_v31, %v5057_v28 }
  0xa2   :  { %v4199_v41 = vmul.f32 -1.442695, %v304_v35  ;;  %v309_v42 = vadd.f32 %v294_v34, %v5051_v21  ;;  %v311_v54 = vadd.f32 %v296_v44, %v5067_v43  ;;  %v310_v56 = vadd.f32 %v295_v48, %v5075_v55 }
  0xa3   :  { %v4201_v46 = vmul.f32 -1.442695, %v306_v37  ;;  %v4200_v47 = vmul.f32 -1.442695, %v305_v38  ;;  %v4203_v50 = vmul.f32 -1.442695, %v308_v39  ;;  %v5079_v58 = vadd.f32 %v5072_v53, %v285_v45 }
  0xa4   :  { %4393 = vpow2.f32 %v4199_v41  ;;  %v4204_v49 = vmul.f32 -1.442695, %v309_v42  ;;  %v4202_v51 = vmul.f32 -1.442695, %v307_v40  ;;  %v4206_v62 = vmul.f32 -1.442695, %v311_v54 }
  0xa5   :  { %4395 = vpow2.f32 %v4201_v46  ;;  %v4205_v1 = vmul.f32 -1.442695, %v310_v56  ;;  %v467_v7 = vrot.slane %v5079_v58, 2  ;;  %v466_v10 = vrot.slane %v5079_v58, 1 }
  0xa6   :  { %v274_v52 = vpop.f32.mrf.mxu2  ;;  %4397 = vpow2.f32 %v4200_v47  ;;  %v470_v15 = vrot.slane %v5079_v58, 5  ;;  %v469_v30 = vrot.slane %v5079_v58, 4 }
  0xa7   :  { %4399 = vpow2.f32 %v4204_v49 }
  0xa8   :  { %4401 = vpow2.f32 %v4203_v50  ;;  %v287_v60 = vpop.f32.mrf.mxu3 }
  0xa9   :  { %4403 = vpow2.f32 %v4202_v51 }
  0xaa   :  { %v4394_v57 = vpop.eup %4393 }
  0xab   :  { %v4396_v59 = vpop.eup %4395  ;;  %v5081_v61 = vadd.f32 1.0, %v4394_v57 }
  0xac   :  { %v4398_v63 = vpop.eup %4397  ;;  %v5083_v0 = vadd.f32 1.0, %v4396_v59 }
  0xad   :  { %v4400_v2 = vpop.eup %4399  ;;  %4405 = vrcp.f32 %v5081_v61  ;;  %v5092_v12 = vadd.f32 1.0, %v4398_v63  ;;  %v353_v16 = vand.u32 2147483647, %v5081_v61  ;;  %v355_v17 = vand.u32 2147483648, %v5081_v61 }
  0xae   :  { %v4402_v6 = vpop.eup %4401  ;;  %4407 = vrcp.f32 %v5083_v0  ;;  %v5094_v13 = vadd.f32 1.0, %v4400_v2  ;;  %v383_v24 = vand.u32 2147483647, %v5083_v0  ;;  %v385_v29 = vand.u32 2147483648, %v5083_v0 }
  0xaf   :  { %v4404_v11 = vpop.eup %4403  ;;  %4409 = vpow2.f32 %v4206_v62  ;;  %v5099_v19 = vadd.f32 1.0, %v4402_v6  ;;  %v370_v31 = vand.u32 2147483648, %v5092_v12  ;;  %vm349_vm1 = vweird.f32 %v5081_v61 }
  0xb0   :  { %4411 = vpow2.f32 %v4205_v1  ;;  %v5107_v32 = vadd.f32 1.0, %v4404_v11  ;;  %vm379_vm2 = vweird.f32 %v5083_v0  ;;  %v430_v37 = vand.u32 2147483648, %v5094_v13 }
  0xb1   :  { %4413 = vrcp.f32 %v5092_v12  ;;  %vm5115_vm3 = vcmp.eq.f32.partialorder %v353_v16, 8.507059e+37  ;;  %v356_v41 = vor.u32 1.1754944e-38, %v355_v17  ;;  %v368_v42 = vand.u32 2147483647, %v5092_v12 }
  0xb2   :  { %4415 = vrcp.f32 %v5094_v13  ;;  %vm5121_vm4 = vcmp.eq.f32.partialorder %v383_v24, 8.507059e+37  ;;  %v386_v47 = vor.u32 1.1754944e-38, %v385_v29  ;;  %v428_v48 = vand.u32 2147483647, %v5094_v13 }
  0xb3   :  { %v4406_v35 = vpop.eup %4405  ;;  %4417 = vrcp.f32 %v5099_v19  ;;  %v415_v49 = vand.u32 2147483648, %v5099_v19  ;;  %vm364_vm5 = vweird.f32 %v5092_v12  ;;  %v371_v52 = vor.u32 1.1754944e-38, %v370_v31 }
  0xb4   :  { %v4408_v38 = vpop.eup %4407  ;;  %v345_v39 = vmul.f32 %v4406_v35, %v5081_v61  ;;  %v413_v54 = vand.u32 2147483647, %v5099_v19  ;;  %4419 = vrcp.f32 %v5107_v32  ;;  %vm350_vm6 = vweird.f32 %v4406_v35 }
  0xb5   :  { %v4410_v44 = vpop.eup %4409  ;;  %v375_v45 = vmul.f32 %v4408_v38, %v5083_v0  ;;  %vm380_vm7 = vweird.f32 %v4408_v38  ;;  %v431_v59 = vor.u32 1.1754944e-38, %v430_v37  ;;  %vm5132_vm9 = vcmp.eq.f32.partialorder %v368_v42, 8.507059e+37  ;;  %vm351_vm15 = vmor %vm349_vm1, %vm350_vm6 }
  0xb6   :  { %v4412_v50 = vpop.eup %4411  ;;  %v346_v51 = vsub.f32 1.0, %v345_v39  ;;  %v416_v2 = vor.u32 1.1754944e-38, %v415_v49  ;;  %v398_v6 = vand.u32 2147483647, %v5107_v32  ;;  %vm5139_vm12 = vcmp.eq.f32.partialorder %v428_v48, 8.507059e+37  ;;  %vm381_vm8 = vmor %vm379_vm2, %vm380_vm7 }
  0xb7   :  { %v4414_v56 = vpop.eup %4413  ;;  %v376_v57 = vsub.f32 1.0, %v375_v45  ;;  %v400_v29 = vand.u32 2147483648, %v5107_v32  ;;  %vm5145_vm14 = vcmp.eq.f32.partialorder %v413_v54, 8.507059e+37  ;;  %vm394_vm10 = vweird.f32 %v5107_v32 }
  0xb8   :  { %v4416_v60 = vpop.eup %4415  ;;  %v347_v62 = vmul.f32 %v4406_v35, %v346_v51  ;;  %v360_v63 = vmul.f32 %v4414_v56, %v5092_v12  ;;  %vm365_vm11 = vweird.f32 %v4414_v56  ;;  %v5153_v49 = vadd.f32 1.0, %v4410_v44 }
  0xb9   :  { %v4418_v11 = vpop.eup %4417  ;;  %v377_v16 = vmul.f32 %v4408_v38, %v376_v57  ;;  %v420_v17 = vmul.f32 %v4416_v60, %v5094_v13  ;;  %vm425_vm13 = vweird.f32 %v4416_v60  ;;  %vm366_vm1 = vmor %vm364_vm5, %vm365_vm11  ;;  %vm7674_vm5 = vweird.f32 %v5099_v19 }
  0xba   :  { %v348_v31 = vadd.f32 %v4406_v35, %v347_v62  ;;  %v361_v37 = vsub.f32 1.0, %v360_v63  ;;  %v405_v39 = vmul.f32 %v4418_v11, %v5099_v19  ;;  %vm410_vm0 = vweird.f32 %v4418_v11  ;;  %v4420_v51 = vpop.eup %4419 }
  0xbb   :  { %v378_v45 = vadd.f32 %v4408_v38, %v377_v16  ;;  %v421_v48 = vsub.f32 1.0, %v420_v17  ;;  %v5158_v63 = vadd.f32 1.0, %v4412_v50  ;;  %v390_v34 = vmul.f32 %v4420_v51, %v5107_v32  ;;  %vm411_vm6 = vmor %vm7674_vm5, %vm410_vm0 }
  0xbc   :  { %v352_v57 = vsel %vm351_vm15, %v4406_v35, %v348_v31  ;;  %v362_v54 = vmul.f32 %v4414_v56, %v361_v37  ;;  %v406_v62 = vsub.f32 1.0, %v405_v39  ;;  %vm395_vm2 = vweird.f32 %v4420_v51 }
  0xbd   :  { %v5162_v61 = vsel %vm5115_vm3, %v356_v41, %v352_v57  ;;  %v382_v16 = vsel %vm381_vm8, %v4408_v38, %v378_v45  ;;  %v422_v17 = vmul.f32 %v4416_v60, %v421_v48  ;;  %v391_v40 = vsub.f32 1.0, %v390_v34  ;;  %vm396_vm0 = vmor %vm394_vm10, %vm395_vm2 }
  0xbe   :  { %v480_v44 = vmul.f32 %v5079_v58, %v5162_v61  ;;  %v5169_v35 = vsel %vm5121_vm4, %v386_v47, %v382_v16  ;;  %v363_v0 = vadd.f32 %v4414_v56, %v362_v54  ;;  %v407_v31 = vmul.f32 %v4418_v11, %v406_v62 }
  0xbf   :  { %v482_v50 = vmul.f32 %v467_v7, %v5169_v35  ;;  %v423_v38 = vadd.f32 %v4416_v60, %v422_v17  ;;  %vm7673_vm3 = vweird.f32 %v5094_v13  ;;  %4421 = vrcp.f32 %v5153_v49 }
  0xc0   :  { %v512_v41 = vadd.f32 %v496_v3, %v480_v44  ;;  %v367_v37 = vsel %vm366_vm1, %v4414_v56, %v363_v0  ;;  %vm426_vm4 = vmor %vm7673_vm3, %vm425_vm13  ;;  %v408_v46 = vadd.f32 %v4418_v11, %v407_v31  ;;  %v392_v20 = vmul.f32 %v4420_v51, %v391_v40 }
  0xc1   :  { %v514_v7 = vadd.f32 %v498_v8, %v482_v50  ;;  %v5187_v12 = vsel %vm5132_vm9, %v371_v52, %v367_v37  ;;  %v427_v34 = vsel %vm426_vm4, %v4416_v60, %v423_v38  ;;  %vm399_vm7 = vcmp.eq.f32.partialorder %v398_v6, 8.507059e+37 }
  0xc2   :  { %4423 = vtanh.f32 %v512_v41  ;;  %v481_v3 = vmul.f32 %v466_v10, %v5187_v12  ;;  %v5197_v13 = vsel %vm5139_vm12, %v431_v59, %v427_v34  ;;  %v412_v36 = vsel %vm411_vm6, %v4418_v11, %v408_v46 }
  0xc3   :  { %4425 = vtanh.f32 %v514_v7  ;;  %v485_v8 = vmul.f32 %v470_v15, %v5197_v13  ;;  %v5204_v19 = vsel %vm5145_vm14, %v416_v2, %v412_v36  ;;  %v393_v47 = vadd.f32 %v4420_v51, %v392_v20 }
  0xc4   :  { %v513_v52 = vadd.f32 %v497_v4, %v481_v3  ;;  %v501_v10 = vrot.slane %v5051_v21, 1  ;;  %v484_v56 = vmul.f32 %v469_v30, %v5204_v19  ;;  %v401_v59 = vor.u32 1.1754944e-38, %v400_v29 }
  0xc5   :  { %v500_v15 = vrot.slane %v5053_v22, 1  ;;  %v397_v60 = vsel %vm396_vm0, %v4420_v51, %v393_v47  ;;  %4427 = vrcp.f32 %v5158_v63  ;;  %v4422_v25 = vpop.eup %4421  ;;  %v7675_v30 = vrot.slane %v5079_v58, 3 }
  0xc6   :  { %4429 = vtanh.f32 %v513_v52  ;;  %v517_v21 = vadd.f32 %v501_v10, %v485_v8  ;;  %v5219_v4 = vsel %vm399_vm7, %v401_v59, %v397_v60  ;;  %v450_v11 = vmul.f32 %v4422_v25, %v5153_v49 }
  0xc7   :  { %v516_v1 = vadd.f32 %v500_v15, %v484_v56  ;;  %v483_v2 = vmul.f32 %v7675_v30, %v5219_v4  ;;  %v499_v22 = vrot.slane %v5057_v28, 1  ;;  %v460_v39 = vand.u32 2147483648, %v5153_v49 }
  0xc8   :  { %v4424_v24 = vpop.eup %4423  ;;  %v451_v32 = vsub.f32 1.0, %v450_v11  ;;  %4431 = vtanh.f32 %v517_v21  ;;  %vm455_vm8 = vweird.f32 %v4422_v25  ;;  %v458_v48 = vand.u32 2147483647, %v5153_v49 }
  0xc9   :  { %v4426_v29 = vpop.eup %4425  ;;  %544 = vrot.lane.b32.xlu1 %v4424_v24, %s4864_s13  ;;  %v515_v6 = vadd.f32 %v499_v22, %v483_v2  ;;  %4433 = vtanh.f32 %v516_v1  ;;  %vm454_vm9 = vweird.f32 %v5153_v49  ;;  %v472_v54 = vrot.slane %v5079_v58, 7 }
  0xca   :  { %548 = vrot.lane.b32.xlu0 %v4426_v29, %s4864_s13  ;;  %v452_v45 = vmul.f32 %v4422_v25, %v451_v32  ;;  %vm456_vm10 = vmor %vm454_vm9, %vm455_vm8  ;;  %v461_v62 = vor.u32 1.1754944e-38, %v460_v39  ;;  %vm459_vm11 = vcmp.eq.f32.partialorder %v458_v48, 8.507059e+37  ;;  %v445_v44 = vand.u32 2147483648, %v5158_v63 }
  0xcb   :  { %v4428_v42 = vpop.eup %4427  ;;  %4435 = vtanh.f32 %v515_v6  ;;  %v443_v38 = vand.u32 2147483647, %v5158_v63  ;;  %v503_v41 = vrot.slane %v5067_v43, 1  ;;  %vm439_vm13 = vweird.f32 %v5158_v63 }
  0xcc   :  { %v4430_v51 = vpop.eup %4429  ;;  %v435_v28 = vmul.f32 %v4428_v42, %v5158_v63  ;;  %v453_v57 = vadd.f32 %v4422_v25, %v452_v45  ;;  %vm440_vm12 = vweird.f32 %v4428_v42  ;;  %v471_v46 = vrot.slane %v5079_v58, 6 }
  0xcd   :  { %546 = vrot.lane.b32.xlu2 %v4430_v51, %s4864_s13  ;;  %vm441_vm14 = vmor %vm439_vm13, %vm440_vm12  ;;  %v446_v34 = vor.u32 1.1754944e-38, %v445_v44  ;;  %vm444_vm15 = vcmp.eq.f32.partialorder %v443_v38, 8.507059e+37  ;;  %v502_v43 = vrot.slane %v5075_v55, 1  ;;  %v529_v58 = vsub.f32 1.0, %v5187_v12 }
  0xce   :  { %v436_v16 = vsub.f32 1.0, %v435_v28  ;;  %v457_v17 = vsel %vm456_vm10, %v4422_v25, %v453_v57  ;;  %v4432_v0 = vpop.eup %4431  ;;  %v577_v56 = vmul.f32 0.0, %v5187_v12  ;;  %v531_v55 = vsub.f32 1.0, %v5219_v4 }
  0xcf   :  { %v5235_v31 = vsel %vm459_vm11, %v461_v62, %v457_v17  ;;  %v4434_v40 = vpop.eup %4433  ;;  %v579_v25 = vmul.f32 0.0, %v5219_v4  ;;  %v528_v2 = vsub.f32 1.0, %v5162_v61  ;;  %v530_v24 = vsub.f32 1.0, %v5169_v35 }
  0xd0   :  { %v437_v50 = vmul.f32 %v4428_v42, %v436_v16  ;;  %v487_v49 = vmul.f32 %v472_v54, %v5235_v31  ;;  %v576_v32 = vmul.f32 0.0, %v5162_v61  ;;  %v578_v4 = vmul.f32 0.0, %v5169_v35 }
  0xd1   :  { %554 = vrot.lane.b32.xlu1 %v4432_v0, %s4864_s13  ;;  %v4436_v20 = vpop.eup %4435  ;;  %v533_v28 = vsub.f32 1.0, %v5197_v13  ;;  %v532_v54 = vsub.f32 1.0, %v5204_v19  ;;  %v581_v62 = vmul.f32 0.0, %v5197_v13  ;;  %v580_v0 = vmul.f32 0.0, %v5204_v19 }
  0xd2   :  { %552 = vrot.lane.b32.xlu0 %v4434_v40, %s4864_s13  ;;  %v438_v37 = vadd.f32 %v4428_v42, %v437_v50  ;;  %v519_v7 = vadd.f32 %v503_v41, %v487_v49  ;;  %vm7580_vm1 = vcmask 1041409   ;;  %vm7579_vm2 = vcmask 1042434  }
  0xd3   :  { %vm7578_vm3 = vcmask 1043459   ;;  %vm7577_vm4 = vcmask 1044484   ;;  %vm7576_vm5 = vcmask 1045509   ;;  %vm7575_vm6 = vcmask 1046534  }
  0xd4   :  { %v442_v3 = vsel %vm441_vm14, %v4428_v42, %v438_v37  ;;  %4437 = vtanh.f32 %v519_v7  ;;  %vm7574_vm0 = vcmask 1047559   ;;  %vm7676_vm7 = vcmask 523264  }
  0xd5   :  { %550 = vrot.lane.b32.xlu2 %v4436_v20, %s4864_s13  ;;  %v447_v36 = vsel %vm444_vm15, %v446_v34, %v442_v3  ;;  %vm7677_vm8 = vmmov %vm7676_vm7 }
  0xd6   :  { %v486_v8 = vmul.f32 %v471_v46, %v447_v36  ;;  %v534_v30 = vsub.f32 1.0, %v447_v36  ;;  %v582_v22 = vmul.f32 0.0, %v447_v36 }
  0xd8   :  { %v518_v47 = vadd.f32 %v502_v43, %v486_v8  ;;  %v535_v8 = vsub.f32 1.0, %v5235_v31  ;;  %v583_v43 = vmul.f32 0.0, %v5235_v31 }
  0xda   :  { %4439 = vtanh.f32 %v518_v47  ;;  %v4438_v52 = vpop.eup %4437 }
  0xdb   :  { %558 = vrot.lane.b32.xlu0 %v4438_v52, %s4864_s13 }
  0xe0   :  { %v4440_v63 = vpop.eup %4439 }
  0xe1   :  { %556 = vrot.lane.b32.xlu2 %v4440_v63, %s4864_s13 }
 0x127   :  { %v547_v10 = vpop.permute.xlu2 %546 }
 0x128   :  { %v569_v59 = vmul.f32 %v547_v10, %v529_v58 }
 0x12a   :  { %v5250_v15 = vadd.f32 %v577_v56, %v569_v59 }
 0x12c   :  { %602 = vst [vmem:[#allocation1 + $0x1] ss:$9 sm:$0xff] %v5250_v15  ;;  %v784_v35 = vpack.c.bf16 %v5250_v15, %v5250_v15 }
 0x12e   :  { %v800_v49 = vunpack.c.l.b16 %v784_v35 }
 0x12f   :  { %v551_v60 = vpop.permute.xlu2 %550 }
 0x130   :  { %v571_v21 = vmul.f32 %v551_v60, %v531_v55  ;;  %v807_v7 = vrot.slane %v800_v49, 7 }
 0x132   :  { %v5255_v1 = vadd.f32 %v579_v25, %v571_v21 }
 0x134   :  { %606 = vst [vmem:[#allocation1 + $0x3] ss:$9 sm:$0xff] %v5255_v1  ;;  %v786_v41 = vpack.c.bf16 %v5255_v1, %v5255_v1 }
 0x136   :  { %v802_v34 = vunpack.c.l.b16 %v786_v41 }
 0x138   :  { %v813_v10 = vrot.slane %v802_v34, 5 }
 0x13b   :  { %v557_v11 = vpop.permute.xlu2 %556  ;;  %v545_v12 = vpop.permute.xlu1 %544 }
 0x13c   :  { %v574_v29 = vmul.f32 %v557_v11, %v534_v30  ;;  %v568_v6 = vmul.f32 %v545_v12, %v528_v2  ;;  %v549_v39 = vpop.permute.xlu0 %548 }
 0x13d   :  { %v570_v42 = vmul.f32 %v549_v39, %v530_v24 }
 0x13e   :  { %v5262_v45 = vadd.f32 %v582_v22, %v574_v29  ;;  %v5264_v48 = vadd.f32 %v576_v32, %v568_v6 }
 0x13f   :  { %v5266_v51 = vadd.f32 %v578_v4, %v570_v42  ;;  %v5312_v42 = vld [vmem:[#allocation2 + $0x1] ss:$8 sm:$0x3] }
 0x140   :  { %612 = vst [vmem:[#allocation1 + $0x6] ss:$9 sm:$0xff] %v5262_v45  ;;  %v783_v44 = vpack.c.bf16 %v5264_v48, %v5264_v48  ;;  %v789_v47 = vpack.c.bf16 %v5262_v45, %v5262_v45 }
 0x141   :  { %600 = vst [vmem:[#allocation1] ss:$9 sm:$0xff] %v5264_v48  ;;  %v785_v61 = vpack.c.bf16 %v5266_v51, %v5266_v51 }
 0x142   :  { %604 = vst [vmem:[#allocation1 + $0x2] ss:$9 sm:$0xff] %v5266_v51  ;;  %v799_v13 = vunpack.c.l.b16 %v783_v44  ;;  %v805_v25 = vunpack.c.l.b16 %v789_v47 }
 0x143   :  { %v555_v57 = vpop.permute.xlu1 %554  ;;  %v801_v38 = vunpack.c.l.b16 %v785_v61  ;;  %v5314_v61 = vld [vmem:[#allocation2 + $0x21] ss:$8 sm:$0x3] }
 0x144   :  { %v573_v16 = vmul.f32 %v555_v57, %v533_v28  ;;  %v553_v17 = vpop.permute.xlu0 %552  ;;  %v809_v36 = vsel %vm7580_vm1, %v807_v7, %v799_v13  ;;  %v822_v12 = vrot.slane %v805_v25, 2  ;;  %v5316_v28 = vld [vmem:[#allocation2 + $0x11] ss:$8 sm:$0x3] }
 0x145   :  { %v572_v50 = vmul.f32 %v553_v17, %v532_v54  ;;  %v810_v19 = vrot.slane %v801_v38, 6  ;;  %v5318_v17 = vld [vmem:[#allocation2 + $0x41] ss:$8 sm:$0x3] }
 0x146   :  { %v5281_v40 = vadd.f32 %v581_v62, %v573_v16  ;;  %v5323_v38 = vld [vmem:[#allocation2 + $0x51] ss:$8 sm:$0x3] }
 0x147   :  { %v5285_v37 = vadd.f32 %v580_v0, %v572_v50  ;;  %v812_v52 = vsel %vm7579_vm2, %v810_v19, %v809_v36  ;;  %v5327_v13 = vld [vmem:[#allocation2 + $0x31] ss:$8 sm:$0x3] }
 0x148   :  { %610 = vst [vmem:[#allocation1 + $0x5] ss:$9 sm:$0xff] %v5281_v40  ;;  %v788_v20 = vpack.c.bf16 %v5281_v40, %v5281_v40  ;;  %v815_v60 = vsel %vm7578_vm3, %v813_v10, %v812_v52  ;;  %v5333_v10 = vld [vmem:[#allocation2 + $0x61] ss:$8 sm:$0x3] }
 0x149   :  { %608 = vst [vmem:[#allocation1 + $0x4] ss:$9 sm:$0xff] %v5285_v37  ;;  %v787_v46 = vpack.c.bf16 %v5285_v37, %v5285_v37 }
 0x14a   :  { %v804_v56 = vunpack.c.l.b16 %v788_v20 }
 0x14b   :  { %v803_v3 = vunpack.c.l.b16 %v787_v46 }
 0x14c   :  { %v819_v31 = vrot.slane %v804_v56, 3 }
 0x14d   :  { %v816_v63 = vrot.slane %v803_v3, 4  ;;  %v559_v58 = vpop.permute.xlu0 %558 }
 0x14e   :  { %v575_v59 = vmul.f32 %v559_v58, %v535_v8 }
 0x14f   :  { %v818_v21 = vsel %vm7577_vm4, %v816_v63, %v815_v60  ;;  %v5330_v63 = vld [vmem:[#allocation2 + $0x71] ss:$8 sm:$0x3] }
 0x150   :  { %v5299_v55 = vadd.f32 %v583_v43, %v575_v59  ;;  %v821_v11 = vsel %vm7576_vm5, %v819_v31, %v818_v21 }
 0x151   :  { %v824_v22 = vsel %vm7575_vm6, %v822_v12, %v821_v11 }
 0x152   :  { %614 = vst [vmem:[#allocation1 + $0x7] ss:$9 sm:$0xff] %v5299_v55  ;;  %v790_v30 = vpack.c.bf16 %v5299_v55, %v5299_v55 }
 0x154   :  { %v806_v2 = vunpack.c.l.b16 %v790_v30 }
 0x156   :  { %v825_v24 = vrot.slane %v806_v2, 1 }
 0x158   :  { %v827_v29 = vsel %vm7574_vm0, %v825_v24, %v824_v22 }
 0x159   :  { %v828_v32 = vpack.c.b16 %v827_v29, %v827_v29 }
 0x15b   :  { %829 = vrot.lane.b32.xlu1 %v828_v32, %s4864_s13 }
 0x1cd   :  { %v830_v6 = vpop.permute.xlu1 %829 }
 0x1ce   :  { %4278 = vmatmul.msk.bf16.vlgmr.msra.gmra.mxu0 %vm7676_vm7, %v830_v6  ;;  %4279 = vmatmul.msk.bf16.vlgmr.msra.gmra.mxu1 %vm7677_vm8, %v830_v6 }
 0x24b   :  { %v843_v39 = vpop.f32.mrf.mxu0  ;;  %v856_v4 = vpop.f32.mrf.mxu1 }
 0x24c   :  { %v861_v35 = vrot.slane %v843_v39, 1  ;;  %v862_v57 = vrot.slane %v843_v39, 2  ;;  %v863_v54 = vrot.slane %v843_v39, 3  ;;  %v864_v62 = vrot.slane %v843_v39, 4 }
 0x24d   :  { %v865_v16 = vrot.slane %v843_v39, 5  ;;  %v875_v44 = vadd.f32 %v843_v39, %v5312_v42  ;;  %v867_v20 = vrot.slane %v843_v39, 7  ;;  %v866_v36 = vrot.slane %v843_v39, 6 }
 0x24e   :  { %v877_v0 = vadd.f32 %v862_v57, %v5314_v61  ;;  %v876_v50 = vadd.f32 %v861_v35, %v5316_v28  ;;  %v879_v49 = vadd.f32 %v864_v62, %v5318_v17  ;;  %v878_v34 = vadd.f32 %v863_v54, %v5327_v13 }
 0x24f   :  { %v880_v41 = vadd.f32 %v865_v16, %v5323_v38  ;;  %v4280_v46 = vmul.f32 -1.442695, %v875_v44  ;;  %v882_v58 = vadd.f32 %v867_v20, %v5330_v63  ;;  %v881_v56 = vadd.f32 %v866_v36, %v5333_v10 }
 0x250   :  { %v4282_v19 = vmul.f32 -1.442695, %v877_v0  ;;  %v4281_v7 = vmul.f32 -1.442695, %v876_v50  ;;  %v4284_v8 = vmul.f32 -1.442695, %v879_v49  ;;  %v5337_v60 = vadd.f32 %v5072_v53, %v856_v4 }
 0x251   :  { %v4285_v3 = vmul.f32 -1.442695, %v880_v41  ;;  %4441 = vpow2.f32 %v4280_v46  ;;  %v4283_v52 = vmul.f32 -1.442695, %v878_v34  ;;  %v4287_v31 = vmul.f32 -1.442695, %v882_v58 }
 0x252   :  { %4443 = vpow2.f32 %v4282_v19  ;;  %v4286_v11 = vmul.f32 -1.442695, %v881_v56 }
 0x253   :  { %v845_v43 = vpop.f32.mrf.mxu0  ;;  %v858_v47 = vpop.f32.mrf.mxu1  ;;  %4445 = vpow2.f32 %v4281_v7 }
 0x254   :  { %4447 = vpow2.f32 %v4285_v3 }
 0x255   :  { %4449 = vpow2.f32 %v4284_v8 }
 0x256   :  { %4451 = vpow2.f32 %v4283_v52  ;;  %v7691_v52 = vrot.slane %v5314_v61, 1 }
 0x257   :  { %v4442_v59 = vpop.eup %4441 }
 0x258   :  { %v4444_v25 = vpop.eup %4443  ;;  %v5339_v21 = vadd.f32 1.0, %v4442_v59 }
 0x259   :  { %v4446_v30 = vpop.eup %4445  ;;  %v5341_v2 = vadd.f32 1.0, %v4444_v25 }
 0x25a   :  { %v4448_v12 = vpop.eup %4447  ;;  %4453 = vrcp.f32 %v5339_v21  ;;  %v5350_v4 = vadd.f32 1.0, %v4446_v30  ;;  %v924_v54 = vand.u32 2147483647, %v5339_v21  ;;  %v926_v62 = vand.u32 2147483648, %v5339_v21 }
 0x25b   :  { %v4450_v29 = vpop.eup %4449  ;;  %4455 = vrcp.f32 %v5341_v2  ;;  %v5353_v57 = vadd.f32 1.0, %v4448_v12  ;;  %v954_v44 = vand.u32 2147483647, %v5341_v2  ;;  %v956_v0 = vand.u32 2147483648, %v5341_v2 }
 0x25c   :  { %v4452_v39 = vpop.eup %4451  ;;  %4457 = vpow2.f32 %v4287_v31  ;;  %v5357_v16 = vadd.f32 1.0, %v4450_v29  ;;  %v941_v49 = vand.u32 2147483648, %v5350_v4  ;;  %vm920_vm9 = vweird.f32 %v5339_v21 }
 0x25d   :  { %4459 = vpow2.f32 %v4286_v11  ;;  %v5366_v46 = vadd.f32 1.0, %v4452_v39  ;;  %vm950_vm10 = vweird.f32 %v5341_v2  ;;  %v1001_v7 = vand.u32 2147483648, %v5353_v57 }
 0x25e   :  { %4461 = vrcp.f32 %v5350_v4  ;;  %vm5373_vm11 = vcmp.eq.f32.partialorder %v924_v54, 8.507059e+37  ;;  %v927_v36 = vor.u32 1.1754944e-38, %v926_v62  ;;  %v939_v8 = vand.u32 2147483647, %v5350_v4 }
 0x25f   :  { %4463 = vrcp.f32 %v5353_v57  ;;  %vm5379_vm12 = vcmp.eq.f32.partialorder %v954_v44, 8.507059e+37  ;;  %v957_v58 = vor.u32 1.1754944e-38, %v956_v0  ;;  %v999_v56 = vand.u32 2147483647, %v5353_v57 }
 0x260   :  { %v4454_v19 = vpop.eup %4453  ;;  %4465 = vrcp.f32 %v5357_v16  ;;  %v986_v59 = vand.u32 2147483648, %v5357_v16  ;;  %vm935_vm13 = vweird.f32 %v5350_v4  ;;  %v942_v30 = vor.u32 1.1754944e-38, %v941_v49 }
 0x261   :  { %v4456_v34 = vpop.eup %4455  ;;  %v916_v20 = vmul.f32 %v4454_v19, %v5339_v21  ;;  %v984_v11 = vand.u32 2147483647, %v5357_v16  ;;  %4467 = vrcp.f32 %v5366_v46  ;;  %vm921_vm14 = vweird.f32 %v4454_v19 }
 0x262   :  { %v4458_v43 = vpop.eup %4457  ;;  %v946_v47 = vmul.f32 %v4456_v34, %v5341_v2  ;;  %vm951_vm15 = vweird.f32 %v4456_v34  ;;  %v1002_v39 = vor.u32 1.1754944e-38, %v1001_v7  ;;  %vm5390_vm8 = vcmp.eq.f32.partialorder %v939_v8, 8.507059e+37  ;;  %vm922_vm2 = vmor %vm920_vm9, %vm921_vm14 }
 0x263   :  { %v4460_v25 = vpop.eup %4459  ;;  %v917_v31 = vsub.f32 1.0, %v916_v20  ;;  %v987_v49 = vor.u32 1.1754944e-38, %v986_v59  ;;  %v969_v20 = vand.u32 2147483647, %v5366_v46  ;;  %vm5397_vm5 = vcmp.eq.f32.partialorder %v999_v56, 8.507059e+37  ;;  %vm952_vm7 = vmor %vm950_vm10, %vm951_vm15 }
 0x264   :  { %v4462_v12 = vpop.eup %4461  ;;  %v947_v29 = vsub.f32 1.0, %v946_v47  ;;  %vm5403_vm3 = vcmp.eq.f32.partialorder %v984_v11, 8.507059e+37  ;;  %vm965_vm0 = vweird.f32 %v5366_v46  ;;  %v5411_v35 = vadd.f32 1.0, %v4458_v43 }
 0x265   :  { %v4464_v54 = vpop.eup %4463  ;;  %v918_v62 = vmul.f32 %v4454_v19, %v917_v31  ;;  %v931_v44 = vmul.f32 %v4462_v12, %v5350_v4  ;;  %vm936_vm6 = vweird.f32 %v4462_v12  ;;  %v971_v31 = vand.u32 2147483648, %v5366_v46 }
 0x266   :  { %v4466_v6 = vpop.eup %4465  ;;  %v948_v41 = vmul.f32 %v4456_v34, %v947_v29  ;;  %v991_v47 = vmul.f32 %v4464_v54, %v5353_v57  ;;  %vm996_vm4 = vweird.f32 %v4464_v54  ;;  %v5416_v32 = vadd.f32 1.0, %v4460_v25 }
 0x267   :  { %v919_v8 = vadd.f32 %v4454_v19, %v918_v62  ;;  %v932_v22 = vsub.f32 1.0, %v931_v44  ;;  %v976_v50 = vmul.f32 %v4466_v6, %v5357_v16  ;;  %vm981_vm1 = vweird.f32 %v4466_v6  ;;  %v4468_v62 = vpop.eup %4467 }
 0x268   :  { %v949_v29 = vadd.f32 %v4456_v34, %v948_v41  ;;  %v992_v56 = vsub.f32 1.0, %v991_v47  ;;  %v961_v53 = vmul.f32 %v4468_v62, %v5366_v46  ;;  %vm966_vm9 = vweird.f32 %v4468_v62 }
 0x269   :  { %v923_v44 = vsel %vm922_vm2, %v4454_v19, %v919_v8  ;;  %v933_v11 = vmul.f32 %v4462_v12, %v932_v22  ;;  %v977_v24 = vsub.f32 1.0, %v976_v50  ;;  %v7688_v50 = vrot.slane %v5337_v60, 2  ;;  %vm937_vm2 = vmor %vm935_vm13, %vm936_vm6 }
 0x26a   :  { %v5420_v21 = vsel %vm5373_vm11, %v927_v36, %v923_v44  ;;  %v953_v41 = vsel %vm952_vm7, %v4456_v34, %v949_v29  ;;  %v993_v47 = vmul.f32 %v4464_v54, %v992_v56  ;;  %v962_v3 = vsub.f32 1.0, %v961_v53 }
 0x26b   :  { %v1051_v43 = vmul.f32 %v5337_v60, %v5420_v21  ;;  %v5427_v19 = vsel %vm5379_vm12, %v957_v58, %v953_v41  ;;  %v934_v2 = vadd.f32 %v4462_v12, %v933_v11  ;;  %v978_v22 = vmul.f32 %v4466_v6, %v977_v24 }
 0x26c   :  { %v1053_v25 = vmul.f32 %v7688_v50, %v5427_v19  ;;  %v994_v34 = vadd.f32 %v4464_v54, %v993_v47  ;;  %v7689_v36 = vrot.slane %v5312_v42, 1  ;;  %vm7690_vm10 = vweird.f32 %v5353_v57 }
 0x26d   :  { %v938_v29 = vsel %vm937_vm2, %v4462_v12, %v934_v2  ;;  %vm997_vm11 = vmor %vm7690_vm10, %vm996_vm4  ;;  %v979_v24 = vadd.f32 %v4466_v6, %v978_v22  ;;  %4469 = vrcp.f32 %v5411_v35  ;;  %vm7692_vm6 = vweird.f32 %v5357_v16 }
 0x26e   :  { %v1083_v8 = vadd.f32 %v7689_v36, %v1051_v43  ;;  %v1085_v58 = vadd.f32 %v7691_v52, %v1053_v25  ;;  %v5445_v4 = vsel %vm5390_vm8, %v942_v30, %v938_v29  ;;  %v998_v53 = vsel %vm997_vm11, %v4464_v54, %v994_v34  ;;  %vm982_vm12 = vmor %vm7692_vm6, %vm981_vm1 }
 0x26f   :  { %v963_v42 = vmul.f32 %v4468_v62, %v962_v3  ;;  %v7693_v57 = vrot.slane %v5337_v60, 1  ;;  %v5455_v56 = vsel %vm5397_vm5, %v1002_v39, %v998_v53  ;;  %v983_v61 = vsel %vm982_vm12, %v4466_v6, %v979_v24  ;;  %vm967_vm1 = vmor %vm965_vm0, %vm966_vm9 }
 0x270   :  { %4471 = vtanh.f32 %v1083_v8  ;;  %v7694_v30 = vrot.slane %v5337_v60, 5  ;;  %v5462_v16 = vsel %vm5403_vm3, %v987_v49, %v983_v61  ;;  %v7695_v44 = vrot.slane %v5316_v28, 1 }
 0x271   :  { %v1052_v12 = vmul.f32 %v7693_v57, %v5445_v4  ;;  %4473 = vtanh.f32 %v1085_v58  ;;  %v964_v0 = vadd.f32 %v4468_v62, %v963_v42  ;;  %v7696_v41 = vrot.slane %v5337_v60, 4 }
 0x272   :  { %v1056_v54 = vmul.f32 %v7694_v30, %v5455_v56  ;;  %v1071_v39 = vrot.slane %v5318_v17, 1  ;;  %v972_v6 = vor.u32 1.1754944e-38, %v971_v31  ;;  %vm970_vm4 = vcmp.eq.f32.partialorder %v969_v20, 8.507059e+37 }
 0x273   :  { %v1084_v11 = vadd.f32 %v7695_v44, %v1052_v12  ;;  %v1055_v7 = vmul.f32 %v7696_v41, %v5462_v16  ;;  %v968_v47 = vsel %vm967_vm1, %v4468_v62, %v964_v0  ;;  %v1039_v49 = vrot.slane %v5337_v60, 3  ;;  %v4470_v59 = vpop.eup %4469 }
 0x274   :  { %4475 = vrcp.f32 %v5416_v32  ;;  %v7697_v28 = vrot.slane %v5323_v38, 1  ;;  %v5477_v2 = vsel %vm970_vm4, %v972_v6, %v968_v47  ;;  %v1021_v46 = vmul.f32 %v4470_v59, %v5411_v35 }
 0x275   :  { %4477 = vtanh.f32 %v1084_v11  ;;  %v1087_v22 = vadd.f32 %v1071_v39, %v1055_v7  ;;  %v1054_v17 = vmul.f32 %v1039_v49, %v5477_v2  ;;  %v1070_v31 = vrot.slane %v5327_v13, 1 }
 0x276   :  { %v1088_v43 = vadd.f32 %v7697_v28, %v1056_v54  ;;  %v4472_v50 = vpop.eup %4471  ;;  %v1022_v62 = vsub.f32 1.0, %v1021_v46  ;;  %v1031_v38 = vand.u32 2147483648, %v5411_v35  ;;  %vm1026_vm3 = vweird.f32 %v4470_v59 }
 0x277   :  { %v4474_v20 = vpop.eup %4473  ;;  %1115 = vrot.lane.b32.xlu1 %v4472_v50, %s4864_s13  ;;  %v1086_v25 = vadd.f32 %v1070_v31, %v1054_v17  ;;  %v1029_v36 = vand.u32 2147483647, %v5411_v35  ;;  %vm1025_vm5 = vweird.f32 %v5411_v35  ;;  %v1043_v53 = vrot.slane %v5337_v60, 7  ;;  %v4377_v17 = vld [vmem:[#allocation4 + $0x74] sm:$0xf] }
 0x278   :  { %1119 = vrot.lane.b32.xlu0 %v4474_v20, %s4864_s13  ;;  %4479 = vtanh.f32 %v1088_v43  ;;  %v1023_v3 = vmul.f32 %v4470_v59, %v1022_v62  ;;  %vm1027_vm0 = vmor %vm1025_vm5, %vm1026_vm3  ;;  %v1032_v24 = vor.u32 1.1754944e-38, %v1031_v38  ;;  %v1016_v42 = vand.u32 2147483648, %v5416_v32  ;;  %v4267_v50 = vld [vmem:[#allocation4 + $0x78] sm:$0xf0]  ;;  %v4257_v31 = vld [vmem:[#allocation4 + $0x60] sm:$0xf] }
 0x279   :  { %4481 = vtanh.f32 %v1087_v22  ;;  %vm1030_vm13 = vcmp.eq.f32.partialorder %v1029_v36, 8.507059e+37  ;;  %v1014_v30 = vand.u32 2147483647, %v5416_v32  ;;  %v1074_v0 = vrot.slane %v5330_v63, 1  ;;  %v4378_v22 = vld [vmem:[#allocation4 + $0x74] sm:$0xf0] }
 0x27a   :  { %v4476_v34 = vpop.eup %4475  ;;  %v1024_v13 = vadd.f32 %v4470_v59, %v1023_v3  ;;  %4483 = vtanh.f32 %v1086_v25  ;;  %vm1010_vm15 = vweird.f32 %v5416_v32  ;;  %v1017_v41 = vor.u32 1.1754944e-38, %v1016_v42  ;;  %v4376_v20 = vld [vmem:[#allocation4 + $0x64] sm:$0xf0]  ;;  %v4375_v62 = vld [vmem:[#allocation4 + $0x64] sm:$0xf] }
 0x27b   :  { %v4478_v8 = vpop.eup %4477  ;;  %v1006_v29 = vmul.f32 %v4476_v34, %v5416_v32  ;;  %vm1011_vm14 = vweird.f32 %v4476_v34  ;;  %vm1015_vm8 = vcmp.eq.f32.partialorder %v1014_v30, 8.507059e+37  ;;  %v1042_v6 = vrot.slane %v5337_v60, 6  ;;  %v4265_v60 = vld [vmem:[#allocation4 + $0x70] sm:$0xf]  ;;  %v4259_v25 = vld [vmem:[#allocation4 + $0x68] sm:$0xf0] }
 0x27c   :  { %1117 = vrot.lane.b32.xlu2 %v4478_v8, %s4864_s13  ;;  %v1028_v58 = vsel %vm1027_vm0, %v4470_v59, %v1024_v13  ;;  %vm1012_vm7 = vmor %vm1010_vm15, %vm1011_vm14  ;;  %v1073_v49 = vrot.slane %v5333_v10, 1  ;;  %v615_v59 = vld [vmem:[#allocation1] sm:$0xff]  ;;  %v5508_v46 = vor.u32 %v4378_v22, %v4265_v60  ;;  %v5510_v10 = vor.u32 %v4377_v17, %v4267_v50  ;;  %v4249_v3 = vld [vmem:[#allocation4 + $0x50] sm:$0xf] }
 0x27d   :  { %v1007_v52 = vsub.f32 1.0, %v1006_v29  ;;  %v5491_v12 = vsel %vm1030_vm13, %v1032_v24, %v1028_v58  ;;  %v5513_v38 = vor.u32 %v4376_v20, %v4257_v31  ;;  %v4374_v36 = vld [vmem:[#allocation4 + $0x54] sm:$0xf0]  ;;  %v4373_v8 = vld [vmem:[#allocation4 + $0x54] sm:$0xf]  ;;  %v1100_v58 = vsub.f32 1.0, %v5445_v4 }
 0x27e   :  { %v4480_v57 = vpop.eup %4479  ;;  %v1058_v35 = vmul.f32 %v1043_v53, %v5491_v12  ;;  %7698 = vst [vmem:[#allocation15_spill] sm:$0xff] %v5508_v46  ;;  %701 = vmatpush.bf16.msrb.mxu2 %v5508_v46  ;;  %1192 = vmatpush.bf16.msrb.mxu0 %v5508_v46  ;;  %v5524_v29 = vor.u32 %v4374_v36, %v4249_v3  ;;  %v4251_v13 = vld [vmem:[#allocation4 + $0x58] sm:$0xf0]  ;;  %v4241_v24 = vld [vmem:[#allocation4 + $0x40] sm:$0xf]  ;;  %vm7714_vm2 = vcmask 523264  }
 0x27f   :  { %v1008_v61 = vmul.f32 %v4476_v34, %v1007_v52  ;;  %v4482_v54 = vpop.eup %4481  ;;  %1125 = vrot.lane.b32.xlu1 %v4480_v57, %s4864_s13  ;;  %7699 = vst [vmem:[#allocation16_spill] sm:$0xff] %v5510_v10  ;;  %714 = vmatpush.bf16.msrb.mxu3 %v5510_v10  ;;  %v4372_v52 = vld [vmem:[#allocation4 + $0x44] sm:$0xf0]  ;;  %v5527_v53 = vor.u32 %v4373_v8, %v4251_v13  ;;  %v4371_v42 = vld [vmem:[#allocation4 + $0x44] sm:$0xf]  ;;  %vm4271_vm9 = vmpackc.low %vm7714_vm2, %vm7714_vm2  ;;  %vm7715_vm10 = vcmask 1041409  }
 0x280   :  { %1123 = vrot.lane.b32.xlu0 %v4482_v54, %s4864_s13  ;;  %v1090_v11 = vadd.f32 %v1074_v0, %v1058_v35  ;;  %v4484_v7 = vpop.eup %4483  ;;  %7700 = vst [vmem:[#allocation17_spill] sm:$0xff] %v5513_v38  ;;  %1205 = vmatpush.bf16.msrb.mxu1 %v5510_v10  ;;  %v4243_v57 = vld [vmem:[#allocation4 + $0x48] sm:$0xf0]  ;;  %v5530_v30 = vor.u32 %v4372_v52, %v4241_v24  ;;  %v4217_v50 = vld [vmem:[#allocation4 + $0x10] sm:$0xf]  ;;  %vm7716_vm11 = vcmask 1042434   ;;  %vm7722_vm5 = vmmov %vm7714_vm2 }
 0x281   :  { %v1009_v44 = vadd.f32 %v4476_v34, %v1008_v61  ;;  %7702 = vst [vmem:[#allocation19_spill] sm:$0xff] %v5524_v29  ;;  %v1148_v54 = vmul.f32 %v5445_v4, %v5250_v15  ;;  %v5536_v0 = vor.u32 %v4371_v42, %v4243_v57  ;;  %v4225_v4 = vld [vmem:[#allocation4 + $0x20] sm:$0xf]  ;;  %v1150_v60 = vmul.f32 %v5477_v2, %v5255_v1  ;;  %v4366_v31 = vld [vmem:[#allocation4 + $0x14] sm:$0xf0]  ;;  %vm7723_vm0 = vmmov %vm7714_vm2 }
 0x282   :  { %4485 = vtanh.f32 %v1090_v11  ;;  %702 = vmatpush.bf16.msrb.mxu2 %v5513_v38  ;;  %1193 = vmatpush.bf16.msrb.mxu0 %v5513_v38  ;;  %7703 = vst [vmem:[#allocation20_spill] sm:$0xff] %v5527_v53  ;;  %v4370_v11 = vld [vmem:[#allocation4 + $0x34] sm:$0xf0]  ;;  %v4365_v20 = vld [vmem:[#allocation4 + $0x14] sm:$0xf]  ;;  %v5564_v3 = vor.u32 %v4366_v31, %v4217_v50  ;;  %v1099_v42 = vsub.f32 1.0, %v5420_v21  ;;  %v1151_v31 = vmul.f32 %v5462_v16, %v5285_v37 }
 0x283   :  { %v1013_v39 = vsel %vm1012_vm7, %v4476_v34, %v1009_v44  ;;  %v5517_v34 = vor.u32 %v4375_v62, %v4259_v25  ;;  %7704 = vst [vmem:[#allocation21_spill] sm:$0xff] %v5530_v30  ;;  %v4233_v44 = vld [vmem:[#allocation4 + $0x30] sm:$0xf]  ;;  %v4219_v62 = vld [vmem:[#allocation4 + $0x18] sm:$0xf0]  ;;  %vm7717_vm6 = vcmask 1043459  }
 0x284   :  { %1121 = vrot.lane.b32.xlu2 %v4484_v7, %s4864_s13  ;;  %v5501_v47 = vsel %vm1015_vm8, %v1017_v41, %v1013_v39  ;;  %7705 = vst [vmem:[#allocation22_spill] sm:$0xff] %v5536_v0  ;;  %v4369_v41 = vld [vmem:[#allocation4 + $0x34] sm:$0xf]  ;;  %v4235_v7 = vld [vmem:[#allocation4 + $0x38] sm:$0xf0]  ;;  %v5569_v1 = vor.u32 %v4365_v20, %v4219_v62  ;;  %vm7718_vm12 = vcmask 1044484  }
 0x285   :  { %v1057_v63 = vmul.f32 %v1042_v6, %v5501_v47  ;;  %7701 = vst [vmem:[#allocation18_spill] sm:$0xff] %v5517_v34  ;;  %715 = vmatpush.bf16.msrb.mxu3 %v5517_v34  ;;  %1206 = vmatpush.bf16.msrb.mxu1 %v5517_v34  ;;  %v5542_v6 = vor.u32 %v4370_v11, %v4233_v44  ;;  %v4364_v36 = vld [vmem:[#allocation4 + $0x4] sm:$0xf0]  ;;  %v4363_v8 = vld [vmem:[#allocation4 + $0x4] sm:$0xf]  ;;  %vm7719_vm1 = vcmask 1045509  }
 0x286   :  { %703 = vmatpush.bf16.msrb.mxu2 %v5524_v29  ;;  %1194 = vmatpush.bf16.msrb.mxu0 %v5524_v29  ;;  %v5547_v15 = vor.u32 %v4369_v41, %v4235_v7  ;;  %7710 = vst [vmem:[#allocation27_spill] sm:$0xff] %v5564_v3  ;;  %v4211_v13 = vld [vmem:[#allocation4 + $0x8] sm:$0xf0]  ;;  %v1153_v44 = vmul.f32 %v5501_v47, %v5262_v45  ;;  %vm7720_vm4 = vcmask 1046534   ;;  %vm7721_vm3 = vcmask 1047559  }
 0x287   :  { %v1089_v28 = vadd.f32 %v1073_v49, %v1057_v63  ;;  %616 = vrot.lane.b32.xlu1 %v615_v59, %s4864_s13  ;;  %7706 = vst [vmem:[#allocation23_spill] sm:$0xff] %v5542_v6  ;;  %v4368_v63 = vld [vmem:[#allocation4 + $0x24] sm:$0xf0]  ;;  %v4367_v49 = vld [vmem:[#allocation4 + $0x24] sm:$0xf]  ;;  %v5577_v52 = vor.u32 %v4363_v8, %v4211_v13 }
 0x288   :  { %v4486_v32 = vpop.eup %4485  ;;  %7707 = vst [vmem:[#allocation24_spill] sm:$0xff] %v5547_v15  ;;  %v4227_v59 = vld [vmem:[#allocation4 + $0x28] sm:$0xf0] }
 0x289   :  { %4487 = vtanh.f32 %v1089_v28  ;;  %1129 = vrot.lane.b32.xlu0 %v4486_v32, %s4864_s13  ;;  %716 = vmatpush.bf16.msrb.mxu3 %v5527_v53  ;;  %v1102_v28 = vsub.f32 1.0, %v5477_v2  ;;  %v5558_v17 = vor.u32 %v4367_v49, %v4227_v59  ;;  %7711 = vst [vmem:[#allocation28_spill] sm:$0xff] %v5569_v1  ;;  %v4209_v2 = vld [vmem:[#allocation4] sm:$0xf] }
 0x28a   :  { %1207 = vmatpush.bf16.msrb.mxu1 %v5527_v53  ;;  %704 = vmatpush.bf16.msrb.mxu2 %v5530_v30  ;;  %v5573_v24 = vor.u32 %v4364_v36, %v4209_v2  ;;  %7713 = vst [vmem:[#allocation30_spill] sm:$0xff] %v5577_v52 }
 0x28b   :  { %1195 = vmatpush.bf16.msrb.mxu0 %v5530_v30  ;;  %7709 = vst [vmem:[#allocation26_spill] sm:$0xff] %v5558_v17 }
 0x28c   :  { %7712 = vst [vmem:[#allocation29_spill] sm:$0xff] %v5573_v24 }
 0x28d   :  { %717 = vmatpush.bf16.msrb.mxu3 %v5536_v0 }
 0x28e   :  { %1208 = vmatpush.bf16.msrb.mxu1 %v5536_v0  ;;  %705 = vmatpush.bf16.msrb.mxu2 %v5542_v6 }
 0x28f   :  { %v4488_v43 = vpop.eup %4487  ;;  %1196 = vmatpush.bf16.msrb.mxu0 %v5542_v6 }
 0x290   :  { %1127 = vrot.lane.b32.xlu2 %v4488_v43, %s4864_s13  ;;  %v5552_v43 = vor.u32 %v4368_v63, %v4225_v4  ;;  %v4388_v4 = vld [vmem:[%s7569_s8] ss:$0 sm:$0xff] }
 0x291   :  { %718 = vmatpush.bf16.msrb.mxu3 %v5547_v15  ;;  %748 = vrot.lane.b32.xlu0 %v4388_v4, %s4864_s13 }
 0x292   :  { %7708 = vst [vmem:[#allocation25_spill] sm:$0xff] %v5552_v43  ;;  %1209 = vmatpush.bf16.msrb.mxu1 %v5547_v15  ;;  %706 = vmatpush.bf16.msrb.mxu2 %v5552_v43 }
 0x293   :  { %1197 = vmatpush.bf16.msrb.mxu0 %v5552_v43 }
 0x295   :  { %719 = vmatpush.bf16.msrb.mxu3 %v5558_v17 }
 0x296   :  { %1210 = vmatpush.bf16.msrb.mxu1 %v5558_v17  ;;  %707 = vmatpush.bf16.msrb.mxu2 %v5564_v3 }
 0x297   :  { %1198 = vmatpush.bf16.msrb.mxu0 %v5564_v3 }
 0x299   :  { %720 = vmatpush.bf16.msrb.mxu3 %v5569_v1 }
 0x29a   :  { %1211 = vmatpush.bf16.msrb.mxu1 %v5569_v1  ;;  %708 = vmatpush.bf16.msrb.mxu2 %v5573_v24 }
 0x29b   :  { %1199 = vmatpush.bf16.msrb.mxu0 %v5573_v24 }
 0x29d   :  { %721 = vmatpush.bf16.msrb.mxu3 %v5577_v52 }
 0x29e   :  { %1319 = vmatpush.bf16.msra.mxu2 %v4940_v5  ;;  %1212 = vmatpush.bf16.msrb.mxu1 %v5577_v52 }
 0x29f   :  { %1800 = vmatpush.bf16.msra.mxu0 %v4940_v5 }
 0x2a1   :  { %1332 = vmatpush.bf16.msra.mxu3 %v4967_v14 }
 0x2a2   :  { %1813 = vmatpush.bf16.msra.mxu1 %v4967_v14  ;;  %1320 = vmatpush.bf16.msra.mxu2 %v4952_v9 }
 0x2a3   :  { %1801 = vmatpush.bf16.msra.mxu0 %v4952_v9 }
 0x2a5   :  { %1333 = vmatpush.bf16.msra.mxu3 %v4994_v23 }
 0x2a6   :  { %1814 = vmatpush.bf16.msra.mxu1 %v4994_v23  ;;  %1321 = vmatpush.bf16.msra.mxu2 %v4979_v18 }
 0x2a7   :  { %1802 = vmatpush.bf16.msra.mxu0 %v4979_v18 }
 0x2a9   :  { %1334 = vmatpush.bf16.msra.mxu3 %v5008_v27 }
 0x2aa   :  { %1815 = vmatpush.bf16.msra.mxu1 %v5008_v27  ;;  %1322 = vmatpush.bf16.msra.mxu2 %v5005_v26 }
 0x2ab   :  { %1803 = vmatpush.bf16.msra.mxu0 %v5005_v26 }
 0x2ad   :  { %1335 = vmatpush.bf16.msra.mxu3 %v5029_v33 }
 0x2ae   :  { %1816 = vmatpush.bf16.msra.mxu1 %v5029_v33 }
 0x2d6   :  { %v1118_v61 = vpop.permute.xlu2 %1117 }
 0x2d7   :  { %v1140_v35 = vmul.f32 %v1118_v61, %v1100_v58  ;;  %v1105_v58 = vsub.f32 1.0, %v5501_v47  ;;  %v1147_v61 = vmul.f32 %v5420_v21, %v5264_v48  ;;  %v1149_v48 = vmul.f32 %v5427_v19, %v5266_v51 }
 0x2d9   :  { %v5539_v39 = vadd.f32 %v1148_v54, %v1140_v35  ;;  %v1101_v35 = vsub.f32 1.0, %v5427_v19  ;;  %v1104_v19 = vsub.f32 1.0, %v5455_v56 }
 0x2db   :  { %1173 = vst [vmem:[#allocation1 + $0x1] ss:$9 sm:$0xff] %v5539_v39  ;;  %v1272_v49 = vpack.c.bf16 %v5539_v39, %v5539_v39 }
 0x2dd   :  { %v1288_v36 = vunpack.c.l.b16 %v1272_v49 }
 0x2de   :  { %v1122_v32 = vpop.permute.xlu2 %1121 }
 0x2df   :  { %v1142_v22 = vmul.f32 %v1122_v32, %v1102_v28  ;;  %v1103_v28 = vsub.f32 1.0, %v5462_v16  ;;  %v1152_v32 = vmul.f32 %v5455_v56, %v5281_v40  ;;  %v1295_v13 = vrot.slane %v1288_v36, 7 }
 0x2e1   :  { %v5561_v25 = vadd.f32 %v1150_v60, %v1142_v22 }
 0x2e3   :  { %1177 = vst [vmem:[#allocation1 + $0x3] ss:$9 sm:$0xff] %v5561_v25  ;;  %v1274_v40 = vpack.c.bf16 %v5561_v25, %v5561_v25 }
 0x2e9   :  { %v1116_v54 = vpop.permute.xlu1 %1115 }
 0x2ea   :  { %v1128_v57 = vpop.permute.xlu2 %1127  ;;  %v1139_v41 = vmul.f32 %v1116_v54, %v1099_v42  ;;  %v1120_v7 = vpop.permute.xlu0 %1119 }
 0x2eb   :  { %v1145_v11 = vmul.f32 %v1128_v57, %v1105_v58  ;;  %v1141_v21 = vmul.f32 %v1120_v7, %v1101_v35  ;;  %v1290_v58 = vunpack.c.l.b16 %v1274_v40 }
 0x2ec   :  { %v5600_v47 = vadd.f32 %v1147_v61, %v1139_v41 }
 0x2ed   :  { %v5598_v45 = vadd.f32 %v1153_v44, %v1145_v11  ;;  %v5604_v63 = vadd.f32 %v1149_v48, %v1141_v21  ;;  %v1106_v44 = vsub.f32 1.0, %v5491_v12  ;;  %v1299_v48 = vrot.slane %v1290_v58, 5 }
 0x2ee   :  { %1171 = vst [vmem:[#allocation1] ss:$9 sm:$0xff] %v5600_v47  ;;  %v1271_v50 = vpack.c.bf16 %v5600_v47, %v5600_v47 }
 0x2ef   :  { %1183 = vst [vmem:[#allocation1 + $0x6] ss:$9 sm:$0xff] %v5598_v45  ;;  %v1273_v51 = vpack.c.bf16 %v5604_v63, %v5604_v63  ;;  %v1277_v11 = vpack.c.bf16 %v5598_v45, %v5598_v45 }
 0x2f0   :  { %1175 = vst [vmem:[#allocation1 + $0x2] ss:$9 sm:$0xff] %v5604_v63  ;;  %v1287_v37 = vunpack.c.l.b16 %v1271_v50 }
 0x2f1   :  { %v1126_v59 = vpop.permute.xlu1 %1125  ;;  %v1289_v62 = vunpack.c.l.b16 %v1273_v51  ;;  %v1154_v51 = vmul.f32 %v5491_v12, %v5299_v55 }
 0x2f2   :  { %v1144_v60 = vmul.f32 %v1126_v59, %v1104_v19  ;;  %v1124_v22 = vpop.permute.xlu0 %1123  ;;  %v1296_v35 = vsel %vm7715_vm10, %v1295_v13, %v1287_v37 }
 0x2f3   :  { %v1143_v20 = vmul.f32 %v1124_v22, %v1103_v28  ;;  %v1297_v8 = vrot.slane %v1289_v62, 6  ;;  %v1293_v28 = vunpack.c.l.b16 %v1277_v11 }
 0x2f4   :  { %v5628_v2 = vadd.f32 %v1152_v32, %v1144_v60 }
 0x2f5   :  { %v5633_v56 = vadd.f32 %v1151_v31, %v1143_v20  ;;  %v1298_v41 = vsel %vm7716_vm11, %v1297_v8, %v1296_v35  ;;  %v1305_v50 = vrot.slane %v1293_v28, 2 }
 0x2f6   :  { %1181 = vst [vmem:[#allocation1 + $0x5] ss:$9 sm:$0xff] %v5628_v2  ;;  %v1276_v42 = vpack.c.bf16 %v5628_v2, %v5628_v2  ;;  %v1300_v59 = vsel %vm7717_vm6, %v1299_v48, %v1298_v41  ;;  %v5712_v48 = vld [vmem:[#allocation2 + $0x12] ss:$8 sm:$0x3] }
 0x2f7   :  { %1179 = vst [vmem:[#allocation1 + $0x4] ss:$9 sm:$0xff] %v5633_v56  ;;  %v1275_v16 = vpack.c.bf16 %v5633_v56, %v5633_v56 }
 0x2f8   :  { %v1292_v21 = vunpack.c.l.b16 %v1276_v42 }
 0x2f9   :  { %v1291_v57 = vunpack.c.l.b16 %v1275_v16  ;;  %v617_v61 = vpop.permute.xlu1 %616 }
 0x2fa   :  { %v4272_v54 = vpack.c.bf16 %v617_v61, %v617_v61  ;;  %v1303_v60 = vrot.slane %v1292_v21, 3 }
 0x2fb   :  { %v1301_v7 = vrot.slane %v1291_v57, 4  ;;  %v1130_v4 = vpop.permute.xlu0 %1129  ;;  %v5702_v57 = vld [vmem:[%s7567_s6] ss:$0 sm:$0xff] }
 0x2fc   :  { %4273 = vmatmul.msk.bf16.vlgmr.msrb.gmra.mxu2 %vm4271_vm9, %v4272_v54  ;;  %4276 = vmatmul.msk.bf16.vlgmr.msrb.gmra.mxu3 %vm4271_vm9, %v4272_v54  ;;  %v1146_v19 = vmul.f32 %v1130_v4, %v1106_v44  ;;  %7725 = vst [vmem:[#allocation32_spill] sm:$0xff] %v5702_v57  ;;  %v5710_v4 = vld [vmem:[#allocation2 + $0x22] ss:$8 sm:$0x3] }
 0x2fd   :  { %1673 = vmatpush.bf16.msrb.mxu2 %v5508_v46  ;;  %1686 = vmatpush.bf16.msrb.mxu3 %v5510_v10  ;;  %v1302_v32 = vsel %vm7718_vm12, %v1301_v7, %v1300_v59  ;;  %v5714_v59 = vld [vmem:[#allocation2 + $0x2] ss:$8 sm:$0x3] }
 0x2fe   :  { %v5657_v49 = vadd.f32 %v1154_v51, %v1146_v19  ;;  %v1304_v12 = vsel %vm7719_vm1, %v1303_v60, %v1302_v32 }
 0x2ff   :  { %v1306_v20 = vsel %vm7720_vm4, %v1305_v50, %v1304_v12 }
 0x300   :  { %1185 = vst [vmem:[#allocation1 + $0x7] ss:$9 sm:$0xff] %v5657_v49  ;;  %v1278_v22 = vpack.c.bf16 %v5657_v49, %v5657_v49 }
 0x301   :  { %1674 = vmatpush.bf16.msrb.mxu2 %v5513_v38  ;;  %1687 = vmatpush.bf16.msrb.mxu3 %v5517_v34 }
 0x302   :  { %v1294_v55 = vunpack.c.l.b16 %v1278_v22  ;;  %v5718_v22 = vld [vmem:[#allocation2 + $0x42] ss:$8 sm:$0x3] }
 0x303   :  { %v5692_v37 = vpop.permute.xlu0 %748 }
 0x304   :  { %v1307_v31 = vrot.slane %v1294_v55, 1  ;;  %7724 = vst [vmem:[#allocation31_spill] sm:$0xff] %v5692_v37 }
 0x305   :  { %1675 = vmatpush.bf16.msrb.mxu2 %v5524_v29  ;;  %1688 = vmatpush.bf16.msrb.mxu3 %v5527_v53 }
 0x306   :  { %v1308_v62 = vsel %vm7721_vm3, %v1307_v31, %v1306_v20  ;;  %v5723_v31 = vld [vmem:[#allocation2 + $0x52] ss:$8 sm:$0x3] }
 0x307   :  { %v1309_v36 = vpack.c.b16 %v1308_v62, %v1308_v62 }
 0x309   :  { %1676 = vmatpush.bf16.msrb.mxu2 %v5530_v30  ;;  %1689 = vmatpush.bf16.msrb.mxu3 %v5536_v0 }
 0x30a   :  { %1310 = vrot.lane.b32.xlu2 %v1309_v36, %s4864_s13 }
 0x30d   :  { %1677 = vmatpush.bf16.msrb.mxu2 %v5542_v6  ;;  %1690 = vmatpush.bf16.msrb.mxu3 %v5547_v15 }
 0x311   :  { %1678 = vmatpush.bf16.msrb.mxu2 %v5552_v43  ;;  %1691 = vmatpush.bf16.msrb.mxu3 %v5558_v17 }
 0x315   :  { %1679 = vmatpush.bf16.msrb.mxu2 %v5564_v3  ;;  %1692 = vmatpush.bf16.msrb.mxu3 %v5569_v1 }
 0x319   :  { %1680 = vmatpush.bf16.msrb.mxu2 %v5573_v24  ;;  %1693 = vmatpush.bf16.msrb.mxu3 %v5577_v52 }
 0x364   :  { %v1311_v40 = vpop.permute.xlu2 %1310 }
 0x365   :  { %4289 = vmatmul.msk.bf16.vlgmr.msra.gmra.mxu2 %vm7722_vm5, %v1311_v40  ;;  %4290 = vmatmul.msk.bf16.vlgmr.msra.gmra.mxu3 %vm7723_vm0, %v1311_v40 }
 0x366   :  { %2281 = vmatpush.bf16.msra.mxu2 %v4940_v5  ;;  %2294 = vmatpush.bf16.msra.mxu3 %v4967_v14 }
 0x36a   :  { %2282 = vmatpush.bf16.msra.mxu2 %v4952_v9  ;;  %2295 = vmatpush.bf16.msra.mxu3 %v4994_v23 }
 0x36e   :  { %2283 = vmatpush.bf16.msra.mxu2 %v4979_v18  ;;  %2296 = vmatpush.bf16.msra.mxu3 %v5008_v27 }
 0x372   :  { %2284 = vmatpush.bf16.msra.mxu2 %v5005_v26  ;;  %2297 = vmatpush.bf16.msra.mxu3 %v5029_v33  ;;  %v5730_v33 = vld [vmem:[#allocation2 + $0x72] ss:$8 sm:$0x3] }
 0x37f   :  { %v710_v16 = vpop.f32.mrf.mxu2  ;;  %v5694_v8 = vpop.f32.mrf.mxu3 }
 0x380   :  { %v751_v13 = vadd.f32 %v5692_v37, %v5694_v8  ;;  %v727_v61 = vadd.f32 %v5702_v57, %v710_v16 }
 0x382   :  { %753 = vrot.lane.b32.xlu1 %v751_v13, %s4864_s13  ;;  %v4277_v54 = vmul.f32 -1.442695, %v727_v61  ;;  %v5727_v61 = vld [vmem:[#allocation2 + $0x32] ss:$8 sm:$0x3] }
 0x384   :  { %4489 = vpow2.f32 %v4277_v54 }
 0x387   :  { %v712_v58 = vpop.f32.mrf.mxu2  ;;  %v725_v42 = vpop.f32.mrf.mxu3 }
 0x38a   :  { %v4490_v35 = vpop.eup %4489 }
 0x38b   :  { %v5705_v44 = vadd.f32 1.0, %v4490_v35 }
 0x38d   :  { %4491 = vrcp.f32 %v5705_v44  ;;  %vm737_vm14 = vweird.f32 %v5705_v44 }
 0x393   :  { %v5708_v11 = vpop.eup %4491 }
 0x394   :  { %v733_v60 = vmul.f32 %v5708_v11, %v5705_v44  ;;  %vm738_vm13 = vweird.f32 %v5708_v11 }
 0x395   :  { %vm5760_vm15 = vmor %vm737_vm14, %vm738_vm13 }
 0x396   :  { %v734_v58 = vsub.f32 1.0, %v733_v60  ;;  %v5734_v60 = vld [vmem:[#allocation2 + $0x62] ss:$8 sm:$0x3] }
 0x3e8   :  { %v1324_v41 = vpop.f32.mrf.mxu2  ;;  %v1337_v7 = vpop.f32.mrf.mxu3 }
 0x3e9   :  { %v1342_v21 = vrot.slane %v1324_v41, 1  ;;  %v1343_v51 = vrot.slane %v1324_v41, 2  ;;  %v1345_v19 = vrot.slane %v1324_v41, 4  ;;  %v1344_v28 = vrot.slane %v1324_v41, 3 }
 0x3ea   :  { %v1346_v32 = vrot.slane %v1324_v41, 5  ;;  %v1356_v55 = vadd.f32 %v1324_v41, %v5714_v59  ;;  %v1348_v62 = vrot.slane %v1324_v41, 7  ;;  %v1347_v54 = vrot.slane %v1324_v41, 6 }
 0x3eb   :  { %v1358_v12 = vadd.f32 %v1343_v51, %v5710_v4  ;;  %v1357_v50 = vadd.f32 %v1342_v21, %v5712_v48  ;;  %v1360_v20 = vadd.f32 %v1345_v19, %v5718_v22  ;;  %v1359_v51 = vadd.f32 %v1344_v28, %v5727_v61 }
 0x3ec   :  { %v1361_v36 = vadd.f32 %v1346_v32, %v5723_v31  ;;  %v4291_v40 = vmul.f32 -1.442695, %v1356_v55  ;;  %v1363_v19 = vadd.f32 %v1348_v62, %v5730_v33  ;;  %v735_v32 = vmul.f32 %v5708_v11, %v734_v58  ;;  %v5742_v62 = vld [vmem:[%s7565_s4] ss:$0 sm:$0xff] }
 0x3ed   :  { %v4293_v16 = vmul.f32 -1.442695, %v1358_v12  ;;  %v4292_v13 = vmul.f32 -1.442695, %v1357_v50  ;;  %v4295_v35 = vmul.f32 -1.442695, %v1360_v20  ;;  %v1362_v41 = vadd.f32 %v1347_v54, %v5734_v60 }
 0x3ee   :  { %v4296_v42 = vmul.f32 -1.442695, %v1361_v36  ;;  %4493 = vpow2.f32 %v4291_v40  ;;  %v4294_v55 = vmul.f32 -1.442695, %v1359_v51  ;;  %v743_v28 = vand.u32 2147483648, %v5705_v44  ;;  %7726 = vst [vmem:[#allocation33_spill] sm:$0xff] %v5742_v62 }
 0x3ef   :  { %4495 = vpow2.f32 %v4293_v16  ;;  %v4298_v50 = vmul.f32 -1.442695, %v1363_v19  ;;  %v5745_v36 = vadd.f32 %v5742_v62, %v1337_v7  ;;  %v5748_v40 = vadd.f32 %v5708_v11, %v735_v32 }
 0x3f0   :  { %v1326_v21 = vpop.f32.mrf.mxu2  ;;  %v1339_v57 = vpop.f32.mrf.mxu3  ;;  %4497 = vpow2.f32 %v4292_v13  ;;  %v4297_v54 = vmul.f32 -1.442695, %v1362_v41 }
 0x3f1   :  { %4499 = vpow2.f32 %v4296_v42  ;;  %v7743_v5 = vrot.slane %v5745_v36, 2 }
 0x3f2   :  { %4501 = vpow2.f32 %v4295_v35 }
 0x3f3   :  { %4503 = vpow2.f32 %v4294_v55 }
 0x3f4   :  { %v4494_v12 = vpop.eup %4493 }
 0x3f5   :  { %v4496_v20 = vpop.eup %4495  ;;  %v5751_v16 = vadd.f32 1.0, %v4494_v12  ;;  %v5765_v12 = vor.u32 1.1754944e-38, %v743_v28 }
 0x3f6   :  { %v4498_v13 = vpop.eup %4497  ;;  %v5753_v58 = vadd.f32 1.0, %v4496_v20 }
 0x3f7   :  { %v4500_v35 = vpop.eup %4499  ;;  %4505 = vrcp.f32 %v5751_v16  ;;  %v5774_v51 = vadd.f32 1.0, %v4498_v13  ;;  %v1405_v42 = vand.u32 2147483647, %v5751_v16  ;;  %vm1401_vm7 = vweird.f32 %v5751_v16 }
 0x3f8   :  { %v4502_v21 = vpop.eup %4501  ;;  %4507 = vpow2.f32 %v4298_v50  ;;  %v5777_v57 = vadd.f32 1.0, %v4500_v35  ;;  %v1407_v50 = vand.u32 2147483648, %v5751_v16  ;;  %v1437_v55 = vand.u32 2147483648, %v5753_v58 }
 0x3f9   :  { %4509 = vrcp.f32 %v5753_v58  ;;  %v5779_v28 = vadd.f32 1.0, %v4502_v21  ;;  %v4504_v7 = vpop.eup %4503  ;;  %v1435_v20 = vand.u32 2147483647, %v5753_v58  ;;  %v1422_v13 = vand.u32 2147483648, %v5774_v51 }
 0x3fa   :  { %4511 = vpow2.f32 %v4297_v54  ;;  %vm5794_vm8 = vcmp.eq.f32.partialorder %v1405_v42, 8.507059e+37  ;;  %vm1431_vm2 = vweird.f32 %v5753_v58  ;;  %v1420_v35 = vand.u32 2147483647, %v5774_v51 }
 0x3fb   :  { %4513 = vrcp.f32 %v5774_v51  ;;  %v1482_v27 = vand.u32 2147483648, %v5777_v57  ;;  %v1408_v23 = vor.u32 1.1754944e-38, %v1407_v50  ;;  %v1438_v9 = vor.u32 1.1754944e-38, %v1437_v55 }
 0x3fc   :  { %4515 = vrcp.f32 %v5777_v57  ;;  %v1480_v54 = vand.u32 2147483647, %v5777_v57  ;;  %v5802_v37 = vadd.f32 1.0, %v4504_v7  ;;  %vm5805_vm9 = vcmp.eq.f32.partialorder %v1435_v20, 8.507059e+37 }
 0x3fd   :  { %v4506_v21 = vpop.eup %4505  ;;  %4517 = vrcp.f32 %v5779_v28  ;;  %vm1416_vm10 = vweird.f32 %v5774_v51  ;;  %v1423_v52 = vor.u32 1.1754944e-38, %v1422_v13  ;;  %vm1476_vm6 = vweird.f32 %v5777_v57 }
 0x3fe   :  { %v4508_v62 = vpop.eup %4507  ;;  %v1397_v41 = vmul.f32 %v4506_v21, %v5751_v16  ;;  %vm1402_vm11 = vweird.f32 %v4506_v21  ;;  %v1465_v55 = vand.u32 2147483647, %v5779_v28  ;;  %v1467_v7 = vand.u32 2147483648, %v5779_v28 }
 0x3ff   :  { %v4510_v18 = vpop.eup %4509  ;;  %4519 = vrcp.f32 %v5802_v37  ;;  %vm5815_vm12 = vcmp.eq.f32.partialorder %v1420_v35, 8.507059e+37  ;;  %v1483_v13 = vor.u32 1.1754944e-38, %v1482_v27  ;;  %vm5820_vm4 = vcmp.eq.f32.partialorder %v1480_v54, 8.507059e+37  ;;  %vm1403_vm5 = vmor %vm1401_vm7, %vm1402_vm11  ;;  %v5906_v54 = vld [vmem:[%s7568_s7] ss:$0 sm:$0xff] }
 0x400   :  { %v4512_v32 = vpop.eup %4511  ;;  %v1398_v14 = vsub.f32 1.0, %v1397_v41  ;;  %v1427_v42 = vmul.f32 %v4510_v18, %v5753_v58  ;;  %vm1432_vm1 = vweird.f32 %v4510_v18  ;;  %vm1461_vm3 = vweird.f32 %v5779_v28 }
 0x401   :  { %v4514_v24 = vpop.eup %4513  ;;  %v5825_v6 = vadd.f32 1.0, %v4508_v62  ;;  %vm5833_vm14 = vcmp.eq.f32.partialorder %v1465_v55, 8.507059e+37  ;;  %v1468_v62 = vor.u32 1.1754944e-38, %v1467_v7  ;;  %vm1433_vm7 = vmor %vm1431_vm2, %vm1432_vm1  ;;  %v1450_v16 = vand.u32 2147483647, %v5802_v37 }
 0x402   :  { %v4516_v41 = vpop.eup %4515  ;;  %v1399_v50 = vmul.f32 %v4506_v21, %v1398_v14  ;;  %v1428_v1 = vsub.f32 1.0, %v1427_v42  ;;  %v1412_v20 = vmul.f32 %v4514_v24, %v5774_v51  ;;  %v5827_v14 = vadd.f32 1.0, %v4512_v32 }
 0x403   :  { %v4518_v17 = vpop.eup %4517  ;;  %v1472_v43 = vmul.f32 %v4516_v41, %v5777_v57  ;;  %vm1417_vm0 = vweird.f32 %v4514_v24  ;;  %vm1477_vm13 = vweird.f32 %v4516_v41  ;;  %4521 = vrcp.f32 %v5825_v6 }
 0x404   :  { %v1400_v42 = vadd.f32 %v4506_v21, %v1399_v50  ;;  %v1429_v35 = vmul.f32 %v4510_v18, %v1428_v1  ;;  %v1413_v0 = vsub.f32 1.0, %v1412_v20  ;;  %v1457_v30 = vmul.f32 %v4518_v17, %v5779_v28 }
 0x405   :  { %v1473_v27 = vsub.f32 1.0, %v1472_v43  ;;  %v4520_v1 = vpop.eup %4519  ;;  %vm1462_vm2 = vweird.f32 %v4518_v17  ;;  %v7739_v58 = vand.u32 2147483647, %v5705_v44  ;;  %v7748_v28 = vrot.slane %v5745_v36, 4 }
 0x406   :  { %v1404_v53 = vsel %vm1403_vm5, %v4506_v21, %v1400_v42  ;;  %v1430_v32 = vadd.f32 %v4510_v18, %v1429_v35  ;;  %v1414_v29 = vmul.f32 %v4514_v24, %v1413_v0  ;;  %v1458_v50 = vsub.f32 1.0, %v1457_v30 }
 0x407   :  { %v5839_v20 = vsel %vm5794_vm8, %v1408_v23, %v1404_v53  ;;  %v1474_v43 = vmul.f32 %v4516_v41, %v1473_v27  ;;  %vm1418_vm8 = vmor %vm1416_vm10, %vm1417_vm0  ;;  %v1442_v53 = vmul.f32 %v4520_v1, %v5802_v37  ;;  %vm5858_vm11 = vcmp.eq.f32.partialorder %v7739_v58, 8.507059e+37 }
 0x408   :  { %v1532_v21 = vmul.f32 %v5745_v36, %v5839_v20  ;;  %v1434_v55 = vsel %vm1433_vm7, %v4510_v18, %v1430_v32  ;;  %v1415_v0 = vadd.f32 %v4514_v24, %v1414_v29  ;;  %v1459_v30 = vmul.f32 %v4518_v17, %v1458_v50  ;;  %vm1463_vm10 = vmor %vm1461_vm3, %vm1462_vm2 }
 0x409   :  { %v5850_v26 = vsel %vm5805_vm9, %v1438_v9, %v1434_v55  ;;  %v1475_v23 = vadd.f32 %v4516_v41, %v1474_v43  ;;  %v7742_v18 = vrot.slane %v5714_v59, 1  ;;  %vm1478_vm9 = vmor %vm1476_vm6, %vm1477_vm13  ;;  %v1443_v27 = vsub.f32 1.0, %v1442_v53  ;;  %v4522_v3 = vpop.eup %4521 }
 0x40a   :  { %v1534_v9 = vmul.f32 %v7743_v5, %v5850_v26  ;;  %v1419_v42 = vsel %vm1418_vm8, %v4514_v24, %v1415_v0  ;;  %v1460_v51 = vadd.f32 %v4518_v17, %v1459_v30  ;;  %v1452_v32 = vand.u32 2147483648, %v5802_v37 }
 0x40b   :  { %v1564_v29 = vadd.f32 %v7742_v18, %v1532_v21  ;;  %v5872_v44 = vsel %vm5815_vm12, %v1423_v52, %v1419_v42  ;;  %v1479_v35 = vsel %vm1478_vm9, %v4516_v41, %v1475_v23  ;;  %v7744_v59 = vrot.slane %v5710_v4, 1 }
 0x40c   :  { %v7745_v24 = vrot.slane %v5745_v36, 1  ;;  %v5882_v57 = vsel %vm5820_vm4, %v1483_v13, %v1479_v35  ;;  %v7746_v52 = vrot.slane %v5745_v36, 5  ;;  %v1464_v21 = vsel %vm1463_vm10, %v4518_v17, %v1460_v51 }
 0x40d   :  { %4523 = vtanh.f32 %v1564_v29  ;;  %v1566_v50 = vadd.f32 %v7744_v59, %v1534_v9  ;;  %v1444_v4 = vmul.f32 %v4520_v1, %v1443_v27  ;;  %vm1447_vm6 = vweird.f32 %v4520_v1 }
 0x40e   :  { %v1533_v43 = vmul.f32 %v7745_v24, %v5872_v44  ;;  %v1537_v41 = vmul.f32 %v7746_v52, %v5882_v57  ;;  %v7747_v55 = vrot.slane %v5712_v48, 1  ;;  %v5894_v15 = vsel %vm5833_vm14, %v1468_v62, %v1464_v21  ;;  %v754_v62 = vpop.permute.xlu1 %753 }
 0x40f   :  { %4525 = vtanh.f32 %v1566_v50  ;;  %v1502_v13 = vmul.f32 %v4522_v3, %v5825_v6  ;;  %v1536_v30 = vmul.f32 %v7748_v28, %v5894_v15  ;;  %v1445_v23 = vadd.f32 %v4520_v1, %v1444_v4 }
 0x410   :  { %v1565_v0 = vadd.f32 %v7747_v55, %v1533_v43  ;;  %vm1446_vm12 = vweird.f32 %v5802_v37  ;;  %vm1451_vm1 = vcmp.eq.f32.partialorder %v1450_v16, 8.507059e+37  ;;  %v7749_v17 = vrot.slane %v5723_v31, 1 }
 0x411   :  { %vm1448_vm4 = vmor %vm1446_vm12, %vm1447_vm6  ;;  %v1453_v48 = vor.u32 1.1754944e-38, %v1452_v32  ;;  %v1503_v58 = vsub.f32 1.0, %v1502_v13  ;;  %vm1507_vm3 = vweird.f32 %v4522_v3  ;;  %v1510_v29 = vand.u32 2147483647, %v5825_v6 }
 0x412   :  { %4527 = vtanh.f32 %v1565_v0  ;;  %v1569_v53 = vadd.f32 %v7749_v17, %v1537_v41  ;;  %v1449_v18 = vsel %vm1448_vm4, %v4520_v1, %v1445_v23  ;;  %v1512_v37 = vand.u32 2147483648, %v5825_v6 }
 0x413   :  { %v4524_v16 = vpop.eup %4523  ;;  %v7750_v5 = vrot.slane %v5718_v22, 1  ;;  %v5912_v9 = vsel %vm1451_vm1, %v1453_v48, %v1449_v18  ;;  %v1504_v42 = vmul.f32 %v4522_v3, %v1503_v58  ;;  %4529 = vrcp.f32 %v5827_v14 }
 0x414   :  { %v7751_v51 = vsel %vm5760_vm15, %v5708_v11, %v5748_v40  ;;  %1596 = vrot.lane.b32.xlu1 %v4524_v16, %s4864_s13  ;;  %v7752_v22 = vrot.slane %v5745_v36, 3  ;;  %v1551_v27 = vrot.slane %v5727_v61, 1  ;;  %4531 = vtanh.f32 %v1569_v53 }
 0x415   :  { %v1568_v31 = vadd.f32 %v7750_v5, %v1536_v30  ;;  %v5923_v1 = vsel %vm5858_vm11, %v5765_v12, %v7751_v51  ;;  %v4526_v32 = vpop.eup %4525  ;;  %v1505_v19 = vadd.f32 %v4522_v3, %v1504_v42  ;;  %vm1506_vm15 = vweird.f32 %v5825_v6 }
 0x416   :  { %v1535_v35 = vmul.f32 %v7752_v22, %v5912_v9  ;;  %v756_v59 = vmul.f32 %v754_v62, %v5923_v1  ;;  %v747_v11 = vadd.f32 %v5906_v54, %v5694_v8  ;;  %1600 = vrot.lane.b32.xlu0 %v4526_v32, %s4864_s13  ;;  %vm1508_vm5 = vmor %vm1506_vm15, %vm1507_vm3  ;;  %v1513_v12 = vor.u32 1.1754944e-38, %v1512_v37 }
 0x417   :  { %4533 = vtanh.f32 %v1568_v31  ;;  %v1509_v50 = vsel %vm1508_vm5, %v4522_v3, %v1505_v19  ;;  %vm1511_vm0 = vcmp.eq.f32.partialorder %v1510_v29, 8.507059e+37  ;;  %v1524_v61 = vrot.slane %v5745_v36, 7 }
 0x418   :  { %v1567_v40 = vadd.f32 %v1551_v27, %v1535_v35  ;;  %v4528_v7 = vpop.eup %4527  ;;  %v5938_v24 = vsel %vm1511_vm0, %v1513_v12, %v1509_v50  ;;  %v757_v43 = vadd.f32 %v756_v59, %v747_v11  ;;  %v1555_v52 = vrot.slane %v5730_v33, 1 }
 0x419   :  { %1598 = vrot.lane.b32.xlu2 %v4528_v7, %s4864_s13  ;;  %v4530_v6 = vpop.eup %4529  ;;  %v1539_v8 = vmul.f32 %v1524_v61, %v5938_v24  ;;  %v1497_v0 = vand.u32 2147483648, %v5827_v14  ;;  %v1495_v28 = vand.u32 2147483647, %v5827_v14  ;;  %vm1491_vm14 = vweird.f32 %v5827_v14 }
 0x41a   :  { %4535 = vtanh.f32 %v1567_v40  ;;  %v1487_v41 = vmul.f32 %v4530_v6, %v5827_v14  ;;  %v4532_v21 = vpop.eup %4531  ;;  %vm1492_vm13 = vweird.f32 %v4530_v6  ;;  %v1523_v53 = vrot.slane %v5745_v36, 6  ;;  %v1186_v14 = vld [vmem:[#allocation1] sm:$0xff] }
 0x41b   :  { %v1571_v4 = vadd.f32 %v1555_v52, %v1539_v8  ;;  %4537 = vtanh.f32 %v757_v43  ;;  %vm1493_vm7 = vmor %vm1491_vm14, %vm1492_vm13  ;;  %v1498_v23 = vor.u32 1.1754944e-38, %v1497_v0  ;;  %vm1496_vm8 = vcmp.eq.f32.partialorder %v1495_v28, 8.507059e+37 }
 0x41c   :  { %1606 = vrot.lane.b32.xlu1 %v4532_v21, %s4864_s13  ;;  %v1488_v3 = vsub.f32 1.0, %v1487_v41  ;;  %v1554_v18 = vrot.slane %v5734_v60, 1  ;;  %v1581_v36 = vsub.f32 1.0, %v5872_v44  ;;  %v1629_v31 = vmul.f32 %v5872_v44, %v5539_v39 }
 0x41d   :  { %v4534_v55 = vpop.eup %4533  ;;  %4539 = vtanh.f32 %v1571_v4  ;;  %v1583_v60 = vsub.f32 1.0, %v5912_v9  ;;  %v1631_v35 = vmul.f32 %v5912_v9, %v5561_v25  ;;  %v1580_v59 = vsub.f32 1.0, %v5839_v20 }
 0x41e   :  { %1604 = vrot.lane.b32.xlu0 %v4534_v55, %s4864_s13  ;;  %v1489_v13 = vmul.f32 %v4530_v6, %v1488_v3  ;;  %v1628_v39 = vmul.f32 %v5839_v20, %v5600_v47  ;;  %v1582_v11 = vsub.f32 1.0, %v5850_v26  ;;  %v1630_v25 = vmul.f32 %v5850_v26, %v5604_v63 }
 0x41f   :  { %v1585_v63 = vsub.f32 1.0, %v5882_v57  ;;  %v1633_v52 = vmul.f32 %v5882_v57, %v5628_v2  ;;  %v1584_v21 = vsub.f32 1.0, %v5894_v15  ;;  %v1632_v28 = vmul.f32 %v5894_v15, %v5633_v56 }
 0x420   :  { %v4536_v30 = vpop.eup %4535  ;;  %v1490_v33 = vadd.f32 %v4530_v6, %v1489_v13  ;;  %v765_v56 = vmul.f32 0.0, %v5923_v1  ;;  %vm7760_vm2 = vcmask 1041409   ;;  %vm7761_vm11 = vcmask 1042434  }
 0x421   :  { %1602 = vrot.lane.b32.xlu2 %v4536_v30, %s4864_s13  ;;  %v4538_v48 = vpop.eup %4537  ;;  %vm7763_vm9 = vcmask 523264   ;;  %vm7764_vm10 = vcmask 1043459   ;;  %vm7765_vm6 = vcmask 1044484   ;;  %vm7766_vm12 = vcmask 1045509  }
 0x422   :  { %v1494_v17 = vsel %vm1493_vm7, %v4530_v6, %v1490_v33  ;;  %vm7767_vm1 = vcmask 1046534   ;;  %vm7768_vm4 = vcmask 1047559   ;;  %vm7781_vm3 = vmmov %vm7763_vm9 }
 0x423   :  { %v1499_v58 = vsel %vm1496_vm8, %v1498_v23, %v1494_v17  ;;  %v4540_v29 = vpop.eup %4539  ;;  %vm7782_vm15 = vmmov %vm7781_vm3 }
 0x424   :  { %761 = vrot.lane.b32.xlu1 %v4538_v48, %s4864_s13  ;;  %v1538_v62 = vmul.f32 %v1523_v53, %v1499_v58  ;;  %v1586_v40 = vsub.f32 1.0, %v1499_v58  ;;  %v1634_v61 = vmul.f32 %v1499_v58, %v5598_v45  ;;  %v759_v58 = vsub.f32 1.0, %v5923_v1 }
 0x426   :  { %1610 = vrot.lane.b32.xlu0 %v4540_v29, %s4864_s13  ;;  %v1570_v37 = vadd.f32 %v1554_v18, %v1538_v62 }
 0x428   :  { %4541 = vtanh.f32 %v1570_v37  ;;  %v1587_v37 = vsub.f32 1.0, %v5938_v24 }
 0x42e   :  { %v4542_v16 = vpop.eup %4541 }
 0x42f   :  { %1608 = vrot.lane.b32.xlu2 %v4542_v16, %s4864_s13 }
 0x437   :  { %1187 = vrot.lane.b32.xlu2 %v1186_v14, %s4864_s13 }
 0x473   :  { %v1599_v5 = vpop.permute.xlu2 %1598 }
 0x474   :  { %v1621_v42 = vmul.f32 %v1599_v5, %v1581_v36  ;;  %v1635_v5 = vmul.f32 %v5938_v24, %v5657_v49 }
 0x476   :  { %v5958_v51 = vadd.f32 %v1629_v31, %v1621_v42 }
 0x478   :  { %7753 = vst [vmem:[#allocation34_spill] sm:$0xff] %v5958_v51  ;;  %v1753_v20 = vpack.c.bf16 %v5958_v51, %v5958_v51 }
 0x479   :  { %1654 = vst [vmem:[#allocation1 + $0x1] ss:$9 sm:$0xff] %v5958_v51 }
 0x47a   :  { %v1769_v0 = vunpack.c.l.b16 %v1753_v20  ;;  %v7769_v20 = vld [vmem:[#allocation19_spill] sm:$0xff] }
 0x47b   :  { %v1603_v22 = vpop.permute.xlu2 %1602 }
 0x47c   :  { %v1623_v27 = vmul.f32 %v1603_v22, %v1583_v60  ;;  %v1776_v17 = vrot.slane %v1769_v0, 7  ;;  %v7779_v0 = vld [vmem:[#allocation29_spill] sm:$0xff] }
 0x47e   :  { %v5964_v32 = vadd.f32 %v1631_v35, %v1623_v27 }
 0x480   :  { %7754 = vst [vmem:[#allocation35_spill] sm:$0xff] %v5964_v32  ;;  %v1755_v4 = vpack.c.bf16 %v5964_v32, %v5964_v32 }
 0x481   :  { %1658 = vst [vmem:[#allocation1 + $0x3] ss:$9 sm:$0xff] %v5964_v32 }
 0x482   :  { %v1771_v2 = vunpack.c.l.b16 %v1755_v4  ;;  %v7776_v4 = vld [vmem:[#allocation26_spill] sm:$0xff] }
 0x484   :  { %v1780_v16 = vrot.slane %v1771_v2, 5  ;;  %v7784_v2 = vld [vmem:[#allocation9_spill] sm:$0xff] }
 0x486   :  { %v1597_v19 = vpop.permute.xlu1 %1596 }
 0x487   :  { %v1620_v44 = vmul.f32 %v1597_v19, %v1580_v59 }
 0x488   :  { %v1601_v12 = vpop.permute.xlu0 %1600 }
 0x489   :  { %v1609_v7 = vpop.permute.xlu2 %1608  ;;  %v5971_v50 = vadd.f32 %v1628_v39, %v1620_v44  ;;  %v1622_v9 = vmul.f32 %v1601_v12, %v1582_v11 }
 0x48a   :  { %v1626_v6 = vmul.f32 %v1609_v7, %v1586_v40 }
 0x48b   :  { %7755 = vst [vmem:[#allocation36_spill] sm:$0xff] %v5971_v50  ;;  %v5977_v43 = vadd.f32 %v1630_v25, %v1622_v9  ;;  %v1752_v26 = vpack.c.bf16 %v5971_v50, %v5971_v50 }
 0x48c   :  { %1652 = vst [vmem:[#allocation1] ss:$9 sm:$0xff] %v5971_v50  ;;  %v5979_v47 = vadd.f32 %v1634_v61, %v1626_v6 }
 0x48d   :  { %7756 = vst [vmem:[#allocation37_spill] sm:$0xff] %v5977_v43  ;;  %v1754_v8 = vpack.c.bf16 %v5977_v43, %v5977_v43  ;;  %v1768_v33 = vunpack.c.l.b16 %v1752_v26 }
 0x48e   :  { %7757 = vst [vmem:[#allocation38_spill] sm:$0xff] %v5979_v47  ;;  %v1607_v45 = vpop.permute.xlu1 %1606  ;;  %v1758_v14 = vpack.c.bf16 %v5979_v47, %v5979_v47 }
 0x48f   :  { %1656 = vst [vmem:[#allocation1 + $0x2] ss:$9 sm:$0xff] %v5977_v43  ;;  %v1625_v41 = vmul.f32 %v1607_v45, %v1585_v63  ;;  %v1770_v3 = vunpack.c.l.b16 %v1754_v8  ;;  %v1777_v62 = vsel %vm7760_vm2, %v1776_v17, %v1768_v33  ;;  %v7770_v8 = vld [vmem:[#allocation20_spill] sm:$0xff]  ;;  %v7771_v63 = vld [vmem:[#allocation21_spill] sm:$0xff]  ;;  %v7772_v45 = vld [vmem:[#allocation22_spill] sm:$0xff] }
 0x490   :  { %1664 = vst [vmem:[#allocation1 + $0x6] ss:$9 sm:$0xff] %v5979_v47  ;;  %v1605_v55 = vpop.permute.xlu0 %1604  ;;  %v1774_v39 = vunpack.c.l.b16 %v1758_v14  ;;  %v7783_v33 = vld [vmem:[#allocation7_spill] sm:$0xff]  ;;  %v7792_v14 = vld [vmem:[#allocation32_spill] sm:$0xff] }
 0x491   :  { %v5995_v13 = vadd.f32 %v1633_v52, %v1625_v41  ;;  %v1624_v30 = vmul.f32 %v1605_v55, %v1584_v21  ;;  %v1778_v57 = vrot.slane %v1770_v3, 6  ;;  %v1188_v35 = vpop.permute.xlu2 %1187  ;;  %v7773_v52 = vld [vmem:[#allocation23_spill] sm:$0xff]  ;;  %v7774_v41 = vld [vmem:[#allocation24_spill] sm:$0xff]  ;;  %v7775_v21 = vld [vmem:[#allocation25_spill] sm:$0xff] }
 0x492   :  { %v1786_v7 = vrot.slane %v1774_v39, 2  ;;  %v7777_v3 = vld [vmem:[#allocation27_spill] sm:$0xff]  ;;  %v7778_v55 = vld [vmem:[#allocation28_spill] sm:$0xff] }
 0x493   :  { %7758 = vst [vmem:[#allocation39_spill] sm:$0xff] %v5995_v13  ;;  %v6000_v23 = vadd.f32 %v1632_v28, %v1624_v30  ;;  %v1757_v53 = vpack.c.bf16 %v5995_v13, %v5995_v13  ;;  %v1779_v36 = vsel %vm7761_vm11, %v1778_v57, %v1777_v62  ;;  %v7780_v28 = vld [vmem:[#allocation30_spill] sm:$0xff] }
 0x494   :  { %1662 = vst [vmem:[#allocation1 + $0x5] ss:$9 sm:$0xff] %v5995_v13  ;;  %v1781_v19 = vsel %vm7764_vm10, %v1780_v16, %v1779_v36  ;;  %v7791_v16 = vld [vmem:[#allocation14_spill] sm:$0xff] }
 0x495   :  { %7759 = vst [vmem:[#allocation40_spill] sm:$0xff] %v6000_v23  ;;  %v1756_v48 = vpack.c.bf16 %v6000_v23, %v6000_v23  ;;  %v1773_v42 = vunpack.c.l.b16 %v1757_v53  ;;  %v7785_v53 = vld [vmem:[#allocation31_spill] sm:$0xff] }
 0x496   :  { %1660 = vst [vmem:[#allocation1 + $0x4] ss:$9 sm:$0xff] %v6000_v23  ;;  %v762_v15 = vpop.permute.xlu1 %761 }
 0x497   :  { %v1772_v18 = vunpack.c.l.b16 %v1756_v48  ;;  %v764_v29 = vmul.f32 %v762_v15, %v759_v58  ;;  %v1784_v40 = vrot.slane %v1773_v42, 3  ;;  %v7786_v58 = vld [vmem:[#allocation8_spill] sm:$0xff]  ;;  %v7788_v15 = vld [vmem:[#allocation10_spill] sm:$0xff] }
 0x498   :  { %v1611_v31 = vpop.permute.xlu0 %1610 }
 0x499   :  { %v1782_v60 = vrot.slane %v1772_v18, 4  ;;  %v6016_v1 = vadd.f32 %v765_v56, %v764_v29  ;;  %v1627_v22 = vmul.f32 %v1611_v31, %v1587_v37  ;;  %v7787_v56 = vld [vmem:[#allocation11_spill] sm:$0xff]  ;;  %v7789_v29 = vld [vmem:[#allocation13_spill] sm:$0xff]  ;;  %v7790_v37 = vld [vmem:[#allocation12_spill] sm:$0xff] }
 0x49b   :  { %v6018_v27 = vadd.f32 %v1635_v5, %v1627_v22  ;;  %v1190_v59 = vsel %vm7763_vm9, %v1188_v35, %v6016_v1  ;;  %v1783_v11 = vsel %vm7765_vm6, %v1782_v60, %v1781_v19 }
 0x49c   :  { %v1191_v44 = vpack.c.bf16 %v1190_v59, %v1190_v59  ;;  %v1785_v12 = vsel %vm7766_vm12, %v1784_v40, %v1783_v11 }
 0x49d   :  { %7762 = vst [vmem:[#allocation41_spill] sm:$0xff] %v6018_v27  ;;  %v1759_v49 = vpack.c.bf16 %v6018_v27, %v6018_v27  ;;  %v1787_v9 = vsel %vm7767_vm1, %v1786_v7, %v1785_v12 }
 0x49e   :  { %1666 = vst [vmem:[#allocation1 + $0x7] ss:$9 sm:$0xff] %v6018_v27  ;;  %1200 = vmatmul.bf16.vlgmr.msrb.gmra.mxu0 %v1191_v44  ;;  %1213 = vmatmul.bf16.vlgmr.msrb.gmra.mxu1 %v1191_v44 }
 0x49f   :  { %v1775_v24 = vunpack.c.l.b16 %v1759_v49  ;;  %2154 = vmatpush.bf16.msrb.mxu0 %v5508_v46  ;;  %2167 = vmatpush.bf16.msrb.mxu1 %v5510_v10 }
 0x4a1   :  { %v1788_v25 = vrot.slane %v1775_v24, 1 }
 0x4a3   :  { %v1789_v61 = vsel %vm7768_vm4, %v1788_v25, %v1787_v9  ;;  %2155 = vmatpush.bf16.msrb.mxu0 %v5513_v38  ;;  %2168 = vmatpush.bf16.msrb.mxu1 %v5517_v34 }
 0x4a4   :  { %v1790_v6 = vpack.c.b16 %v1789_v61, %v1789_v61 }
 0x4a5   :  { %v1667_v26 = vld [vmem:[#allocation1] sm:$0xff] }
 0x4a6   :  { %1791 = vrot.lane.b32.xlu0 %v1790_v6, %s4864_s13  ;;  %v6065_v6 = vld [vmem:[#allocation2 + $0x3] ss:$8 sm:$0x3] }
 0x4a7   :  { %2156 = vmatpush.bf16.msrb.mxu0 %v7769_v20  ;;  %2169 = vmatpush.bf16.msrb.mxu1 %v7770_v8 }
 0x4ab   :  { %2157 = vmatpush.bf16.msrb.mxu0 %v7771_v63  ;;  %2170 = vmatpush.bf16.msrb.mxu1 %v7772_v45 }
 0x4ae   :  { %1668 = vrot.lane.b32.xlu0 %v1667_v26, %s4864_s13  ;;  %v6067_v26 = vld [vmem:[#allocation2 + $0x23] ss:$8 sm:$0x3] }
 0x4af   :  { %2158 = vmatpush.bf16.msrb.mxu0 %v7773_v52  ;;  %2171 = vmatpush.bf16.msrb.mxu1 %v7774_v41 }
 0x4b3   :  { %2159 = vmatpush.bf16.msrb.mxu0 %v7775_v21  ;;  %2172 = vmatpush.bf16.msrb.mxu1 %v7776_v4 }
 0x4b7   :  { %2160 = vmatpush.bf16.msrb.mxu0 %v7777_v3  ;;  %2173 = vmatpush.bf16.msrb.mxu1 %v7778_v55 }
 0x4bb   :  { %2161 = vmatpush.bf16.msrb.mxu0 %v7779_v0  ;;  %2174 = vmatpush.bf16.msrb.mxu1 %v7780_v28 }
 0x518   :  { %v1792_v30 = vpop.permute.xlu0 %1791 }
 0x519   :  { %4300 = vmatmul.msk.bf16.vlgmr.msra.gmra.mxu0 %vm7781_vm3, %v1792_v30  ;;  %4301 = vmatmul.msk.bf16.vlgmr.msra.gmra.mxu1 %vm7782_vm15, %v1792_v30  ;;  %v6069_v30 = vld [vmem:[#allocation2 + $0x13] ss:$8 sm:$0x3] }
 0x51a   :  { %2762 = vmatpush.bf16.msra.mxu0 %v7783_v33  ;;  %2775 = vmatpush.bf16.msra.mxu1 %v7784_v2 }
 0x51b   :  { %v1201_v57 = vpop.f32.mrf.mxu0  ;;  %v1214_v17 = vpop.f32.mrf.mxu1 }
 0x51c   :  { %v1239_v48 = vadd.f32 %v1214_v17, %v7785_v53  ;;  %v1218_v36 = vadd.f32 %v7792_v14, %v1201_v57  ;;  %v1238_v12 = vadd.f32 %v5906_v54, %v1214_v17 }
 0x51e   :  { %1241 = vrot.lane.b32.xlu1 %v1239_v48, %s4864_s13  ;;  %2763 = vmatpush.bf16.msra.mxu0 %v7786_v58  ;;  %v4288_v5 = vmul.f32 -1.442695, %v1218_v36  ;;  %v6071_v36 = vld [vmem:[#allocation2 + $0x43] ss:$8 sm:$0x3] }
 0x51f   :  { %2776 = vmatpush.bf16.msra.mxu1 %v7787_v56 }
 0x520   :  { %4543 = vpow2.f32 %v4288_v5 }
 0x522   :  { %2764 = vmatpush.bf16.msra.mxu0 %v7788_v15 }
 0x523   :  { %v1203_v62 = vpop.f32.mrf.mxu0  ;;  %v1216_v18 = vpop.f32.mrf.mxu1  ;;  %2777 = vmatpush.bf16.msra.mxu1 %v7789_v29 }
 0x526   :  { %2765 = vmatpush.bf16.msra.mxu0 %v7790_v37  ;;  %v4544_v31 = vpop.eup %4543 }
 0x527   :  { %2778 = vmatpush.bf16.msra.mxu1 %v7791_v16  ;;  %v1222_v42 = vadd.f32 1.0, %v4544_v31  ;;  %v6076_v31 = vld [vmem:[#allocation2 + $0x53] ss:$8 sm:$0x3] }
 0x529   :  { %4545 = vrcp.f32 %v1222_v42  ;;  %v1234_v39 = vand.u32 2147483648, %v1222_v42  ;;  %vm1228_vm0 = vweird.f32 %v1222_v42  ;;  %v1232_v44 = vand.u32 2147483647, %v1222_v42 }
 0x52b   :  { %v1235_v40 = vor.u32 1.1754944e-38, %v1234_v39  ;;  %vm1233_vm14 = vcmp.eq.f32.partialorder %v1232_v44, 8.507059e+37 }
 0x52f   :  { %v4546_v60 = vpop.eup %4545 }
 0x530   :  { %v1224_v22 = vmul.f32 %v4546_v60, %v1222_v42  ;;  %vm1229_vm5 = vweird.f32 %v4546_v60 }
 0x531   :  { %vm1230_vm13 = vmor %vm1228_vm0, %vm1229_vm5 }
 0x532   :  { %v1225_v35 = vsub.f32 1.0, %v1224_v22  ;;  %v6080_v22 = vld [vmem:[#allocation2 + $0x33] ss:$8 sm:$0x3] }
 0x534   :  { %v1226_v59 = vmul.f32 %v4546_v60, %v1225_v35 }
 0x536   :  { %v1227_v19 = vadd.f32 %v4546_v60, %v1226_v59 }
 0x538   :  { %v1231_v11 = vsel %vm1230_vm13, %v4546_v60, %v1227_v19 }
 0x539   :  { %v6061_v24 = vsel %vm1233_vm14, %v1235_v40, %v1231_v11 }
 0x590   :  { %v1242_v49 = vpop.permute.xlu1 %1241 }
 0x591   :  { %v1244_v7 = vmul.f32 %v1242_v49, %v6061_v24 }
 0x593   :  { %v1245_v25 = vadd.f32 %v1244_v7, %v1238_v12 }
 0x595   :  { %4547 = vtanh.f32 %v1245_v25 }
 0x596   :  { %v1805_v9 = vpop.f32.mrf.mxu0  ;;  %v1818_v61 = vpop.f32.mrf.mxu1 }
 0x597   :  { %v1823_v57 = vrot.slane %v1805_v9, 1  ;;  %v1824_v48 = vrot.slane %v1805_v9, 2  ;;  %v1825_v62 = vrot.slane %v1805_v9, 3  ;;  %v1826_v18 = vrot.slane %v1805_v9, 4 }
 0x598   :  { %v1827_v14 = vrot.slane %v1805_v9, 5  ;;  %v1837_v54 = vadd.f32 %v1805_v9, %v6065_v6  ;;  %v1829_v11 = vrot.slane %v1805_v9, 7  ;;  %v1828_v49 = vrot.slane %v1805_v9, 6  ;;  %v7793_v9 = vld [vmem:[#allocation33_spill] sm:$0xff] }
 0x599   :  { %v1839_v17 = vadd.f32 %v1824_v48, %v6067_v26  ;;  %v1838_v5 = vadd.f32 %v1823_v57, %v6069_v30  ;;  %v1841_v42 = vadd.f32 %v1826_v18, %v6071_v36  ;;  %v1840_v44 = vadd.f32 %v1825_v62, %v6080_v22  ;;  %v6084_v48 = vld [vmem:[#allocation2 + $0x73] ss:$8 sm:$0x3] }
 0x59a   :  { %v1842_v60 = vadd.f32 %v1827_v14, %v6076_v31  ;;  %v4302_v59 = vmul.f32 -1.442695, %v1837_v54  ;;  %v1844_v18 = vadd.f32 %v1829_v11, %v6084_v48  ;;  %v6087_v14 = vld [vmem:[#allocation2 + $0x63] ss:$8 sm:$0x3] }
 0x59b   :  { %v4548_v35 = vpop.eup %4547  ;;  %v4304_v19 = vmul.f32 -1.442695, %v1839_v17  ;;  %v4303_v39 = vmul.f32 -1.442695, %v1838_v5  ;;  %v4306_v12 = vmul.f32 -1.442695, %v1841_v42  ;;  %v1843_v62 = vadd.f32 %v1828_v49, %v6087_v14 }
 0x59c   :  { %1249 = vrot.lane.b32.xlu2 %v4548_v35, %s4864_s13  ;;  %v4307_v40 = vmul.f32 -1.442695, %v1842_v60  ;;  %4549 = vpow2.f32 %v4302_v59  ;;  %v4305_v57 = vmul.f32 -1.442695, %v1840_v44  ;;  %v6091_v17 = vadd.f32 %v7793_v9, %v1818_v61 }
 0x59d   :  { %4551 = vpow2.f32 %v4304_v19  ;;  %v4309_v60 = vmul.f32 -1.442695, %v1844_v18  ;;  %v4308_v19 = vmul.f32 -1.442695, %v1843_v62 }
 0x59e   :  { %v1807_v7 = vpop.f32.mrf.mxu0  ;;  %v1820_v25 = vpop.f32.mrf.mxu1  ;;  %4553 = vpow2.f32 %v4303_v39 }
 0x59f   :  { %4555 = vpow2.f32 %v4307_v40 }
 0x5a0   :  { %4557 = vpow2.f32 %v4306_v12 }
 0x5a1   :  { %4559 = vpow2.f32 %v4305_v57 }
 0x5a2   :  { %v4550_v54 = vpop.eup %4549 }
 0x5a3   :  { %v4552_v5 = vpop.eup %4551  ;;  %v6093_v42 = vadd.f32 1.0, %v4550_v54 }
 0x5a4   :  { %v4554_v35 = vpop.eup %4553  ;;  %v6095_v59 = vadd.f32 1.0, %v4552_v5 }
 0x5a5   :  { %v4556_v39 = vpop.eup %4555  ;;  %4561 = vrcp.f32 %v6093_v42  ;;  %v6104_v25 = vadd.f32 1.0, %v4554_v35  ;;  %v1886_v62 = vand.u32 2147483647, %v6093_v42  ;;  %v1888_v54 = vand.u32 2147483648, %v6093_v42 }
 0x5a6   :  { %v4558_v40 = vpop.eup %4557  ;;  %4563 = vrcp.f32 %v6095_v59  ;;  %v6107_v18 = vadd.f32 1.0, %v4556_v39  ;;  %v1916_v5 = vand.u32 2147483647, %v6095_v59  ;;  %v1918_v49 = vand.u32 2147483648, %v6095_v59 }
 0x5a7   :  { %v4560_v7 = vpop.eup %4559  ;;  %4565 = vpow2.f32 %v4309_v60  ;;  %v6111_v9 = vadd.f32 1.0, %v4558_v40  ;;  %v1903_v12 = vand.u32 2147483648, %v6104_v25  ;;  %vm1882_vm7 = vweird.f32 %v6093_v42 }
 0x5a8   :  { %4567 = vpow2.f32 %v4308_v19  ;;  %v6120_v39 = vadd.f32 1.0, %v4560_v7  ;;  %vm1912_vm8 = vweird.f32 %v6095_v59  ;;  %v1963_v19 = vand.u32 2147483648, %v6107_v18 }
 0x5a9   :  { %4569 = vrcp.f32 %v6104_v25  ;;  %vm6127_vm2 = vcmp.eq.f32.partialorder %v1886_v62, 8.507059e+37  ;;  %v1889_v44 = vor.u32 1.1754944e-38, %v1888_v54  ;;  %v1901_v7 = vand.u32 2147483647, %v6104_v25 }
 0x5aa   :  { %4571 = vrcp.f32 %v6107_v18  ;;  %vm6133_vm11 = vcmp.eq.f32.partialorder %v1916_v5, 8.507059e+37  ;;  %v1919_v37 = vor.u32 1.1754944e-38, %v1918_v49  ;;  %v1961_v29 = vand.u32 2147483647, %v6107_v18 }
 0x5ab   :  { %v4562_v57 = vpop.eup %4561  ;;  %4573 = vrcp.f32 %v6111_v9  ;;  %v1948_v15 = vand.u32 2147483648, %v6111_v9  ;;  %vm1897_vm9 = vweird.f32 %v6104_v25  ;;  %v1904_v58 = vor.u32 1.1754944e-38, %v1903_v12 }
 0x5ac   :  { %v4564_v40 = vpop.eup %4563  ;;  %v1878_v35 = vmul.f32 %v4562_v57, %v6093_v42  ;;  %v1946_v54 = vand.u32 2147483647, %v6111_v9  ;;  %4575 = vrcp.f32 %v6120_v39  ;;  %vm1883_vm10 = vweird.f32 %v4562_v57 }
 0x5ad   :  { %v4566_v60 = vpop.eup %4565  ;;  %v1908_v61 = vmul.f32 %v4564_v40, %v6095_v59  ;;  %vm1913_vm6 = vweird.f32 %v4564_v40  ;;  %v1964_v49 = vor.u32 1.1754944e-38, %v1963_v19  ;;  %vm6144_vm1 = vcmp.eq.f32.partialorder %v1901_v7, 8.507059e+37  ;;  %vm1884_vm13 = vmor %vm1882_vm7, %vm1883_vm10 }
 0x5ae   :  { %v4568_v56 = vpop.eup %4567  ;;  %v1879_v62 = vsub.f32 1.0, %v1878_v35  ;;  %v1949_v12 = vor.u32 1.1754944e-38, %v1948_v15  ;;  %v1931_v32 = vand.u32 2147483647, %v6120_v39  ;;  %vm6151_vm15 = vcmp.eq.f32.partialorder %v1961_v29, 8.507059e+37  ;;  %vm1914_vm12 = vmor %vm1912_vm8, %vm1913_vm6 }
 0x5af   :  { %v4570_v2 = vpop.eup %4569  ;;  %v1909_v5 = vsub.f32 1.0, %v1908_v61  ;;  %vm6157_vm0 = vcmp.eq.f32.partialorder %v1946_v54, 8.507059e+37  ;;  %vm1927_vm4 = vweird.f32 %v6120_v39  ;;  %v6165_v23 = vadd.f32 1.0, %v4566_v60 }
 0x5b0   :  { %v4572_v33 = vpop.eup %4571  ;;  %v1880_v53 = vmul.f32 %v4562_v57, %v1879_v62  ;;  %v1893_v47 = vmul.f32 %v4570_v2, %v6104_v25  ;;  %vm1898_vm3 = vweird.f32 %v4570_v2  ;;  %v1933_v62 = vand.u32 2147483648, %v6120_v39 }
 0x5b1   :  { %v4574_v13 = vpop.eup %4573  ;;  %v1910_v51 = vmul.f32 %v4564_v40, %v1909_v5  ;;  %v1953_v61 = vmul.f32 %v4572_v33, %v6107_v18  ;;  %vm1958_vm5 = vweird.f32 %v4572_v33  ;;  %v6170_v28 = vadd.f32 1.0, %v4568_v56  ;;  %vm1899_vm7 = vmor %vm1897_vm9, %vm1898_vm3 }
 0x5b2   :  { %v1881_v7 = vadd.f32 %v4562_v57, %v1880_v53  ;;  %v1894_v50 = vsub.f32 1.0, %v1893_v47  ;;  %v1938_v27 = vmul.f32 %v4574_v13, %v6111_v9  ;;  %vm1943_vm14 = vweird.f32 %v4574_v13  ;;  %v4576_v53 = vpop.eup %4575 }
 0x5b3   :  { %v1911_v5 = vadd.f32 %v4564_v40, %v1910_v51  ;;  %v1954_v29 = vsub.f32 1.0, %v1953_v61  ;;  %v1923_v0 = vmul.f32 %v4576_v53, %v6120_v39  ;;  %vm1928_vm8 = vweird.f32 %v4576_v53 }
 0x5b4   :  { %v1885_v47 = vsel %vm1884_vm13, %v4562_v57, %v1881_v7  ;;  %v1895_v54 = vmul.f32 %v4570_v2, %v1894_v50  ;;  %v1939_v43 = vsub.f32 1.0, %v1938_v27  ;;  %v7804_v27 = vrot.slane %v6091_v17, 2  ;;  %vm1929_vm6 = vmor %vm1927_vm4, %vm1928_vm8 }
 0x5b5   :  { %v6174_v42 = vsel %vm6127_vm2, %v1889_v44, %v1885_v47  ;;  %v1915_v51 = vsel %vm1914_vm12, %v4564_v40, %v1911_v5  ;;  %v1955_v61 = vmul.f32 %v4572_v33, %v1954_v29  ;;  %v1924_v11 = vsub.f32 1.0, %v1923_v0 }
 0x5b6   :  { %v2013_v60 = vmul.f32 %v6091_v17, %v6174_v42  ;;  %v6181_v57 = vsel %vm6133_vm11, %v1919_v37, %v1915_v51  ;;  %v1896_v59 = vadd.f32 %v4570_v2, %v1895_v54  ;;  %v1940_v50 = vmul.f32 %v4574_v13, %v1939_v43 }
 0x5b7   :  { %v2015_v56 = vmul.f32 %v7804_v27, %v6181_v57  ;;  %v1956_v44 = vadd.f32 %v4572_v33, %v1955_v61  ;;  %v7805_v40 = vrot.slane %v6065_v6, 1  ;;  %vm7806_vm2 = vweird.f32 %v6107_v18 }
 0x5b8   :  { %v1900_v5 = vsel %vm1899_vm7, %v4570_v2, %v1896_v59  ;;  %vm1959_vm11 = vmor %vm7806_vm2, %vm1958_vm5  ;;  %v1941_v43 = vadd.f32 %v4574_v13, %v1940_v50  ;;  %4577 = vrcp.f32 %v6165_v23  ;;  %v7807_v37 = vrot.slane %v6067_v26, 1 }
 0x5b9   :  { %v2045_v7 = vadd.f32 %v7805_v40, %v2013_v60  ;;  %v6199_v25 = vsel %vm6144_vm1, %v1904_v58, %v1900_v5  ;;  %v1960_v0 = vsel %vm1959_vm11, %v4572_v33, %v1956_v44  ;;  %vm7808_vm9 = vweird.f32 %v6111_v9 }
 0x5ba   :  { %v2047_v16 = vadd.f32 %v7807_v37, %v2015_v56  ;;  %vm1944_vm10 = vmor %vm7808_vm9, %vm1943_vm14  ;;  %v1925_v2 = vmul.f32 %v4576_v53, %v1924_v11  ;;  %v7809_v6 = vrot.slane %v6091_v17, 1  ;;  %v6209_v29 = vsel %vm6151_vm15, %v1964_v49, %v1960_v0 }
 0x5bb   :  { %4579 = vtanh.f32 %v2045_v7  ;;  %v1945_v26 = vsel %vm1944_vm10, %v4574_v13, %v1941_v43  ;;  %v7810_v58 = vrot.slane %v6091_v17, 5  ;;  %v7811_v47 = vrot.slane %v6069_v30, 1 }
 0x5bc   :  { %v2014_v18 = vmul.f32 %v7809_v6, %v6199_v25  ;;  %4581 = vtanh.f32 %v2047_v16  ;;  %v6216_v9 = vsel %vm6157_vm0, %v1949_v12, %v1945_v26  ;;  %v1926_v35 = vadd.f32 %v4576_v53, %v1925_v2 }
 0x5bd   :  { %v2018_v33 = vmul.f32 %v7810_v58, %v6209_v29  ;;  %v7812_v51 = vrot.slane %v6091_v17, 4  ;;  %v2033_v49 = vrot.slane %v6071_v36, 1  ;;  %v1934_v13 = vor.u32 1.1754944e-38, %v1933_v62 }
 0x5be   :  { %v2046_v54 = vadd.f32 %v7811_v47, %v2014_v18  ;;  %v1930_v61 = vsel %vm1929_vm6, %v4576_v53, %v1926_v35  ;;  %vm1932_vm12 = vcmp.eq.f32.partialorder %v1931_v32, 8.507059e+37  ;;  %v2001_v12 = vrot.slane %v6091_v17, 3  ;;  %v4578_v15 = vpop.eup %4577 }
 0x5bf   :  { %v2017_v19 = vmul.f32 %v7812_v51, %v6216_v9  ;;  %4583 = vrcp.f32 %v6170_v28  ;;  %v7813_v30 = vrot.slane %v6076_v31, 1  ;;  %v6231_v59 = vsel %vm1932_vm12, %v1934_v13, %v1930_v61 }
 0x5c0   :  { %4585 = vtanh.f32 %v2046_v54  ;;  %v2016_v36 = vmul.f32 %v2001_v12, %v6231_v59  ;;  %v1983_v39 = vmul.f32 %v4578_v15, %v6165_v23  ;;  %v2032_v62 = vrot.slane %v6080_v22, 1 }
 0x5c1   :  { %v2050_v60 = vadd.f32 %v7813_v30, %v2018_v33  ;;  %v2049_v50 = vadd.f32 %v2033_v49, %v2017_v19  ;;  %v4580_v27 = vpop.eup %4579  ;;  %v1993_v31 = vand.u32 2147483648, %v6165_v23  ;;  %vm1988_vm1 = vweird.f32 %v4578_v15 }
 0x5c2   :  { %v4582_v32 = vpop.eup %4581  ;;  %2077 = vrot.lane.b32.xlu0 %v4580_v27, %s4864_s13  ;;  %v1984_v53 = vsub.f32 1.0, %v1983_v39  ;;  %v2048_v56 = vadd.f32 %v2032_v62, %v2016_v36  ;;  %v1991_v40 = vand.u32 2147483647, %v6165_v23  ;;  %vm1987_vm4 = vweird.f32 %v6165_v23  ;;  %v1669_v27 = vpop.permute.xlu0 %1668 }
 0x5c3   :  { %2081 = vrot.lane.b32.xlu2 %v4582_v32, %s4864_s13  ;;  %4587 = vtanh.f32 %v2050_v60  ;;  %vm1989_vm3 = vmor %vm1987_vm4, %vm1988_vm1  ;;  %v1994_v43 = vor.u32 1.1754944e-38, %v1993_v31  ;;  %v2005_v0 = vrot.slane %v6091_v17, 7  ;;  %v1978_v2 = vand.u32 2147483648, %v6170_v28 }
 0x5c4   :  { %4589 = vtanh.f32 %v2049_v50  ;;  %v1985_v11 = vmul.f32 %v4578_v15, %v1984_v53  ;;  %vm1992_vm15 = vcmp.eq.f32.partialorder %v1991_v40, 8.507059e+37  ;;  %v1976_v58 = vand.u32 2147483647, %v6170_v28 }
 0x5c5   :  { %v4584_v44 = vpop.eup %4583  ;;  %4591 = vtanh.f32 %v2048_v56  ;;  %v2036_v35 = vrot.slane %v6084_v48, 1  ;;  %vm1972_vm0 = vweird.f32 %v6170_v28  ;;  %v1979_v51 = vor.u32 1.1754944e-38, %v1978_v2  ;;  %v7817_v56 = vld [vmem:[#allocation37_spill] sm:$0xff] }
 0x5c6   :  { %v4586_v7 = vpop.eup %4585  ;;  %v1968_v5 = vmul.f32 %v4584_v44, %v6170_v28  ;;  %v1986_v22 = vadd.f32 %v4578_v15, %v1985_v11  ;;  %vm1973_vm5 = vweird.f32 %v4584_v44  ;;  %vm1977_vm14 = vcmp.eq.f32.partialorder %v1976_v58, 8.507059e+37 }
 0x5c7   :  { %2079 = vrot.lane.b32.xlu1 %v4586_v7, %s4864_s13  ;;  %vm1974_vm13 = vmor %vm1972_vm0, %vm1973_vm5  ;;  %v2004_v13 = vrot.slane %v6091_v17, 6  ;;  %v2035_v12 = vrot.slane %v6087_v14, 1  ;;  %v1247_v60 = vsub.f32 1.0, %v6061_v24  ;;  %v1253_v50 = vmul.f32 %v6061_v24, %v6016_v1  ;;  %v7815_v1 = vld [vmem:[#allocation29_spill] sm:$0xff]  ;;  %v7816_v24 = vld [vmem:[#allocation30_spill] sm:$0xff] }
 0x5c8   :  { %v1969_v37 = vsub.f32 1.0, %v1968_v5  ;;  %v1990_v16 = vsel %vm1989_vm3, %v4578_v15, %v1986_v22  ;;  %vm7814_vm7 = vcmask 523264   ;;  %v2063_v32 = vsub.f32 1.0, %v6181_v57  ;;  %v7818_v5 = vld [vmem:[#allocation40_spill] sm:$0xff] }
 0x5c9   :  { %v4588_v6 = vpop.eup %4587  ;;  %v6245_v18 = vsel %vm1992_vm15, %v1994_v43, %v1990_v16  ;;  %v2111_v31 = vmul.f32 %v6181_v57, %v7817_v56  ;;  %v2065_v40 = vsub.f32 1.0, %v6216_v9  ;;  %v2113_v22 = vmul.f32 %v6216_v9, %v7818_v5  ;;  %v7819_v57 = vld [vmem:[#allocation41_spill] sm:$0xff]  ;;  %v7820_v9 = vld [vmem:[#allocation36_spill] sm:$0xff]  ;;  %vm7833_vm1 = vmmov %vm7814_vm7 }
 0x5ca   :  { %v1970_v26 = vmul.f32 %v4584_v44, %v1969_v37  ;;  %v4590_v33 = vpop.eup %4589  ;;  %2087 = vrot.lane.b32.xlu0 %v4588_v6, %s4864_s13  ;;  %v2020_v23 = vmul.f32 %v2005_v0, %v6245_v18  ;;  %v2068_v16 = vsub.f32 1.0, %v6245_v18  ;;  %v2116_v2 = vmul.f32 %v6245_v18, %v7819_v57  ;;  %v7821_v18 = vld [vmem:[#allocation34_spill] sm:$0xff]  ;;  %vm7834_vm4 = vmmov %vm7833_vm1 }
 0x5cb   :  { %2085 = vrot.lane.b32.xlu2 %v4590_v33, %s4864_s13  ;;  %v4592_v19 = vpop.eup %4591  ;;  %v2061_v58 = vsub.f32 1.0, %v6174_v42  ;;  %vm7824_vm8 = vcmask 1041409   ;;  %vm7826_vm2 = vcmask 1042434   ;;  %vm7827_vm11 = vcmask 1043459  }
 0x5cc   :  { %v1971_v47 = vadd.f32 %v4584_v44, %v1970_v26  ;;  %v2052_v54 = vadd.f32 %v2036_v35, %v2020_v23  ;;  %v2109_v23 = vmul.f32 %v6174_v42, %v7820_v9  ;;  %v7822_v42 = vld [vmem:[#allocation39_spill] sm:$0xff]  ;;  %vm7828_vm9 = vcmask 1044484  }
 0x5cd   :  { %vm7829_vm10 = vcmask 1045509   ;;  %vm7830_vm6 = vcmask 1046534   ;;  %vm7831_vm12 = vcmask 1047559  }
 0x5ce   :  { %v1975_v49 = vsel %vm1974_vm13, %v4584_v44, %v1971_v47  ;;  %4593 = vtanh.f32 %v2052_v54  ;;  %v2062_v54 = vsub.f32 1.0, %v6199_v25  ;;  %vm7844_vm13 = vmmov %vm7833_vm1 }
 0x5cf   :  { %2083 = vrot.lane.b32.xlu1 %v4592_v19, %s4864_s13  ;;  %v6255_v61 = vsel %vm1977_vm14, %v1979_v51, %v1975_v49  ;;  %v2110_v19 = vmul.f32 %v6199_v25, %v7821_v18 }
 0x5d0   :  { %v2019_v48 = vmul.f32 %v2004_v13, %v6255_v61 }
 0x5d2   :  { %v2051_v15 = vadd.f32 %v2035_v12, %v2019_v48  ;;  %v2066_v48 = vsub.f32 1.0, %v6209_v29 }
 0x5d4   :  { %4595 = vtanh.f32 %v2051_v15  ;;  %v4594_v28 = vpop.eup %4593  ;;  %v2114_v15 = vmul.f32 %v6209_v29, %v7822_v42 }
 0x5d5   :  { %2091 = vrot.lane.b32.xlu2 %v4594_v28, %s4864_s13 }
 0x5da   :  { %v4596_v30 = vpop.eup %4595 }
 0x5db   :  { %2089 = vrot.lane.b32.xlu1 %v4596_v30, %s4864_s13 }
 0x5f6   :  { %v1250_v17 = vpop.permute.xlu2 %1249 }
 0x5f7   :  { %v1252_v36 = vmul.f32 %v1250_v17, %v1247_v60  ;;  %v2064_v60 = vsub.f32 1.0, %v6231_v59 }
 0x5f9   :  { %v6264_v39 = vadd.f32 %v1253_v50, %v1252_v36  ;;  %v7823_v50 = vld [vmem:[#allocation35_spill] sm:$0xff] }
 0x5fa   :  { %v2112_v36 = vmul.f32 %v6231_v59, %v7823_v50 }
 0x5fb   :  { %v1671_v14 = vsel %vm7814_vm7, %v1669_v27, %v6264_v39 }
 0x5fc   :  { %v1672_v62 = vpack.c.bf16 %v1671_v14, %v1671_v14 }
 0x5fe   :  { %1681 = vmatmul.bf16.vlgmr.msrb.gmra.mxu2 %v1672_v62  ;;  %1694 = vmatmul.bf16.vlgmr.msrb.gmra.mxu3 %v1672_v62 }
 0x5ff   :  { %2635 = vmatpush.bf16.msrb.mxu2 %v5508_v46  ;;  %2648 = vmatpush.bf16.msrb.mxu3 %v5510_v10 }
 0x603   :  { %2636 = vmatpush.bf16.msrb.mxu2 %v5513_v38  ;;  %2649 = vmatpush.bf16.msrb.mxu3 %v5517_v34 }
 0x607   :  { %2637 = vmatpush.bf16.msrb.mxu2 %v7769_v20  ;;  %2650 = vmatpush.bf16.msrb.mxu3 %v7770_v8 }
 0x60b   :  { %2638 = vmatpush.bf16.msrb.mxu2 %v7771_v63  ;;  %2651 = vmatpush.bf16.msrb.mxu3 %v7772_v45 }
 0x60f   :  { %2639 = vmatpush.bf16.msrb.mxu2 %v7773_v52  ;;  %2652 = vmatpush.bf16.msrb.mxu3 %v7774_v41 }
 0x613   :  { %2640 = vmatpush.bf16.msrb.mxu2 %v7775_v21  ;;  %2653 = vmatpush.bf16.msrb.mxu3 %v7776_v4 }
 0x617   :  { %2641 = vmatpush.bf16.msrb.mxu2 %v7777_v3  ;;  %2654 = vmatpush.bf16.msrb.mxu3 %v7778_v55 }
 0x61b   :  { %2642 = vmatpush.bf16.msrb.mxu2 %v7815_v1  ;;  %2655 = vmatpush.bf16.msrb.mxu3 %v7816_v24 }
 0x61d   :  { %v2082_v53 = vpop.permute.xlu2 %2081 }
 0x61e   :  { %v2103_v44 = vmul.f32 %v2082_v53, %v2063_v32 }
 0x620   :  { %v6287_v11 = vadd.f32 %v2111_v31, %v2103_v44 }
 0x622   :  { %2137 = vst [vmem:[#allocation1 + $0x2] ss:$9 sm:$0xff] %v6287_v11  ;;  %v2235_v29 = vpack.c.bf16 %v6287_v11, %v6287_v11 }
 0x624   :  { %v2251_v44 = vunpack.c.l.b16 %v2235_v29 }
 0x625   :  { %v2086_v7 = vpop.permute.xlu2 %2085 }
 0x626   :  { %v2105_v43 = vmul.f32 %v2086_v7, %v2065_v40  ;;  %v2067_v7 = vsub.f32 1.0, %v6255_v61 }
 0x628   :  { %v6293_v37 = vadd.f32 %v2113_v22, %v2105_v43 }
 0x62a   :  { %2141 = vst [vmem:[#allocation1 + $0x4] ss:$9 sm:$0xff] %v6293_v37  ;;  %v2237_v59 = vpack.c.bf16 %v6293_v37, %v6293_v37 }
 0x62c   :  { %v2253_v57 = vunpack.c.l.b16 %v2237_v59  ;;  %v7835_v59 = vld [vmem:[#allocation7_spill] sm:$0xff] }
 0x62f   :  { %v2092_v0 = vpop.permute.xlu2 %2091 }
 0x630   :  { %v2108_v6 = vmul.f32 %v2092_v0, %v2068_v16  ;;  %v2259_v0 = vrot.slane %v2251_v44, 6 }
 0x632   :  { %v6299_v26 = vadd.f32 %v2116_v2, %v2108_v6  ;;  %v7825_v2 = vld [vmem:[#allocation38_spill] sm:$0xff] }
 0x633   :  { %v2115_v6 = vmul.f32 %v6255_v61, %v7825_v2  ;;  %v7842_v2 = vld [vmem:[#allocation14_spill] sm:$0xff] }
 0x634   :  { %2147 = vst [vmem:[#allocation1 + $0x7] ss:$9 sm:$0xff] %v6299_v26  ;;  %v2078_v33 = vpop.permute.xlu0 %2077 }
 0x635   :  { %v2101_v35 = vmul.f32 %v2078_v33, %v2061_v58  ;;  %v2240_v33 = vpack.c.bf16 %v6299_v26, %v6299_v26 }
 0x637   :  { %v6305_v47 = vadd.f32 %v2109_v23, %v2101_v35 }
 0x639   :  { %v2080_v51 = vpop.permute.xlu1 %2079  ;;  %2133 = vst [vmem:[#allocation1] ss:$9 sm:$0xff] %v6305_v47  ;;  %v2233_v53 = vpack.c.bf16 %v6305_v47, %v6305_v47 }
 0x63a   :  { %v2102_v49 = vmul.f32 %v2080_v51, %v2062_v54  ;;  %v2263_v51 = vrot.slane %v2253_v57, 4  ;;  %v7841_v57 = vld [vmem:[#allocation12_spill] sm:$0xff] }
 0x63b   :  { %v2249_v40 = vunpack.c.l.b16 %v2233_v53  ;;  %v6362_v53 = vld [vmem:[%s7567_s6] ss:$0 sm:$0xff] }
 0x63c   :  { %v6311_v13 = vadd.f32 %v2110_v19, %v2102_v49  ;;  %v2088_v12 = vpop.permute.xlu0 %2087  ;;  %v2256_v19 = vunpack.c.l.b16 %v2240_v33 }
 0x63d   :  { %v2106_v28 = vmul.f32 %v2088_v12, %v2066_v48 }
 0x63e   :  { %2135 = vst [vmem:[#allocation1 + $0x1] ss:$9 sm:$0xff] %v6311_v13  ;;  %v2234_v17 = vpack.c.bf16 %v6311_v13, %v6311_v13  ;;  %v2269_v42 = vrot.slane %v2256_v19, 1 }
 0x63f   :  { %v6317_v30 = vadd.f32 %v2114_v15, %v2106_v28 }
 0x640   :  { %v2250_v62 = vunpack.c.l.b16 %v2234_v17 }
 0x641   :  { %v2084_v25 = vpop.permute.xlu1 %2083  ;;  %2143 = vst [vmem:[#allocation1 + $0x5] ss:$9 sm:$0xff] %v6317_v30  ;;  %v2238_v22 = vpack.c.bf16 %v6317_v30, %v6317_v30 }
 0x642   :  { %v2104_v27 = vmul.f32 %v2084_v25, %v2064_v60  ;;  %v2257_v56 = vrot.slane %v2250_v62, 7 }
 0x643   :  { %v2254_v35 = vunpack.c.l.b16 %v2238_v22  ;;  %v7838_v22 = vld [vmem:[#allocation11_spill] sm:$0xff] }
 0x644   :  { %v6325_v14 = vadd.f32 %v2112_v36, %v2104_v27  ;;  %v2258_v5 = vsel %vm7824_vm8, %v2257_v56, %v2249_v40  ;;  %v7832_v27 = vld [vmem:[#allocation31_spill] sm:$0xff]  ;;  %v7836_v40 = vld [vmem:[#allocation9_spill] sm:$0xff] }
 0x645   :  { %v2260_v9 = vsel %vm7826_vm2, %v2259_v0, %v2258_v5  ;;  %v2265_v48 = vrot.slane %v2254_v35, 3  ;;  %v7837_v5 = vld [vmem:[#allocation8_spill] sm:$0xff]  ;;  %v7840_v0 = vld [vmem:[#allocation13_spill] sm:$0xff] }
 0x646   :  { %2139 = vst [vmem:[#allocation1 + $0x3] ss:$9 sm:$0xff] %v6325_v14  ;;  %v2236_v32 = vpack.c.bf16 %v6325_v14, %v6325_v14 }
 0x648   :  { %v2252_v31 = vunpack.c.l.b16 %v2236_v32 }
 0x64a   :  { %v2261_v43 = vrot.slane %v2252_v31, 5 }
 0x64c   :  { %v2262_v54 = vsel %vm7827_vm11, %v2261_v43, %v2260_v9 }
 0x64d   :  { %v2090_v16 = vpop.permute.xlu1 %2089  ;;  %v2264_v61 = vsel %vm7828_vm9, %v2263_v51, %v2262_v54 }
 0x64e   :  { %v2107_v58 = vmul.f32 %v2090_v16, %v2067_v7  ;;  %v2266_v15 = vsel %vm7829_vm10, %v2265_v48, %v2264_v61  ;;  %v7839_v16 = vld [vmem:[#allocation10_spill] sm:$0xff]  ;;  %v6378_v48 = vld [vmem:[%s7568_s7] ss:$0 sm:$0xff] }
 0x650   :  { %v6345_v23 = vadd.f32 %v2115_v6, %v2107_v58 }
 0x652   :  { %2145 = vst [vmem:[#allocation1 + $0x6] ss:$9 sm:$0xff] %v6345_v23  ;;  %v2239_v18 = vpack.c.bf16 %v6345_v23, %v6345_v23 }
 0x654   :  { %v2255_v49 = vunpack.c.l.b16 %v2239_v18 }
 0x656   :  { %v2267_v12 = vrot.slane %v2255_v49, 2 }
 0x658   :  { %v2268_v28 = vsel %vm7830_vm6, %v2267_v12, %v2266_v15 }
 0x659   :  { %v2270_v60 = vsel %vm7831_vm12, %v2269_v42, %v2268_v28  ;;  %v2148_v25 = vld [vmem:[#allocation1] sm:$0xff] }
 0x65a   :  { %v2271_v17 = vpack.c.b16 %v2270_v60, %v2270_v60 }
 0x65c   :  { %2272 = vrot.lane.b32.xlu0 %v2271_v17, %s4864_s13 }
 0x664   :  { %2149 = vrot.lane.b32.xlu0 %v2148_v25, %s4864_s13  ;;  %v6382_v25 = vld [vmem:[#allocation2 + $0x4] ss:$8 sm:$0x3] }
 0x681   :  { %v1682_v50 = vpop.f32.mrf.mxu2  ;;  %v1695_v36 = vpop.f32.mrf.mxu3 }
 0x682   :  { %v1720_v62 = vadd.f32 %v1695_v36, %v7832_v27  ;;  %v1699_v56 = vadd.f32 %v6362_v53, %v1682_v50  ;;  %v1719_v12 = vadd.f32 %v6378_v48, %v1695_v36 }
 0x684   :  { %1722 = vrot.lane.b32.xlu1 %v1720_v62, %s4864_s13  ;;  %v4299_v31 = vmul.f32 -1.442695, %v1699_v56 }
 0x686   :  { %4597 = vpow2.f32 %v4299_v31 }
 0x689   :  { %v1684_v29 = vpop.f32.mrf.mxu2  ;;  %v1697_v32 = vpop.f32.mrf.mxu3 }
 0x68c   :  { %v4598_v7 = vpop.eup %4597 }
 0x68d   :  { %v1703_v43 = vadd.f32 1.0, %v4598_v7 }
 0x68f   :  { %4599 = vrcp.f32 %v1703_v43  ;;  %v1715_v54 = vand.u32 2147483648, %v1703_v43  ;;  %vm1709_vm15 = vweird.f32 %v1703_v43  ;;  %v1713_v51 = vand.u32 2147483647, %v1703_v43 }
 0x691   :  { %v1716_v19 = vor.u32 1.1754944e-38, %v1715_v54  ;;  %vm1714_vm0 = vcmp.eq.f32.partialorder %v1713_v51, 8.507059e+37 }
 0x695   :  { %v4600_v6 = vpop.eup %4599 }
 0x696   :  { %v1705_v58 = vmul.f32 %v4600_v6, %v1703_v43  ;;  %vm1710_vm3 = vweird.f32 %v4600_v6  ;;  %v6385_v43 = vld [vmem:[#allocation2 + $0x24] ss:$8 sm:$0x3] }
 0x697   :  { %vm1711_vm5 = vmor %vm1709_vm15, %vm1710_vm3 }
 0x698   :  { %v1706_v33 = vsub.f32 1.0, %v1705_v58 }
 0x69a   :  { %v1707_v9 = vmul.f32 %v4600_v6, %v1706_v33 }
 0x69c   :  { %v1708_v35 = vadd.f32 %v4600_v6, %v1707_v9  ;;  %v6388_v9 = vld [vmem:[#allocation2 + $0x14] ss:$8 sm:$0x3] }
 0x69e   :  { %v1712_v18 = vsel %vm1711_vm5, %v4600_v6, %v1708_v35 }
 0x69f   :  { %v1717_v49 = vsel %vm1714_vm0, %v1716_v19, %v1712_v18  ;;  %v6392_v18 = vld [vmem:[#allocation2 + $0x54] ss:$8 sm:$0x3]  ;;  %v6394_v19 = vld [vmem:[#allocation2 + $0x44] ss:$8 sm:$0x3] }
 0x6a0   :  { %v1728_v7 = vsub.f32 1.0, %v1717_v49  ;;  %v1734_v35 = vmul.f32 %v1717_v49, %v6264_v39 }
 0x6ce   :  { %v2273_v44 = vpop.permute.xlu0 %2272 }
 0x6cf   :  { %4311 = vmatmul.msk.bf16.vlgmr.msra.gmra.mxu2 %vm7833_vm1, %v2273_v44  ;;  %4312 = vmatmul.msk.bf16.vlgmr.msra.gmra.mxu3 %vm7834_vm4, %v2273_v44 }
 0x6d0   :  { %3243 = vmatpush.bf16.msra.mxu2 %v7835_v59  ;;  %3256 = vmatpush.bf16.msra.mxu3 %v7836_v40 }
 0x6d4   :  { %3244 = vmatpush.bf16.msra.mxu2 %v7837_v5  ;;  %3257 = vmatpush.bf16.msra.mxu3 %v7838_v22 }
 0x6d8   :  { %3245 = vmatpush.bf16.msra.mxu2 %v7839_v16  ;;  %3258 = vmatpush.bf16.msra.mxu3 %v7840_v0 }
 0x6dc   :  { %3246 = vmatpush.bf16.msra.mxu2 %v7841_v57  ;;  %3259 = vmatpush.bf16.msra.mxu3 %v7842_v2 }
 0x6f6   :  { %v1723_v61 = vpop.permute.xlu1 %1722 }
 0x6f7   :  { %v1725_v42 = vmul.f32 %v1723_v61, %v1717_v49  ;;  %v2150_v49 = vpop.permute.xlu0 %2149 }
 0x6f9   :  { %v1726_v15 = vadd.f32 %v1725_v42, %v1719_v12 }
 0x6fb   :  { %4601 = vtanh.f32 %v1726_v15 }
 0x701   :  { %v4602_v28 = vpop.eup %4601 }
 0x702   :  { %1730 = vrot.lane.b32.xlu2 %v4602_v28, %s4864_s13  ;;  %v6398_v28 = vld [vmem:[#allocation2 + $0x34] ss:$8 sm:$0x3] }
 0x752   :  { %v2286_v60 = vpop.f32.mrf.mxu2  ;;  %v2299_v17 = vpop.f32.mrf.mxu3 }
 0x753   :  { %v2318_v50 = vadd.f32 %v2286_v60, %v6382_v25  ;;  %v2305_v29 = vrot.slane %v2286_v60, 2  ;;  %v2304_v32 = vrot.slane %v2286_v60, 1  ;;  %v2307_v44 = vrot.slane %v2286_v60, 4 }
 0x754   :  { %v2308_v36 = vrot.slane %v2286_v60, 5  ;;  %v2306_v6 = vrot.slane %v2286_v60, 3 }
 0x755   :  { %v4313_v62 = vmul.f32 -1.442695, %v2318_v50  ;;  %v2320_v33 = vadd.f32 %v2305_v29, %v6385_v43  ;;  %v2319_v51 = vadd.f32 %v2304_v32, %v6388_v9  ;;  %v2322_v15 = vadd.f32 %v2307_v44, %v6394_v19 }
 0x756   :  { %v2323_v42 = vadd.f32 %v2308_v36, %v6392_v18  ;;  %v2310_v50 = vrot.slane %v2286_v60, 7  ;;  %v6408_v36 = vld [vmem:[#allocation2 + $0x74] ss:$8 sm:$0x3] }
 0x757   :  { %4603 = vpow2.f32 %v4313_v62  ;;  %v4315_v12 = vmul.f32 -1.442695, %v2320_v33  ;;  %v4314_v39 = vmul.f32 -1.442695, %v2319_v51 }
 0x758   :  { %v4318_v32 = vmul.f32 -1.442695, %v2323_v42  ;;  %v2325_v33 = vadd.f32 %v2310_v50, %v6408_v36 }
 0x759   :  { %4605 = vpow2.f32 %v4315_v12  ;;  %v6422_v12 = vld [vmem:[#allocation2 + $0x64] ss:$8 sm:$0x3] }
 0x75a   :  { %v2288_v56 = vpop.f32.mrf.mxu2  ;;  %v2301_v31 = vpop.f32.mrf.mxu3 }
 0x75b   :  { %v4317_v56 = vmul.f32 -1.442695, %v2322_v15  ;;  %v2321_v31 = vadd.f32 %v2306_v6, %v6398_v28  ;;  %v6414_v6 = vld [vmem:[%s7565_s4] ss:$0 sm:$0xff] }
 0x75c   :  { %v1731_v58 = vpop.permute.xlu2 %1730  ;;  %7845 = vst [vmem:[#allocation33_spill] sm:$0xff] %v6414_v6 }
 0x75d   :  { %v1733_v54 = vmul.f32 %v1731_v58, %v1728_v7  ;;  %v4604_v61 = vpop.eup %4603  ;;  %v2309_v58 = vrot.slane %v2286_v60, 6 }
 0x75e   :  { %v6402_v29 = vadd.f32 1.0, %v4604_v61  ;;  %v4320_v61 = vmul.f32 -1.442695, %v2325_v33 }
 0x75f   :  { %v6400_v62 = vadd.f32 %v1734_v35, %v1733_v54  ;;  %v4316_v35 = vmul.f32 -1.442695, %v2321_v31  ;;  %v6417_v54 = vadd.f32 %v6414_v6, %v2299_v17  ;;  %v4606_v60 = vpop.eup %4605  ;;  %v2324_v17 = vadd.f32 %v2309_v58, %v6422_v12 }
 0x760   :  { %4607 = vrcp.f32 %v6402_v29  ;;  %v6424_v15 = vadd.f32 1.0, %v4606_v60  ;;  %vm2363_vm7 = vweird.f32 %v6402_v29 }
 0x761   :  { %7843 = vst [vmem:[#allocation32_spill] sm:$0xff] %v6400_v62  ;;  %v2152_v7 = vsel %vm7844_vm13, %v2150_v49, %v6400_v62  ;;  %4609 = vpow2.f32 %v4314_v39  ;;  %v4319_v51 = vmul.f32 -1.442695, %v2324_v17  ;;  %v7859_v62 = vrot.slane %v6388_v9, 1 }
 0x762   :  { %v2153_v44 = vpack.c.bf16 %v2152_v7, %v2152_v7  ;;  %4611 = vpow2.f32 %v4318_v32  ;;  %v2397_v60 = vand.u32 2147483647, %v6424_v15  ;;  %v2399_v6 = vand.u32 2147483648, %v6424_v15 }
 0x763   :  { %4613 = vpow2.f32 %v4317_v56  ;;  %vm2393_vm11 = vweird.f32 %v6424_v15 }
 0x764   :  { %2162 = vmatmul.bf16.vlgmr.msrb.gmra.mxu0 %v2153_v44  ;;  %2175 = vmatmul.bf16.vlgmr.msrb.gmra.mxu1 %v2153_v44  ;;  %4615 = vpow2.f32 %v4316_v35  ;;  %v2367_v44 = vand.u32 2147483647, %v6402_v29  ;;  %v2369_v35 = vand.u32 2147483648, %v6402_v29  ;;  %vm6460_vm9 = vcmp.eq.f32.partialorder %v2397_v60, 8.507059e+37 }
 0x765   :  { %3116 = vmatpush.bf16.msrb.mxu0 %v5508_v46  ;;  %3129 = vmatpush.bf16.msrb.mxu1 %v5510_v10  ;;  %4617 = vrcp.f32 %v6424_v15 }
 0x766   :  { %v4608_v42 = vpop.eup %4607  ;;  %4619 = vpow2.f32 %v4320_v61  ;;  %vm2368_vm8 = vcmp.eq.f32.partialorder %v2367_v44, 8.507059e+37  ;;  %v2400_v44 = vor.u32 1.1754944e-38, %v2399_v6 }
 0x767   :  { %v4610_v49 = vpop.eup %4609  ;;  %v2359_v32 = vmul.f32 %v4608_v42, %v6402_v29  ;;  %vm2364_vm14 = vweird.f32 %v4608_v42  ;;  %v2370_v29 = vor.u32 1.1754944e-38, %v2369_v35 }
 0x768   :  { %v4612_v7 = vpop.eup %4611  ;;  %v6438_v50 = vadd.f32 1.0, %v4610_v49  ;;  %vm2365_vm2 = vmor %vm2363_vm7, %vm2364_vm14 }
 0x769   :  { %3117 = vmatpush.bf16.msrb.mxu0 %v5513_v38  ;;  %3130 = vmatpush.bf16.msrb.mxu1 %v5517_v34  ;;  %v4614_v58 = vpop.eup %4613  ;;  %v2360_v39 = vsub.f32 1.0, %v2359_v32  ;;  %v6440_v56 = vadd.f32 1.0, %v4612_v7 }
 0x76a   :  { %v6443_v31 = vadd.f32 1.0, %v4614_v58  ;;  %4621 = vrcp.f32 %v6438_v50  ;;  %v4616_v17 = vpop.eup %4615  ;;  %v2384_v32 = vand.u32 2147483648, %v6438_v50  ;;  %v2382_v58 = vand.u32 2147483647, %v6438_v50 }
 0x76b   :  { %v2361_v33 = vmul.f32 %v4608_v42, %v2360_v39  ;;  %4623 = vrcp.f32 %v6440_v56  ;;  %v4618_v7 = vpop.eup %4617  ;;  %vm2378_vm10 = vweird.f32 %v6438_v50  ;;  %v2444_v35 = vand.u32 2147483648, %v6440_v56 }
 0x76c   :  { %4625 = vrcp.f32 %v6443_v31  ;;  %v4620_v61 = vpop.eup %4619  ;;  %v2427_v38 = vand.u32 2147483647, %v6443_v31  ;;  %vm2438_vm6 = vweird.f32 %v6440_v56  ;;  %vm6478_vm12 = vcmp.eq.f32.partialorder %v2382_v58, 8.507059e+37 }
 0x76d   :  { %3118 = vmatpush.bf16.msrb.mxu0 %v7769_v20  ;;  %3131 = vmatpush.bf16.msrb.mxu1 %v7770_v8  ;;  %v2362_v39 = vadd.f32 %v4608_v42, %v2361_v33  ;;  %4627 = vpow2.f32 %v4319_v51  ;;  %v2389_v8 = vmul.f32 %v4618_v7, %v6424_v15  ;;  %v2442_v20 = vand.u32 2147483647, %v6440_v56 }
 0x76e   :  { %v6470_v51 = vadd.f32 1.0, %v4616_v17  ;;  %vm2423_vm1 = vweird.f32 %v6443_v31  ;;  %v6484_v17 = vadd.f32 1.0, %v4620_v61  ;;  %vm2394_vm4 = vweird.f32 %v4618_v7 }
 0x76f   :  { %v2366_v49 = vsel %vm2365_vm2, %v4608_v42, %v2362_v39  ;;  %v2390_v60 = vsub.f32 1.0, %v2389_v8  ;;  %v2385_v39 = vor.u32 1.1754944e-38, %v2384_v32  ;;  %vm6489_vm3 = vcmp.eq.f32.partialorder %v2442_v20, 8.507059e+37  ;;  %vm2395_vm5 = vmor %vm2393_vm11, %vm2394_vm4 }
 0x770   :  { %v6465_v34 = vsel %vm2368_vm8, %v2370_v29, %v2366_v49  ;;  %v4622_v42 = vpop.eup %4621  ;;  %4629 = vrcp.f32 %v6470_v51  ;;  %v2445_v57 = vor.u32 1.1754944e-38, %v2444_v35  ;;  %vm6494_vm15 = vcmp.eq.f32.partialorder %v2427_v38, 8.507059e+37 }
 0x771   :  { %3119 = vmatpush.bf16.msrb.mxu0 %v7771_v63  ;;  %3132 = vmatpush.bf16.msrb.mxu1 %v7772_v45  ;;  %v2494_v6 = vmul.f32 %v6417_v54, %v6465_v34  ;;  %v4624_v49 = vpop.eup %4623  ;;  %v2374_v29 = vmul.f32 %v4622_v42, %v6438_v50  ;;  %v7850_v63 = vrot.slane %v6382_v25, 1  ;;  %v2391_v32 = vmul.f32 %v4618_v7, %v2390_v60 }
 0x772   :  { %v4626_v45 = vpop.eup %4625  ;;  %v2434_v46 = vmul.f32 %v4624_v49, %v6440_v56  ;;  %v2429_v20 = vand.u32 2147483648, %v6443_v31  ;;  %vm2379_vm0 = vweird.f32 %v4622_v42  ;;  %vm2439_vm13 = vweird.f32 %v4624_v49 }
 0x773   :  { %v2526_v8 = vadd.f32 %v7850_v63, %v2494_v6  ;;  %v4628_v58 = vpop.eup %4627  ;;  %v2375_v2 = vsub.f32 1.0, %v2374_v29  ;;  %v2419_v0 = vmul.f32 %v4626_v45, %v6443_v31  ;;  %v2392_v63 = vadd.f32 %v4618_v7, %v2391_v32  ;;  %vm2380_vm7 = vmor %vm2378_vm10, %vm2379_vm0 }
 0x774   :  { %v2435_v25 = vsub.f32 1.0, %v2434_v46  ;;  %v6504_v29 = vadd.f32 1.0, %v4628_v58  ;;  %vm2424_vm14 = vweird.f32 %v4626_v45  ;;  %vm2440_vm8 = vmor %vm2438_vm6, %vm2439_vm13  ;;  %v7858_v31 = vrot.slane %v6417_v54, 5 }
 0x775   :  { %3120 = vmatpush.bf16.msrb.mxu0 %v7773_v52  ;;  %3133 = vmatpush.bf16.msrb.mxu1 %v7774_v41  ;;  %4631 = vtanh.f32 %v2526_v8  ;;  %v2376_v6 = vmul.f32 %v4622_v42, %v2375_v2  ;;  %v2420_v35 = vsub.f32 1.0, %v2419_v0  ;;  %v2396_v38 = vsel %vm2395_vm5, %v4618_v7, %v2392_v63  ;;  %vm2425_vm2 = vmor %vm2423_vm1, %vm2424_vm14 }
 0x776   :  { %4633 = vrcp.f32 %v6484_v17  ;;  %v2436_v60 = vmul.f32 %v4624_v49, %v2435_v25  ;;  %v4630_v52 = vpop.eup %4629  ;;  %v6508_v8 = vsel %vm6460_vm9, %v2400_v44, %v2396_v38  ;;  %v7855_v0 = vrot.slane %v6417_v54, 2 }
 0x777   :  { %v2377_v46 = vadd.f32 %v4622_v42, %v2376_v6  ;;  %v2421_v32 = vmul.f32 %v4626_v45, %v2420_v35  ;;  %v2430_v7 = vor.u32 1.1754944e-38, %v2429_v20  ;;  %v2404_v33 = vmul.f32 %v4630_v52, %v6470_v51 }
 0x778   :  { %v2496_v2 = vmul.f32 %v7855_v0, %v6508_v8  ;;  %v2437_v15 = vadd.f32 %v4624_v49, %v2436_v60  ;;  %v2412_v63 = vand.u32 2147483647, %v6470_v51  ;;  %v2414_v25 = vand.u32 2147483648, %v6470_v51 }
 0x779   :  { %3121 = vmatpush.bf16.msrb.mxu0 %v7775_v21  ;;  %3134 = vmatpush.bf16.msrb.mxu1 %v7776_v4  ;;  %v2381_v44 = vsel %vm2380_vm7, %v4622_v42, %v2377_v46  ;;  %v2422_v58 = vadd.f32 %v4626_v45, %v2421_v32  ;;  %v7856_v35 = vrot.slane %v6385_v43, 1  ;;  %v2405_v56 = vsub.f32 1.0, %v2404_v33 }
 0x77a   :  { %v6528_v50 = vsel %vm6478_vm12, %v2385_v39, %v2381_v44  ;;  %v2441_v20 = vsel %vm2440_vm8, %v4624_v49, %v2437_v15  ;;  %v7857_v60 = vrot.slane %v6417_v54, 1  ;;  %vm2409_vm11 = vweird.f32 %v4630_v52 }
 0x77b   :  { %v4632_v6 = vpop.eup %4631  ;;  %v2528_v38 = vadd.f32 %v7856_v35, %v2496_v2  ;;  %v6539_v43 = vsel %vm6489_vm3, %v2445_v57, %v2441_v20  ;;  %v2426_v10 = vsel %vm2425_vm2, %v4626_v45, %v2422_v58  ;;  %v2406_v32 = vmul.f32 %v4630_v52, %v2405_v56 }
 0x77c   :  { %v4634_v42 = vpop.eup %4633  ;;  %2558 = vrot.lane.b32.xlu0 %v4632_v6, %s4864_s13  ;;  %v2495_v46 = vmul.f32 %v7857_v60, %v6528_v50  ;;  %v2499_v39 = vmul.f32 %v7858_v31, %v6539_v43  ;;  %v6547_v49 = vsel %vm6494_vm15, %v2430_v7, %v2426_v10  ;;  %v7860_v45 = vrot.slane %v6417_v54, 4 }
 0x77d   :  { %3122 = vmatpush.bf16.msrb.mxu0 %v7777_v3  ;;  %4635 = vtanh.f32 %v2528_v38  ;;  %3135 = vmatpush.bf16.msrb.mxu1 %v7778_v55  ;;  %v2482_v2 = vrot.slane %v6417_v54, 3  ;;  %v2464_v15 = vmul.f32 %v4634_v42, %v6484_v17  ;;  %v7861_v33 = vrot.slane %v6392_v18, 1 }
 0x77e   :  { %v2527_v57 = vadd.f32 %v7859_v62, %v2495_v46  ;;  %v2498_v0 = vmul.f32 %v7860_v45, %v6547_v49  ;;  %v2407_v61 = vadd.f32 %v4630_v52, %v2406_v32  ;;  %vm2408_vm9 = vweird.f32 %v6470_v51 }
 0x77f   :  { %v2531_v44 = vadd.f32 %v7861_v33, %v2499_v39  ;;  %4637 = vrcp.f32 %v6504_v29  ;;  %vm2410_vm10 = vmor %vm2408_vm9, %vm2409_vm11  ;;  %vm2413_vm6 = vcmp.eq.f32.partialorder %v2412_v63, 8.507059e+37  ;;  %v2415_v9 = vor.u32 1.1754944e-38, %v2414_v25 }
 0x780   :  { %4639 = vtanh.f32 %v2527_v57  ;;  %v2465_v7 = vsub.f32 1.0, %v2464_v15  ;;  %v7862_v58 = vrot.slane %v6394_v19, 1  ;;  %v2411_v35 = vsel %vm2410_vm10, %v4630_v52, %v2407_v61 }
 0x781   :  { %3123 = vmatpush.bf16.msrb.mxu0 %v7815_v1  ;;  %4641 = vtanh.f32 %v2531_v44  ;;  %v2474_v18 = vand.u32 2147483648, %v6484_v17  ;;  %3136 = vmatpush.bf16.msrb.mxu1 %v7816_v24  ;;  %v6567_v51 = vsel %vm2413_vm6, %v2415_v9, %v2411_v35  ;;  %vm2469_vm12 = vweird.f32 %v4634_v42 }
 0x782   :  { %v2530_v6 = vadd.f32 %v7862_v58, %v2498_v0  ;;  %v2466_v38 = vmul.f32 %v4634_v42, %v2465_v7  ;;  %v2472_v20 = vand.u32 2147483647, %v6484_v17  ;;  %v2497_v25 = vmul.f32 %v2482_v2, %v6567_v51 }
 0x783   :  { %v4636_v63 = vpop.eup %4635  ;;  %v2513_v56 = vrot.slane %v6398_v28, 1  ;;  %vm2468_vm1 = vweird.f32 %v6484_v17  ;;  %v2475_v46 = vor.u32 1.1754944e-38, %v2474_v18  ;;  %v2486_v39 = vrot.slane %v6417_v54, 7 }
 0x784   :  { %2562 = vrot.lane.b32.xlu2 %v4636_v63, %s4864_s13  ;;  %v2467_v19 = vadd.f32 %v4634_v42, %v2466_v38  ;;  %4643 = vtanh.f32 %v2530_v6  ;;  %vm2470_vm4 = vmor %vm2468_vm1, %vm2469_vm12  ;;  %vm2473_vm3 = vcmp.eq.f32.partialorder %v2472_v20, 8.507059e+37  ;;  %v2517_v57 = vrot.slane %v6408_v36, 1 }
 0x785   :  { %v4638_v52 = vpop.eup %4637  ;;  %v2529_v60 = vadd.f32 %v2513_v56, %v2497_v25  ;;  %v2459_v0 = vand.u32 2147483648, %v6504_v29  ;;  %v2457_v15 = vand.u32 2147483647, %v6504_v29  ;;  %vm2453_vm5 = vweird.f32 %v6504_v29 }
 0x786   :  { %v4640_v10 = vpop.eup %4639  ;;  %v2471_v31 = vsel %vm2470_vm4, %v4634_v42, %v2467_v19  ;;  %v2449_v32 = vmul.f32 %v4638_v52, %v6504_v29  ;;  %vm2454_vm15 = vweird.f32 %v4638_v52  ;;  %v2485_v36 = vrot.slane %v6417_v54, 6 }
 0x787   :  { %v4642_v62 = vpop.eup %4641  ;;  %2560 = vrot.lane.b32.xlu1 %v4640_v10, %s4864_s13  ;;  %v2476_v28 = vsel %vm2473_vm3, %v2475_v46, %v2471_v31  ;;  %4645 = vtanh.f32 %v2529_v60  ;;  %vm2455_vm0 = vmor %vm2453_vm5, %vm2454_vm15  ;;  %v2460_v61 = vor.u32 1.1754944e-38, %v2459_v0  ;;  %vm2458_vm13 = vcmp.eq.f32.partialorder %v2457_v15, 8.507059e+37 }
 0x788   :  { %2568 = vrot.lane.b32.xlu0 %v4642_v62, %s4864_s13  ;;  %v2501_v17 = vmul.f32 %v2486_v39, %v2476_v28  ;;  %v2450_v45 = vsub.f32 1.0, %v2449_v32  ;;  %v2516_v35 = vrot.slane %v6422_v12, 1  ;;  %v2544_v20 = vsub.f32 1.0, %v6508_v8 }
 0x789   :  { %v2592_v54 = vmul.f32 %v6508_v8, %v6287_v11  ;;  %v2546_v60 = vsub.f32 1.0, %v6547_v49  ;;  %v2594_v11 = vmul.f32 %v6547_v49, %v6293_v37  ;;  %v2549_v32 = vsub.f32 1.0, %v2476_v28 }
 0x78a   :  { %v2533_v2 = vadd.f32 %v2517_v57, %v2501_v17  ;;  %v2451_v42 = vmul.f32 %v4638_v52, %v2450_v45  ;;  %v4644_v33 = vpop.eup %4643  ;;  %v2542_v62 = vsub.f32 1.0, %v6465_v34  ;;  %v2597_v45 = vmul.f32 %v2476_v28, %v6299_v26 }
 0x78b   :  { %v2543_v15 = vsub.f32 1.0, %v6528_v50  ;;  %v2591_v26 = vmul.f32 %v6528_v50, %v6311_v13  ;;  %v2593_v50 = vmul.f32 %v6567_v51, %v6325_v14  ;;  %vm7863_vm14 = vcmask 1041409  }
 0x78c   :  { %2566 = vrot.lane.b32.xlu2 %v4644_v33, %s4864_s13  ;;  %v2452_v44 = vadd.f32 %v4638_v52, %v2451_v42  ;;  %4647 = vtanh.f32 %v2533_v2  ;;  %v2590_v2 = vmul.f32 %v6465_v34, %v6305_v47  ;;  %v2595_v34 = vmul.f32 %v6539_v43, %v6317_v30 }
 0x78d   :  { %v4646_v9 = vpop.eup %4645  ;;  %vm7864_vm7 = vcmask 1042434   ;;  %vm7865_vm8 = vcmask 1043459   ;;  %vm7866_vm2 = vcmask 1044484   ;;  %vm7867_vm11 = vcmask 1045509  }
 0x78e   :  { %v2456_v7 = vsel %vm2455_vm0, %v4638_v52, %v2452_v44  ;;  %v2547_v44 = vsub.f32 1.0, %v6539_v43  ;;  %vm7868_vm9 = vcmask 1046534   ;;  %vm7869_vm10 = vcmask 1047559  }
 0x78f   :  { %2564 = vrot.lane.b32.xlu1 %v4646_v9, %s4864_s13  ;;  %v6585_v58 = vsel %vm2458_vm13, %v2460_v61, %v2456_v7  ;;  %vm7870_vm3 = vcmask 523264  }
 0x790   :  { %v2500_v6 = vmul.f32 %v2485_v36, %v6585_v58  ;;  %v2545_v36 = vsub.f32 1.0, %v6567_v51  ;;  %vm7871_vm15 = vmmov %vm7870_vm3 }
 0x791   :  { %vm7876_vm5 = vmmov %vm7870_vm3 }
 0x792   :  { %v2532_v18 = vadd.f32 %v2516_v35, %v2500_v6  ;;  %v4648_v38 = vpop.eup %4647 }
 0x794   :  { %2572 = vrot.lane.b32.xlu2 %v4648_v38, %s4864_s13  ;;  %4649 = vtanh.f32 %v2532_v18 }
 0x79a   :  { %v4650_v29 = vpop.eup %4649 }
 0x79b   :  { %2570 = vrot.lane.b32.xlu1 %v4650_v29, %s4864_s13 }
 0x7de   :  { %v2563_v63 = vpop.permute.xlu2 %2562 }
 0x7df   :  { %v2584_v25 = vmul.f32 %v2563_v63, %v2544_v20 }
 0x7e1   :  { %v6594_v56 = vpop.f32.mrf.mxu0  ;;  %v6596_v19 = vpop.f32.mrf.mxu1  ;;  %v6598_v12 = vadd.f32 %v2592_v54, %v2584_v25  ;;  %v2548_v25 = vsub.f32 1.0, %v6585_v58 }
 0x7e2   :  { %v2201_v52 = vadd.f32 %v6596_v19, %v7832_v27 }
 0x7e3   :  { %2618 = vst [vmem:[#allocation1 + $0x2] ss:$9 sm:$0xff] %v6598_v12  ;;  %v2716_v18 = vpack.c.bf16 %v6598_v12, %v6598_v12 }
 0x7e4   :  { %2203 = vrot.lane.b32.xlu1 %v2201_v52, %s4864_s13 }
 0x7e5   :  { %v2732_v54 = vunpack.c.l.b16 %v2716_v18 }
 0x7e6   :  { %v2567_v46 = vpop.permute.xlu2 %2566 }
 0x7e7   :  { %v2586_v8 = vmul.f32 %v2567_v46, %v2546_v60 }
 0x7e9   :  { %v2165_v10 = vpop.f32.mrf.mxu0  ;;  %v2178_v31 = vpop.f32.mrf.mxu1  ;;  %v6607_v39 = vadd.f32 %v2594_v11, %v2586_v8  ;;  %v2740_v8 = vrot.slane %v2732_v54, 6 }
 0x7ea   :  { %v2596_v31 = vmul.f32 %v6585_v58, %v6345_v23 }
 0x7eb   :  { %2622 = vst [vmem:[#allocation1 + $0x4] ss:$9 sm:$0xff] %v6607_v39  ;;  %v2718_v14 = vpack.c.bf16 %v6607_v39, %v6607_v39 }
 0x7ed   :  { %v2734_v10 = vunpack.c.l.b16 %v2718_v14 }
 0x7ee   :  { %v2573_v17 = vpop.permute.xlu2 %2572  ;;  %v2559_v57 = vpop.permute.xlu0 %2558 }
 0x7ef   :  { %v2589_v0 = vmul.f32 %v2573_v17, %v2549_v32  ;;  %v2582_v42 = vmul.f32 %v2559_v57, %v2542_v62 }
 0x7f1   :  { %v6614_v37 = vadd.f32 %v2597_v45, %v2589_v0  ;;  %v6616_v49 = vadd.f32 %v2590_v2, %v2582_v42  ;;  %v2744_v2 = vrot.slane %v2734_v10, 4 }
 0x7f3   :  { %2628 = vst [vmem:[#allocation1 + $0x7] ss:$9 sm:$0xff] %v6614_v37  ;;  %v2714_v29 = vpack.c.bf16 %v6616_v49, %v6616_v49  ;;  %v2721_v62 = vpack.c.bf16 %v6614_v37, %v6614_v37 }
 0x7f4   :  { %2614 = vst [vmem:[#allocation1] ss:$9 sm:$0xff] %v6616_v49 }
 0x7f5   :  { %v2730_v51 = vunpack.c.l.b16 %v2714_v29 }
 0x7f9   :  { %v2561_v33 = vpop.permute.xlu1 %2560 }
 0x7fa   :  { %v2583_v28 = vmul.f32 %v2561_v33, %v2543_v15  ;;  %v2569_v61 = vpop.permute.xlu0 %2568  ;;  %v2737_v15 = vunpack.c.l.b16 %v2721_v62 }
 0x7fb   :  { %v2587_v47 = vmul.f32 %v2569_v61, %v2547_v44 }
 0x7fc   :  { %v6626_v9 = vadd.f32 %v2591_v26, %v2583_v28  ;;  %v2750_v26 = vrot.slane %v2737_v15, 1  ;;  %v7882_v15 = vld [vmem:[#allocation20_spill] sm:$0xff] }
 0x7fd   :  { %v6628_v7 = vadd.f32 %v2595_v34, %v2587_v47 }
 0x7fe   :  { %2616 = vst [vmem:[#allocation1 + $0x1] ss:$9 sm:$0xff] %v6626_v9  ;;  %v2715_v6 = vpack.c.bf16 %v6626_v9, %v6626_v9 }
 0x7ff   :  { %2624 = vst [vmem:[#allocation1 + $0x5] ss:$9 sm:$0xff] %v6628_v7  ;;  %v2719_v60 = vpack.c.bf16 %v6628_v7, %v6628_v7 }
 0x800   :  { %v2731_v43 = vunpack.c.l.b16 %v2715_v6  ;;  %v2180_v6 = vadd.f32 %v6362_v53, %v6594_v56 }
 0x801   :  { %v2565_v13 = vpop.permute.xlu1 %2564  ;;  %v2735_v45 = vunpack.c.l.b16 %v2719_v60 }
 0x802   :  { %v2585_v35 = vmul.f32 %v2565_v13, %v2545_v36  ;;  %v2738_v20 = vrot.slane %v2731_v43, 7  ;;  %v4310_v13 = vmul.f32 -1.442695, %v2180_v6 }
 0x803   :  { %v2746_v58 = vrot.slane %v2735_v45, 3  ;;  %v7878_v45 = vld [vmem:[#allocation16_spill] sm:$0xff] }
 0x804   :  { %v6637_v30 = vadd.f32 %v2593_v50, %v2585_v35  ;;  %v2739_v52 = vsel %vm7863_vm14, %v2738_v20, %v2730_v51  ;;  %4651 = vpow2.f32 %v4310_v13 }
 0x805   :  { %v2741_v17 = vsel %vm7864_vm7, %v2740_v8, %v2739_v52  ;;  %v7874_v8 = vld [vmem:[#allocation14_spill] sm:$0xff] }
 0x806   :  { %2620 = vst [vmem:[#allocation1 + $0x3] ss:$9 sm:$0xff] %v6637_v30  ;;  %v2717_v38 = vpack.c.bf16 %v6637_v30, %v6637_v30 }
 0x808   :  { %v2733_v63 = vunpack.c.l.b16 %v2717_v38 }
 0x80a   :  { %v2742_v46 = vrot.slane %v2733_v63, 5  ;;  %v4652_v50 = vpop.eup %4651 }
 0x80b   :  { %v2184_v35 = vadd.f32 1.0, %v4652_v50 }
 0x80c   :  { %v2743_v0 = vsel %vm7865_vm8, %v2742_v46, %v2741_v17 }
 0x80d   :  { %v2571_v11 = vpop.permute.xlu1 %2570  ;;  %v2745_v23 = vsel %vm7866_vm2, %v2744_v2, %v2743_v0  ;;  %4653 = vrcp.f32 %v2184_v35  ;;  %v2196_v63 = vand.u32 2147483648, %v2184_v35  ;;  %vm2190_vm12 = vweird.f32 %v2184_v35  ;;  %v7879_v0 = vld [vmem:[#allocation17_spill] sm:$0xff]  ;;  %v7880_v2 = vld [vmem:[#allocation18_spill] sm:$0xff] }
 0x80e   :  { %v2588_v32 = vmul.f32 %v2571_v11, %v2548_v25  ;;  %v2747_v28 = vsel %vm7867_vm11, %v2746_v58, %v2745_v23  ;;  %v2194_v54 = vand.u32 2147483647, %v2184_v35  ;;  %v2200_v25 = vadd.f32 %v6378_v48, %v6596_v19  ;;  %v7872_v48 = vld [vmem:[#allocation13_spill] sm:$0xff]  ;;  %v7873_v19 = vld [vmem:[#allocation12_spill] sm:$0xff]  ;;  %v7884_v23 = vld [vmem:[#allocation22_spill] sm:$0xff] }
 0x80f   :  { %v2197_v51 = vor.u32 1.1754944e-38, %v2196_v63  ;;  %v7885_v58 = vld [vmem:[#allocation23_spill] sm:$0xff] }
 0x810   :  { %v6657_v57 = vadd.f32 %v2596_v31, %v2588_v32  ;;  %vm2195_vm4 = vcmp.eq.f32.partialorder %v2194_v54, 8.507059e+37  ;;  %v7875_v32 = vld [vmem:[#allocation32_spill] sm:$0xff] }
 0x811   :  { %v6720_v54 = vld [vmem:[#allocation2 + $0x45] ss:$8 sm:$0x3] }
 0x812   :  { %2626 = vst [vmem:[#allocation1 + $0x6] ss:$9 sm:$0xff] %v6657_v57  ;;  %v2720_v42 = vpack.c.bf16 %v6657_v57, %v6657_v57 }
 0x813   :  { %v4654_v43 = vpop.eup %4653 }
 0x814   :  { %v2736_v33 = vunpack.c.l.b16 %v2720_v42  ;;  %v2186_v18 = vmul.f32 %v4654_v43, %v2184_v35  ;;  %vm2191_vm6 = vweird.f32 %v4654_v43  ;;  %v7881_v42 = vld [vmem:[#allocation19_spill] sm:$0xff]  ;;  %v6711_v35 = vld [vmem:[#allocation2 + $0x35] ss:$8 sm:$0x3] }
 0x815   :  { %vm2192_vm1 = vmor %vm2190_vm12, %vm2191_vm6 }
 0x816   :  { %v2748_v44 = vrot.slane %v2736_v33, 2  ;;  %v2187_v38 = vsub.f32 1.0, %v2186_v18  ;;  %v7883_v33 = vld [vmem:[#allocation21_spill] sm:$0xff] }
 0x818   :  { %v2749_v61 = vsel %vm7868_vm9, %v2748_v44, %v2747_v28  ;;  %v2188_v29 = vmul.f32 %v4654_v43, %v2187_v38  ;;  %v6705_v28 = vld [vmem:[#allocation2 + $0x5] ss:$8 sm:$0x3] }
 0x819   :  { %v2751_v34 = vsel %vm7869_vm10, %v2750_v26, %v2749_v61  ;;  %v2629_v36 = vld [vmem:[#allocation1] sm:$0xff] }
 0x81a   :  { %v2752_v47 = vpack.c.b16 %v2751_v34, %v2751_v34  ;;  %v2189_v20 = vadd.f32 %v4654_v43, %v2188_v29  ;;  %v6707_v61 = vld [vmem:[#allocation2 + $0x15] ss:$8 sm:$0x3]  ;;  %v6709_v34 = vld [vmem:[#allocation2 + $0x25] ss:$8 sm:$0x3] }
 0x81b   :  { %v6716_v29 = vld [vmem:[#allocation2 + $0x55] ss:$8 sm:$0x3] }
 0x81c   :  { %2753 = vrot.lane.b32.xlu0 %v2752_v47, %s4864_s13  ;;  %v2193_v14 = vsel %vm2192_vm1, %v4654_v43, %v2189_v20 }
 0x81d   :  { %v2198_v53 = vsel %vm2195_vm4, %v2197_v51, %v2193_v14 }
 0x81e   :  { %v2209_v10 = vsub.f32 1.0, %v2198_v53  ;;  %v2215_v62 = vmul.f32 %v2198_v53, %v7875_v32 }
 0x824   :  { %2630 = vrot.lane.b32.xlu0 %v2629_v36, %s4864_s13 }
 0x856   :  { %v2204_v56 = vpop.permute.xlu1 %2203 }
 0x857   :  { %v2206_v52 = vmul.f32 %v2204_v56, %v2198_v53 }
 0x859   :  { %v2207_v60 = vadd.f32 %v2206_v52, %v2200_v25 }
 0x85b   :  { %4655 = vtanh.f32 %v2207_v60 }
 0x861   :  { %v4656_v46 = vpop.eup %4655 }
 0x862   :  { %2211 = vrot.lane.b32.xlu2 %v4656_v46, %s4864_s13 }
 0x88e   :  { %v2754_v11 = vpop.permute.xlu0 %2753 }
 0x88f   :  { %4322 = vmatmul.msk.bf16.vlgmr.msra.gmra.mxu0 %vm7870_vm3, %v2754_v11  ;;  %4323 = vmatmul.msk.bf16.vlgmr.msra.gmra.mxu1 %vm7871_vm15, %v2754_v11 }
 0x890   :  { %3724 = vmatpush.bf16.msra.mxu0 %v7835_v59  ;;  %3737 = vmatpush.bf16.msra.mxu1 %v7836_v40 }
 0x894   :  { %3725 = vmatpush.bf16.msra.mxu0 %v7837_v5  ;;  %3738 = vmatpush.bf16.msra.mxu1 %v7838_v22 }
 0x896   :  { %v2631_v40 = vpop.permute.xlu0 %2630 }
 0x898   :  { %3726 = vmatpush.bf16.msra.mxu0 %v7839_v16  ;;  %3739 = vmatpush.bf16.msra.mxu1 %v7872_v48  ;;  %v7877_v16 = vld [vmem:[#allocation15_spill] sm:$0xff] }
 0x89c   :  { %3727 = vmatpush.bf16.msra.mxu0 %v7873_v19  ;;  %3740 = vmatpush.bf16.msra.mxu1 %v7874_v8  ;;  %v6723_v8 = vld [vmem:[#allocation2 + $0x65] ss:$8 sm:$0x3] }
 0x8bc   :  { %v2212_v31 = vpop.permute.xlu2 %2211 }
 0x8bd   :  { %v2214_v17 = vmul.f32 %v2212_v31, %v2209_v10  ;;  %v6726_v31 = vld [vmem:[#allocation2 + $0x75] ss:$8 sm:$0x3] }
 0x8bf   :  { %v6685_v59 = vadd.f32 %v2215_v62, %v2214_v17  ;;  %v7886_v17 = vld [vmem:[#allocation33_spill] sm:$0xff] }
 0x8c1   :  { %v2633_v5 = vsel %vm7876_vm5, %v2631_v40, %v6685_v59 }
 0x8c2   :  { %v2634_v22 = vpack.c.bf16 %v2633_v5, %v2633_v5 }
 0x8c4   :  { %2643 = vmatmul.bf16.vlgmr.msrb.gmra.mxu2 %v2634_v22  ;;  %2656 = vmatmul.bf16.vlgmr.msrb.gmra.mxu3 %v2634_v22 }
 0x8c5   :  { %3597 = vmatpush.bf16.msrb.mxu2 %v7877_v16  ;;  %3610 = vmatpush.bf16.msrb.mxu3 %v7878_v45 }
 0x8c9   :  { %3598 = vmatpush.bf16.msrb.mxu2 %v7879_v0  ;;  %3611 = vmatpush.bf16.msrb.mxu3 %v7880_v2 }
 0x8cd   :  { %3599 = vmatpush.bf16.msrb.mxu2 %v7881_v42  ;;  %3612 = vmatpush.bf16.msrb.mxu3 %v7882_v15 }
 0x8d1   :  { %3600 = vmatpush.bf16.msrb.mxu2 %v7883_v33  ;;  %3613 = vmatpush.bf16.msrb.mxu3 %v7884_v23 }
 0x8d5   :  { %3601 = vmatpush.bf16.msrb.mxu2 %v7885_v58  ;;  %3614 = vmatpush.bf16.msrb.mxu3 %v7774_v41 }
 0x8d9   :  { %3602 = vmatpush.bf16.msrb.mxu2 %v7775_v21  ;;  %3615 = vmatpush.bf16.msrb.mxu3 %v7776_v4 }
 0x8dd   :  { %3603 = vmatpush.bf16.msrb.mxu2 %v7777_v3  ;;  %3616 = vmatpush.bf16.msrb.mxu3 %v7778_v55 }
 0x8e1   :  { %3604 = vmatpush.bf16.msrb.mxu2 %v7815_v1  ;;  %3617 = vmatpush.bf16.msrb.mxu3 %v7816_v24 }
 0x90c   :  { %v2767_v44 = vpop.f32.mrf.mxu0  ;;  %v2780_v26 = vpop.f32.mrf.mxu1 }
 0x90d   :  { %v2785_v47 = vrot.slane %v2767_v44, 1  ;;  %v2786_v36 = vrot.slane %v2767_v44, 2  ;;  %v2787_v6 = vrot.slane %v2767_v44, 3  ;;  %v2788_v13 = vrot.slane %v2767_v44, 4 }
 0x90e   :  { %v2789_v50 = vrot.slane %v2767_v44, 5  ;;  %v2799_v43 = vadd.f32 %v2767_v44, %v6705_v28  ;;  %v2790_v25 = vrot.slane %v2767_v44, 6  ;;  %v2791_v60 = vrot.slane %v2767_v44, 7 }
 0x90f   :  { %v2800_v18 = vadd.f32 %v2785_v47, %v6707_v61  ;;  %v2801_v38 = vadd.f32 %v2786_v36, %v6709_v34  ;;  %v2802_v20 = vadd.f32 %v2787_v6, %v6711_v35  ;;  %v2803_v56 = vadd.f32 %v2788_v13, %v6720_v54 }
 0x910   :  { %v2804_v63 = vadd.f32 %v2789_v50, %v6716_v29  ;;  %v4324_v14 = vmul.f32 -1.442695, %v2799_v43  ;;  %v2805_v10 = vadd.f32 %v2790_v25, %v6723_v8  ;;  %v2806_v32 = vadd.f32 %v2791_v60, %v6726_v31 }
 0x911   :  { %v4325_v51 = vmul.f32 -1.442695, %v2800_v18  ;;  %v4326_v53 = vmul.f32 -1.442695, %v2801_v38  ;;  %v4327_v46 = vmul.f32 -1.442695, %v2802_v20  ;;  %v6730_v40 = vadd.f32 %v7886_v17, %v2780_v26 }
 0x912   :  { %v4329_v52 = vmul.f32 -1.442695, %v2804_v63  ;;  %4657 = vpow2.f32 %v4324_v14  ;;  %v4328_v19 = vmul.f32 -1.442695, %v2803_v56  ;;  %v4330_v44 = vmul.f32 -1.442695, %v2805_v10 }
 0x913   :  { %4659 = vpow2.f32 %v4325_v51  ;;  %v4331_v6 = vmul.f32 -1.442695, %v2806_v32 }
 0x914   :  { %v2769_v11 = vpop.f32.mrf.mxu0  ;;  %v2782_v48 = vpop.f32.mrf.mxu1  ;;  %4661 = vpow2.f32 %v4326_v53 }
 0x915   :  { %4663 = vpow2.f32 %v4329_v52 }
 0x916   :  { %4665 = vpow2.f32 %v4327_v46 }
 0x917   :  { %4667 = vpow2.f32 %v4328_v19 }
 0x918   :  { %v4658_v62 = vpop.eup %4657 }
 0x919   :  { %v4660_v5 = vpop.eup %4659  ;;  %v6732_v22 = vadd.f32 1.0, %v4658_v62 }
 0x91a   :  { %v4662_v47 = vpop.eup %4661  ;;  %v6734_v36 = vadd.f32 1.0, %v4660_v5 }
 0x91b   :  { %v4664_v13 = vpop.eup %4663  ;;  %4669 = vrcp.f32 %v6732_v22  ;;  %v6743_v14 = vadd.f32 1.0, %v4662_v47  ;;  %v2848_v56 = vand.u32 2147483647, %v6732_v22  ;;  %v2850_v25 = vand.u32 2147483648, %v6732_v22 }
 0x91c   :  { %v4666_v18 = vpop.eup %4665  ;;  %4671 = vrcp.f32 %v6734_v36  ;;  %v6746_v53 = vadd.f32 1.0, %v4664_v13  ;;  %v2863_v60 = vand.u32 2147483647, %v6734_v36  ;;  %v2865_v46 = vand.u32 2147483648, %v6734_v36 }
 0x91d   :  { %v4668_v63 = vpop.eup %4667  ;;  %4673 = vpow2.f32 %v4330_v44  ;;  %v6750_v52 = vadd.f32 1.0, %v4666_v18  ;;  %v2880_v48 = vand.u32 2147483648, %v6743_v14  ;;  %vm2844_vm0 = vweird.f32 %v6732_v22 }
 0x91e   :  { %4675 = vpow2.f32 %v4331_v6  ;;  %v6759_v10 = vadd.f32 1.0, %v4668_v63  ;;  %vm2859_vm13 = vweird.f32 %v6734_v36  ;;  %v2925_v62 = vand.u32 2147483648, %v6746_v53 }
 0x91f   :  { %4677 = vrcp.f32 %v6743_v14  ;;  %vm6766_vm14 = vcmp.eq.f32.partialorder %v2848_v56, 8.507059e+37  ;;  %v2851_v47 = vor.u32 1.1754944e-38, %v2850_v25  ;;  %v2878_v6 = vand.u32 2147483647, %v6743_v14 }
 0x920   :  { %4679 = vrcp.f32 %v6746_v53  ;;  %vm6772_vm7 = vcmp.eq.f32.partialorder %v2863_v60, 8.507059e+37  ;;  %v2866_v20 = vor.u32 1.1754944e-38, %v2865_v46  ;;  %v2923_v19 = vand.u32 2147483647, %v6746_v53 }
 0x921   :  { %v4670_v32 = vpop.eup %4669  ;;  %4681 = vrcp.f32 %v6750_v52  ;;  %v2895_v38 = vand.u32 2147483648, %v6750_v52  ;;  %vm2874_vm8 = vweird.f32 %v6743_v14  ;;  %v2881_v51 = vor.u32 1.1754944e-38, %v2880_v48 }
 0x922   :  { %v4672_v17 = vpop.eup %4671  ;;  %v2840_v5 = vmul.f32 %v4670_v32, %v6732_v22  ;;  %v2893_v25 = vand.u32 2147483647, %v6750_v52  ;;  %4683 = vrcp.f32 %v6759_v10  ;;  %vm2845_vm2 = vweird.f32 %v4670_v32 }
 0x923   :  { %v4674_v13 = vpop.eup %4673  ;;  %v2855_v18 = vmul.f32 %v4672_v17, %v6734_v36  ;;  %vm2860_vm11 = vweird.f32 %v4672_v17  ;;  %v2926_v46 = vor.u32 1.1754944e-38, %v2925_v62  ;;  %vm6783_vm10 = vcmp.eq.f32.partialorder %v2878_v6, 8.507059e+37  ;;  %vm2846_vm15 = vmor %vm2844_vm0, %vm2845_vm2 }
 0x924   :  { %v4676_v11 = vpop.eup %4675  ;;  %v2841_v56 = vsub.f32 1.0, %v2840_v5  ;;  %v2896_v48 = vor.u32 1.1754944e-38, %v2895_v38  ;;  %v2908_v1 = vand.u32 2147483647, %v6759_v10  ;;  %vm6790_vm1 = vcmp.eq.f32.partialorder %v2923_v19, 8.507059e+37  ;;  %vm2861_vm9 = vmor %vm2859_vm13, %vm2860_vm11 }
 0x925   :  { %v4678_v43 = vpop.eup %4677  ;;  %v2856_v60 = vsub.f32 1.0, %v2855_v18  ;;  %vm6796_vm3 = vcmp.eq.f32.partialorder %v2893_v25, 8.507059e+37  ;;  %vm2904_vm6 = vweird.f32 %v6759_v10  ;;  %v6804_v41 = vadd.f32 1.0, %v4674_v13 }
 0x926   :  { %v4680_v50 = vpop.eup %4679  ;;  %v2842_v26 = vmul.f32 %v4670_v32, %v2841_v56  ;;  %v2870_v24 = vmul.f32 %v4678_v43, %v6743_v14  ;;  %vm2875_vm12 = vweird.f32 %v4678_v43  ;;  %v2910_v56 = vand.u32 2147483648, %v6759_v10 }
 0x927   :  { %v4682_v55 = vpop.eup %4681  ;;  %v2857_v3 = vmul.f32 %v4672_v17, %v2856_v60  ;;  %v2915_v18 = vmul.f32 %v4680_v50, %v6746_v53  ;;  %vm2920_vm4 = vweird.f32 %v4680_v50  ;;  %v6809_v23 = vadd.f32 1.0, %v4676_v11  ;;  %vm2876_vm0 = vmor %vm2874_vm8, %vm2875_vm12 }
 0x928   :  { %v2843_v6 = vadd.f32 %v4670_v32, %v2842_v26  ;;  %v2871_v4 = vsub.f32 1.0, %v2870_v24  ;;  %v2885_v21 = vmul.f32 %v4682_v55, %v6750_v52  ;;  %vm2890_vm5 = vweird.f32 %v4682_v55  ;;  %v4684_v26 = vpop.eup %4683 }
 0x929   :  { %v2858_v60 = vadd.f32 %v4672_v17, %v2857_v3  ;;  %v2916_v19 = vsub.f32 1.0, %v2915_v18  ;;  %v2900_v33 = vmul.f32 %v4684_v26, %v6759_v10  ;;  %vm2905_vm13 = vweird.f32 %v4684_v26 }
 0x92a   :  { %v2847_v24 = vsel %vm2846_vm15, %v4670_v32, %v2843_v6  ;;  %v2872_v25 = vmul.f32 %v4678_v43, %v2871_v4  ;;  %v2886_v58 = vsub.f32 1.0, %v2885_v21  ;;  %v7897_v21 = vrot.slane %v6730_v40, 1  ;;  %vm2906_vm11 = vmor %vm2904_vm6, %vm2905_vm13 }
 0x92b   :  { %v6813_v22 = vsel %vm6766_vm14, %v2851_v47, %v2847_v24  ;;  %v2862_v3 = vsel %vm2861_vm9, %v4672_v17, %v2858_v60  ;;  %v2917_v18 = vmul.f32 %v4680_v50, %v2916_v19  ;;  %v2901_v44 = vsub.f32 1.0, %v2900_v33 }
 0x92c   :  { %v2975_v13 = vmul.f32 %v6730_v40, %v6813_v22  ;;  %v6820_v32 = vsel %vm6772_vm7, %v2866_v20, %v2862_v3  ;;  %v2873_v36 = vadd.f32 %v4678_v43, %v2872_v25  ;;  %v2887_v4 = vmul.f32 %v4682_v55, %v2886_v58 }
 0x92d   :  { %v2976_v11 = vmul.f32 %v7897_v21, %v6820_v32  ;;  %v2918_v17 = vadd.f32 %v4680_v50, %v2917_v18  ;;  %v7898_v47 = vrot.slane %v6705_v28, 1  ;;  %vm7899_vm14 = vweird.f32 %v6746_v53 }
 0x92e   :  { %v2877_v60 = vsel %vm2876_vm0, %v4678_v43, %v2873_v36  ;;  %vm2921_vm7 = vmor %vm7899_vm14, %vm2920_vm4  ;;  %v2888_v58 = vadd.f32 %v4682_v55, %v2887_v4  ;;  %4685 = vrcp.f32 %v6804_v41  ;;  %v7900_v20 = vrot.slane %v6707_v61, 1 }
 0x92f   :  { %v3007_v6 = vadd.f32 %v7898_v47, %v2975_v13  ;;  %v6838_v14 = vsel %vm6783_vm10, %v2881_v51, %v2877_v60  ;;  %v2922_v33 = vsel %vm2921_vm7, %v4680_v50, %v2918_v17  ;;  %vm7901_vm8 = vweird.f32 %v6750_v52 }
 0x930   :  { %v3008_v63 = vadd.f32 %v7900_v20, %v2976_v11  ;;  %vm2891_vm2 = vmor %vm7901_vm8, %vm2890_vm5  ;;  %v2902_v28 = vmul.f32 %v4684_v26, %v2901_v44  ;;  %v7902_v43 = vrot.slane %v6730_v40, 2  ;;  %v6848_v19 = vsel %vm6790_vm1, %v2926_v46, %v2922_v33 }
 0x931   :  { %4687 = vtanh.f32 %v3007_v6  ;;  %v2892_v61 = vsel %vm2891_vm2, %v4682_v55, %v2888_v58  ;;  %v7903_v51 = vrot.slane %v6730_v40, 5  ;;  %v7904_v24 = vrot.slane %v6709_v34, 1 }
 0x932   :  { %v2977_v53 = vmul.f32 %v7902_v43, %v6838_v14  ;;  %4689 = vtanh.f32 %v3008_v63  ;;  %v6855_v52 = vsel %vm6796_vm3, %v2896_v48, %v2892_v61  ;;  %v2903_v5 = vadd.f32 %v4684_v26, %v2902_v28 }
 0x933   :  { %v2980_v50 = vmul.f32 %v7903_v51, %v6848_v19  ;;  %v7905_v3 = vrot.slane %v6730_v40, 3  ;;  %v2994_v46 = vrot.slane %v6711_v35, 1  ;;  %v2911_v55 = vor.u32 1.1754944e-38, %v2910_v56 }
 0x934   :  { %v3009_v25 = vadd.f32 %v7904_v24, %v2977_v53  ;;  %v2907_v18 = vsel %vm2906_vm11, %v4684_v26, %v2903_v5  ;;  %vm2909_vm9 = vcmp.eq.f32.partialorder %v2908_v1, 8.507059e+37  ;;  %v2964_v48 = vrot.slane %v6730_v40, 4  ;;  %v4686_v38 = vpop.eup %4685 }
 0x935   :  { %v2978_v62 = vmul.f32 %v7905_v3, %v6855_v52  ;;  %4691 = vrcp.f32 %v6809_v23  ;;  %v7906_v34 = vrot.slane %v6716_v29, 1  ;;  %v6870_v36 = vsel %vm2909_vm9, %v2911_v55, %v2907_v18 }
 0x936   :  { %4693 = vtanh.f32 %v3009_v25  ;;  %v2979_v35 = vmul.f32 %v2964_v48, %v6870_v36  ;;  %v2930_v10 = vmul.f32 %v4686_v38, %v6804_v41  ;;  %v2995_v56 = vrot.slane %v6720_v54, 1 }
 0x937   :  { %v3012_v13 = vadd.f32 %v7906_v34, %v2980_v50  ;;  %v3010_v4 = vadd.f32 %v2994_v46, %v2978_v62  ;;  %v4688_v21 = vpop.eup %4687  ;;  %v2940_v29 = vand.u32 2147483648, %v6804_v41  ;;  %vm2935_vm10 = vweird.f32 %v4686_v38 }
 0x938   :  { %v4690_v1 = vpop.eup %4689  ;;  %3039 = vrot.lane.b32.xlu0 %v4688_v21, %s4864_s13  ;;  %v2931_v26 = vsub.f32 1.0, %v2930_v10  ;;  %v3011_v11 = vadd.f32 %v2995_v56, %v2979_v35  ;;  %v2938_v47 = vand.u32 2147483647, %v6804_v41  ;;  %vm2934_vm6 = vweird.f32 %v6804_v41 }
 0x939   :  { %3041 = vrot.lane.b32.xlu1 %v4690_v1, %s4864_s13  ;;  %4695 = vtanh.f32 %v3012_v13  ;;  %vm2936_vm12 = vmor %vm2934_vm6, %vm2935_vm10  ;;  %v2941_v58 = vor.u32 1.1754944e-38, %v2940_v29  ;;  %v2966_v33 = vrot.slane %v6730_v40, 6  ;;  %v2955_v28 = vand.u32 2147483648, %v6809_v23 }
 0x93a   :  { %4697 = vtanh.f32 %v3010_v4  ;;  %v2932_v44 = vmul.f32 %v4686_v38, %v2931_v26  ;;  %vm2939_vm1 = vcmp.eq.f32.partialorder %v2938_v47, 8.507059e+37  ;;  %v2953_v51 = vand.u32 2147483647, %v6809_v23 }
 0x93b   :  { %v4692_v17 = vpop.eup %4691  ;;  %4699 = vtanh.f32 %v3011_v11  ;;  %v2997_v5 = vrot.slane %v6723_v8, 1  ;;  %vm2949_vm3 = vweird.f32 %v6809_v23  ;;  %v2956_v3 = vor.u32 1.1754944e-38, %v2955_v28 }
 0x93c   :  { %v4694_v6 = vpop.eup %4693  ;;  %v2945_v60 = vmul.f32 %v4692_v17, %v6809_v23  ;;  %v2933_v54 = vadd.f32 %v4686_v38, %v2932_v44  ;;  %vm2950_vm4 = vweird.f32 %v4692_v17  ;;  %vm2954_vm5 = vcmp.eq.f32.partialorder %v2953_v51, 8.507059e+37 }
 0x93d   :  { %3043 = vrot.lane.b32.xlu2 %v4694_v6, %s4864_s13  ;;  %vm2951_vm15 = vmor %vm2949_vm3, %vm2950_vm4  ;;  %v2967_v55 = vrot.slane %v6730_v40, 7  ;;  %v2998_v8 = vrot.slane %v6726_v31, 1  ;;  %v6905_v31 = vld [vmem:[%s7567_s6] ss:$0 sm:$0xff]  ;;  %v3025_v56 = vsub.f32 1.0, %v6838_v14  ;;  %v3073_v26 = vmul.f32 %v6838_v14, %v6598_v12 }
 0x93e   :  { %v2946_v20 = vsub.f32 1.0, %v2945_v60  ;;  %v2937_v63 = vsel %vm2936_vm12, %v4686_v38, %v2933_v54  ;;  %v3027_v44 = vsub.f32 1.0, %v6870_v36  ;;  %v3075_v6 = vmul.f32 %v6870_v36, %v6607_v39 }
 0x93f   :  { %v4696_v43 = vpop.eup %4695  ;;  %v6884_v53 = vsel %vm2939_vm1, %v2941_v58, %v2937_v63  ;;  %v3024_v28 = vsub.f32 1.0, %v6820_v32  ;;  %v3071_v36 = vmul.f32 %v6813_v22, %v6616_v49  ;;  %v3028_v49 = vsub.f32 1.0, %v6848_v19 }
 0x940   :  { %v2947_v61 = vmul.f32 %v4692_v17, %v2946_v20  ;;  %v4698_v50 = vpop.eup %4697  ;;  %3049 = vrot.lane.b32.xlu0 %v4696_v43, %s4864_s13  ;;  %v2981_v41 = vmul.f32 %v2966_v33, %v6884_v53  ;;  %v3023_v20 = vsub.f32 1.0, %v6813_v22  ;;  %v3026_v22 = vsub.f32 1.0, %v6855_v52 }
 0x941   :  { %3045 = vrot.lane.b32.xlu1 %v4698_v50, %s4864_s13  ;;  %v4700_v62 = vpop.eup %4699  ;;  %v3072_v50 = vmul.f32 %v6820_v32, %v6626_v9  ;;  %vm7907_vm0 = vcmask 1041409   ;;  %vm7908_vm14 = vcmask 1042434   ;;  %vm7909_vm8 = vcmask 1043459  }
 0x942   :  { %v2948_v24 = vadd.f32 %v4692_v17, %v2947_v61  ;;  %v3013_v25 = vadd.f32 %v2997_v5, %v2981_v41  ;;  %vm7910_vm11 = vcmask 1044484   ;;  %vm7911_vm10 = vcmask 1045509  }
 0x943   :  { %vm7912_vm6 = vcmask 1046534   ;;  %vm7913_vm12 = vcmask 1047559   ;;  %vm7914_vm1 = vcmask 523264  }
 0x944   :  { %v2952_v46 = vsel %vm2951_vm15, %v4692_v17, %v2948_v24  ;;  %4701 = vtanh.f32 %v3013_v25  ;;  %vm7915_vm4 = vmmov %vm7914_vm1 }
 0x945   :  { %3047 = vrot.lane.b32.xlu2 %v4700_v62, %s4864_s13  ;;  %v2957_v18 = vsel %vm2954_vm5, %v2956_v3, %v2952_v46  ;;  %v3076_v62 = vmul.f32 %v6848_v19, %v6628_v7  ;;  %vm7916_vm3 = vmmov %vm7914_vm1 }
 0x946   :  { %v2982_v48 = vmul.f32 %v2967_v55, %v2957_v18  ;;  %v3030_v14 = vsub.f32 1.0, %v2957_v18  ;;  %v3078_v43 = vmul.f32 %v2957_v18, %v6614_v37  ;;  %v3074_v18 = vmul.f32 %v6855_v52, %v6637_v30 }
 0x947   :  { %v2644_v38 = vpop.f32.mrf.mxu2  ;;  %v6895_v34 = vpop.f32.mrf.mxu3 }
 0x948   :  { %v3014_v13 = vadd.f32 %v2998_v8, %v2982_v48  ;;  %v2682_v40 = vadd.f32 %v6895_v34, %v7832_v27  ;;  %v2661_v21 = vadd.f32 %v6905_v31, %v2644_v38 }
 0x94a   :  { %4703 = vtanh.f32 %v3014_v13  ;;  %v4702_v23 = vpop.eup %4701  ;;  %v4321_v29 = vmul.f32 -1.442695, %v2661_v21 }
 0x94b   :  { %3051 = vrot.lane.b32.xlu1 %v4702_v23, %s4864_s13 }
 0x94c   :  { %4705 = vpow2.f32 %v4321_v29 }
 0x94f   :  { %v2646_v4 = vpop.f32.mrf.mxu2  ;;  %v2659_v35 = vpop.f32.mrf.mxu3 }
 0x950   :  { %v4704_v10 = vpop.eup %4703 }
 0x951   :  { %3053 = vrot.lane.b32.xlu2 %v4704_v10, %s4864_s13 }
 0x952   :  { %v4706_v58 = vpop.eup %4705 }
 0x953   :  { %2684 = vrot.lane.b32.xlu1 %v2682_v40, %s4864_s13  ;;  %v6920_v12 = vadd.f32 1.0, %v4706_v58 }
 0x955   :  { %4707 = vrcp.f32 %v6920_v12  ;;  %vm2671_vm7 = vweird.f32 %v6920_v12 }
 0x95b   :  { %v4708_v3 = vpop.eup %4707 }
 0x95c   :  { %v2667_v32 = vmul.f32 %v4708_v3, %v6920_v12  ;;  %vm2672_vm13 = vweird.f32 %v4708_v3 }
 0x95d   :  { %vm2673_vm2 = vmor %vm2671_vm7, %vm2672_vm13 }
 0x95e   :  { %v2668_v4 = vsub.f32 1.0, %v2667_v32 }
 0x960   :  { %v2669_v40 = vmul.f32 %v4708_v3, %v2668_v4 }
 0x962   :  { %v2670_v58 = vadd.f32 %v4708_v3, %v2669_v40 }
 0x997   :  { %v3044_v1 = vpop.permute.xlu2 %3043 }
 0x998   :  { %v3065_v11 = vmul.f32 %v3044_v1, %v3025_v56  ;;  %v3029_v56 = vsub.f32 1.0, %v6884_v53  ;;  %v3077_v1 = vmul.f32 %v6884_v53, %v6657_v57  ;;  %v2675_v53 = vand.u32 2147483647, %v6920_v12 }
 0x99a   :  { %v6911_v17 = vadd.f32 %v3073_v26, %v3065_v11  ;;  %vm2676_vm9 = vcmp.eq.f32.partialorder %v2675_v53, 8.507059e+37 }
 0x99c   :  { %3099 = vst [vmem:[#allocation1 + $0x2] ss:$9 sm:$0xff] %v6911_v17  ;;  %v3197_v13 = vpack.c.bf16 %v6911_v17, %v6911_v17 }
 0x99e   :  { %v3213_v19 = vunpack.c.l.b16 %v3197_v13 }
 0x99f   :  { %v3048_v47 = vpop.permute.xlu2 %3047 }
 0x9a0   :  { %v3067_v60 = vmul.f32 %v3048_v47, %v3027_v44  ;;  %v3221_v47 = vrot.slane %v3213_v19, 6 }
 0x9a2   :  { %v6917_v54 = vadd.f32 %v3075_v6, %v3067_v60 }
 0x9a4   :  { %3103 = vst [vmem:[#allocation1 + $0x4] ss:$9 sm:$0xff] %v6917_v54  ;;  %v3199_v52 = vpack.c.bf16 %v6917_v54, %v6917_v54 }
 0x9a6   :  { %v3215_v6 = vunpack.c.l.b16 %v3199_v52 }
 0x9aa   :  { %v3040_v33 = vpop.permute.xlu0 %3039 }
 0x9ab   :  { %v3054_v63 = vpop.permute.xlu2 %3053  ;;  %v3063_v61 = vmul.f32 %v3040_v33, %v3023_v20  ;;  %v3042_v51 = vpop.permute.xlu1 %3041  ;;  %v2677_v20 = vand.u32 2147483648, %v6920_v12 }
 0x9ac   :  { %v3070_v39 = vmul.f32 %v3054_v63, %v3030_v14  ;;  %v3064_v41 = vmul.f32 %v3042_v51, %v3024_v28 }
 0x9ad   :  { %v6932_v24 = vadd.f32 %v3071_v36, %v3063_v61  ;;  %v2674_v36 = vsel %vm2673_vm2, %v4708_v3, %v2670_v58  ;;  %v2678_v51 = vor.u32 1.1754944e-38, %v2677_v20 }
 0x9ae   :  { %v6930_v5 = vadd.f32 %v3078_v43, %v3070_v39  ;;  %v6934_v25 = vadd.f32 %v3072_v50, %v3064_v41  ;;  %v3225_v43 = vrot.slane %v3215_v6, 4 }
 0x9af   :  { %3095 = vst [vmem:[#allocation1] ss:$9 sm:$0xff] %v6932_v24  ;;  %v3195_v35 = vpack.c.bf16 %v6932_v24, %v6932_v24 }
 0x9b0   :  { %3109 = vst [vmem:[#allocation1 + $0x7] ss:$9 sm:$0xff] %v6930_v5  ;;  %v3196_v37 = vpack.c.bf16 %v6934_v25, %v6934_v25  ;;  %v3202_v14 = vpack.c.bf16 %v6930_v5, %v6930_v5 }
 0x9b1   :  { %3097 = vst [vmem:[#allocation1 + $0x1] ss:$9 sm:$0xff] %v6934_v25  ;;  %v3211_v21 = vunpack.c.l.b16 %v3195_v35 }
 0x9b2   :  { %v3050_v9 = vpop.permute.xlu0 %3049  ;;  %v3212_v8 = vunpack.c.l.b16 %v3196_v37  ;;  %v3218_v61 = vunpack.c.l.b16 %v3202_v14  ;;  %v7021_v14 = vld [vmem:[#allocation2 + $0x16] ss:$8 sm:$0x3] }
 0x9b3   :  { %v3068_v46 = vmul.f32 %v3050_v9, %v3028_v49  ;;  %v3046_v55 = vpop.permute.xlu1 %3045  ;;  %v2679_v49 = vsel %vm2676_vm9, %v2678_v51, %v2674_v36  ;;  %v6984_v9 = vld [vmem:[%s7568_s7] ss:$0 sm:$0xff] }
 0x9b4   :  { %v3066_v48 = vmul.f32 %v3046_v55, %v3026_v22  ;;  %v3219_v30 = vrot.slane %v3212_v8, 7  ;;  %v2681_v22 = vadd.f32 %v6984_v9, %v6895_v34  ;;  %v3231_v3 = vrot.slane %v3218_v61, 1 }
 0x9b5   :  { %v6948_v38 = vadd.f32 %v3076_v62, %v3068_v46  ;;  %v2696_v19 = vmul.f32 %v2679_v49, %v6685_v59  ;;  %v7917_v59 = vld [vmem:[#allocation21_spill] sm:$0xff] }
 0x9b6   :  { %v6952_v23 = vadd.f32 %v3074_v18, %v3066_v48  ;;  %v3220_v26 = vsel %vm7907_vm0, %v3219_v30, %v3211_v21 }
 0x9b7   :  { %3105 = vst [vmem:[#allocation1 + $0x5] ss:$9 sm:$0xff] %v6948_v38  ;;  %v3200_v11 = vpack.c.bf16 %v6948_v38, %v6948_v38  ;;  %v3222_v63 = vsel %vm7908_vm14, %v3221_v47, %v3220_v26  ;;  %v7920_v26 = vld [vmem:[#allocation24_spill] sm:$0xff] }
 0x9b8   :  { %3101 = vst [vmem:[#allocation1 + $0x3] ss:$9 sm:$0xff] %v6952_v23  ;;  %v3198_v7 = vpack.c.bf16 %v6952_v23, %v6952_v23  ;;  %v7019_v47 = vld [vmem:[#allocation2 + $0x26] ss:$8 sm:$0x3] }
 0x9b9   :  { %v3216_v33 = vunpack.c.l.b16 %v3200_v11  ;;  %v7921_v11 = vld [vmem:[#allocation25_spill] sm:$0xff] }
 0x9ba   :  { %v3214_v10 = vunpack.c.l.b16 %v3198_v7  ;;  %v2690_v7 = vsub.f32 1.0, %v2679_v49 }
 0x9bb   :  { %v3227_v37 = vrot.slane %v3216_v33, 3 }
 0x9bc   :  { %v3223_v29 = vrot.slane %v3214_v10, 5 }
 0x9bd   :  { %v3052_v44 = vpop.permute.xlu1 %3051 }
 0x9be   :  { %v3069_v60 = vmul.f32 %v3052_v44, %v3029_v56  ;;  %v3224_v28 = vsel %vm7909_vm8, %v3223_v29, %v3222_v63  ;;  %v7918_v56 = vld [vmem:[#allocation22_spill] sm:$0xff]  ;;  %v7017_v44 = vld [vmem:[#allocation2 + $0x6] ss:$8 sm:$0x3] }
 0x9bf   :  { %v3226_v41 = vsel %vm7910_vm11, %v3225_v43, %v3224_v28  ;;  %v7023_v63 = vld [vmem:[#allocation2 + $0x56] ss:$8 sm:$0x3] }
 0x9c0   :  { %v6972_v57 = vadd.f32 %v3077_v1, %v3069_v60  ;;  %v3228_v46 = vsel %vm7911_vm10, %v3227_v37, %v3226_v41  ;;  %v7919_v1 = vld [vmem:[#allocation23_spill] sm:$0xff] }
 0x9c2   :  { %3107 = vst [vmem:[#allocation1 + $0x6] ss:$9 sm:$0xff] %v6972_v57  ;;  %v3201_v39 = vpack.c.bf16 %v6972_v57, %v6972_v57 }
 0x9c4   :  { %v3217_v50 = vunpack.c.l.b16 %v3201_v39  ;;  %v7028_v39 = vld [vmem:[#allocation2 + $0x46] ss:$8 sm:$0x3] }
 0x9c5   :  { %v2685_v12 = vpop.permute.xlu1 %2684 }
 0x9c6   :  { %v3229_v32 = vrot.slane %v3217_v50, 2  ;;  %v2687_v62 = vmul.f32 %v2685_v12, %v2679_v49 }
 0x9c8   :  { %v3230_v55 = vsel %vm7912_vm6, %v3229_v32, %v3228_v46  ;;  %v2688_v18 = vadd.f32 %v2687_v62, %v2681_v22  ;;  %v7036_v22 = vld [vmem:[#allocation2 + $0x36] ss:$8 sm:$0x3] }
 0x9c9   :  { %v3232_v48 = vsel %vm7913_vm12, %v3231_v3, %v3230_v55  ;;  %v3110_v4 = vld [vmem:[#allocation1] sm:$0xff] }
 0x9ca   :  { %v3233_v8 = vpack.c.b16 %v3232_v48, %v3232_v48  ;;  %4709 = vtanh.f32 %v2688_v18  ;;  %v7039_v48 = vld [vmem:[#allocation2 + $0x76] ss:$8 sm:$0x3] }
 0x9cc   :  { %3234 = vrot.lane.b32.xlu0 %v3233_v8, %s4864_s13 }
 0x9d0   :  { %v4710_v13 = vpop.eup %4709 }
 0x9d1   :  { %2692 = vrot.lane.b32.xlu2 %v4710_v13, %s4864_s13  ;;  %v7042_v13 = vld [vmem:[#allocation2 + $0x66] ss:$8 sm:$0x3] }
 0x9d4   :  { %3111 = vrot.lane.b32.xlu0 %v3110_v4, %s4864_s13 }
 0xa2b   :  { %v2693_v34 = vpop.permute.xlu2 %2692 }
 0xa2c   :  { %v2695_v30 = vmul.f32 %v2693_v34, %v2690_v7 }
 0xa2e   :  { %v6997_v52 = vadd.f32 %v2696_v19, %v2695_v30 }
 0xa3e   :  { %v3235_v35 = vpop.permute.xlu0 %3234 }
 0xa3f   :  { %4333 = vmatmul.msk.bf16.vlgmr.msra.gmra.mxu2 %vm7914_vm1, %v3235_v35  ;;  %4334 = vmatmul.msk.bf16.vlgmr.msra.gmra.mxu3 %vm7915_vm4, %v3235_v35 }
 0xa46   :  { %v3112_v10 = vpop.permute.xlu0 %3111 }
 0xa47   :  { %v3114_v40 = vsel %vm7916_vm3, %v3112_v10, %v6997_v52  ;;  %v7048_v10 = vld [vmem:[%s7565_s4] ss:$0 sm:$0xff] }
 0xa48   :  { %v3115_v21 = vpack.c.bf16 %v3114_v40, %v3114_v40 }
 0xa4a   :  { %3124 = vmatmul.bf16.vlgmr.msrb.gmra.mxu0 %v3115_v21  ;;  %3137 = vmatmul.bf16.vlgmr.msrb.gmra.mxu1 %v3115_v21 }
 0xa4b   :  { %4078 = vmatpush.bf16.msrb.mxu0 %v7877_v16  ;;  %4091 = vmatpush.bf16.msrb.mxu1 %v7878_v45  ;;  %v7922_v16 = vld [vmem:[#allocation26_spill] sm:$0xff]  ;;  %v7923_v45 = vld [vmem:[#allocation27_spill] sm:$0xff] }
 0xa4f   :  { %4079 = vmatpush.bf16.msrb.mxu0 %v7879_v0  ;;  %4092 = vmatpush.bf16.msrb.mxu1 %v7880_v2  ;;  %v7924_v0 = vld [vmem:[#allocation28_spill] sm:$0xff]  ;;  %v7925_v2 = vld [vmem:[#allocation29_spill] sm:$0xff] }
 0xa53   :  { %4080 = vmatpush.bf16.msrb.mxu0 %v7881_v42  ;;  %4093 = vmatpush.bf16.msrb.mxu1 %v7882_v15  ;;  %v7926_v42 = vld [vmem:[#allocation30_spill] sm:$0xff] }
 0xa57   :  { %4081 = vmatpush.bf16.msrb.mxu0 %v7917_v59  ;;  %4094 = vmatpush.bf16.msrb.mxu1 %v7918_v56 }
 0xa5b   :  { %4082 = vmatpush.bf16.msrb.mxu0 %v7919_v1  ;;  %4095 = vmatpush.bf16.msrb.mxu1 %v7920_v26 }
 0xa5f   :  { %4083 = vmatpush.bf16.msrb.mxu0 %v7921_v11  ;;  %4096 = vmatpush.bf16.msrb.mxu1 %v7922_v16  ;;  %v3472_v16 = vrot.slane %v7017_v44, 1 }
 0xa63   :  { %4084 = vmatpush.bf16.msrb.mxu0 %v7923_v45  ;;  %4097 = vmatpush.bf16.msrb.mxu1 %v7924_v0  ;;  %v3474_v45 = vrot.slane %v7019_v47, 1 }
 0xa67   :  { %4085 = vmatpush.bf16.msrb.mxu0 %v7925_v2  ;;  %4098 = vmatpush.bf16.msrb.mxu1 %v7926_v42 }
 0xac2   :  { %v3248_v15 = vpop.f32.mrf.mxu2  ;;  %v3261_v29 = vpop.f32.mrf.mxu3 }
 0xac3   :  { %v3266_v6 = vrot.slane %v3248_v15, 1  ;;  %v3267_v60 = vrot.slane %v3248_v15, 2  ;;  %v3269_v58 = vrot.slane %v3248_v15, 4  ;;  %v3270_v20 = vrot.slane %v3248_v15, 5 }
 0xac4   :  { %v3268_v53 = vrot.slane %v3248_v15, 3  ;;  %v3280_v33 = vadd.f32 %v3248_v15, %v7017_v44  ;;  %v3272_v12 = vrot.slane %v3248_v15, 7  ;;  %v3271_v32 = vrot.slane %v3248_v15, 6 }
 0xac5   :  { %v3282_v28 = vadd.f32 %v3267_v60, %v7019_v47  ;;  %v3281_v43 = vadd.f32 %v3266_v6, %v7021_v14  ;;  %v3285_v36 = vadd.f32 %v3270_v20, %v7023_v63  ;;  %v3284_v61 = vadd.f32 %v3269_v58, %v7028_v39 }
 0xac6   :  { %v4335_v41 = vmul.f32 -1.442695, %v3280_v33  ;;  %v3283_v3 = vadd.f32 %v3268_v53, %v7036_v22  ;;  %v3287_v8 = vadd.f32 %v3272_v12, %v7039_v48  ;;  %v3286_v34 = vadd.f32 %v3271_v32, %v7042_v13 }
 0xac7   :  { %v7032_v51 = vpop.f32.mrf.mxu0  ;;  %v7034_v50 = vpop.f32.mrf.mxu1  ;;  %v4337_v37 = vmul.f32 -1.442695, %v3282_v28  ;;  %v4336_v49 = vmul.f32 -1.442695, %v3281_v43  ;;  %v4340_v62 = vmul.f32 -1.442695, %v3285_v36  ;;  %v7051_v40 = vadd.f32 %v7048_v10, %v3261_v29 }
 0xac8   :  { %4711 = vpow2.f32 %v4335_v41  ;;  %v4339_v18 = vmul.f32 -1.442695, %v3284_v61  ;;  %v4338_v4 = vmul.f32 -1.442695, %v3283_v3  ;;  %v4342_v59 = vmul.f32 -1.442695, %v3287_v8 }
 0xac9   :  { %4713 = vpow2.f32 %v4337_v37  ;;  %v4341_v26 = vmul.f32 -1.442695, %v3286_v34  ;;  %v3443_v42 = vrot.slane %v7051_v40, 2  ;;  %v3442_v33 = vrot.slane %v7051_v40, 1 }
 0xaca   :  { %v3250_v46 = vpop.f32.mrf.mxu2  ;;  %v3263_v55 = vpop.f32.mrf.mxu3  ;;  %4715 = vpow2.f32 %v4336_v49  ;;  %v3446_v36 = vrot.slane %v7051_v40, 5 }
 0xacb   :  { %4717 = vpow2.f32 %v4340_v62 }
 0xacc   :  { %4719 = vpow2.f32 %v4339_v18 }
 0xacd   :  { %4721 = vpow2.f32 %v4338_v4 }
 0xace   :  { %v4712_v35 = vpop.eup %4711 }
 0xacf   :  { %v3127_v7 = vpop.f32.mrf.mxu0  ;;  %v3140_v30 = vpop.f32.mrf.mxu1  ;;  %v7053_v21 = vadd.f32 1.0, %v4712_v35 }
 0xad0   :  { %v4714_v19 = vpop.eup %4713 }
 0xad1   :  { %v4716_v56 = vpop.eup %4715  ;;  %v7055_v1 = vadd.f32 1.0, %v4714_v19  ;;  %4723 = vrcp.f32 %v7053_v21  ;;  %v3329_v6 = vand.u32 2147483647, %v7053_v21  ;;  %v3331_v20 = vand.u32 2147483648, %v7053_v21 }
 0xad2   :  { %v4718_v11 = vpop.eup %4717  ;;  %v7063_v15 = vadd.f32 1.0, %v4716_v56  ;;  %vm3325_vm15 = vweird.f32 %v7053_v21 }
 0xad3   :  { %4725 = vrcp.f32 %v7055_v1  ;;  %v4720_v2 = vpop.eup %4719  ;;  %v7067_v60 = vadd.f32 1.0, %v4718_v11  ;;  %v3359_v53 = vand.u32 2147483647, %v7055_v1  ;;  %v3361_v43 = vand.u32 2147483648, %v7055_v1 }
 0xad4   :  { %4727 = vpow2.f32 %v4342_v59  ;;  %v7069_v58 = vadd.f32 1.0, %v4720_v2  ;;  %v4722_v28 = vpop.eup %4721  ;;  %vm3355_vm5 = vweird.f32 %v7055_v1  ;;  %v3346_v37 = vand.u32 2147483648, %v7063_v15 }
 0xad5   :  { %4729 = vpow2.f32 %v4341_v26  ;;  %vm7084_vm0 = vcmp.eq.f32.partialorder %v3329_v6, 8.507059e+37  ;;  %v3344_v62 = vand.u32 2147483647, %v7063_v15  ;;  %v3406_v3 = vand.u32 2147483648, %v7067_v60 }
 0xad6   :  { %4731 = vrcp.f32 %v7063_v15  ;;  %v3332_v55 = vor.u32 1.1754944e-38, %v3331_v20  ;;  %vm7091_vm13 = vcmp.eq.f32.partialorder %v3359_v53, 8.507059e+37  ;;  %v3404_v4 = vand.u32 2147483647, %v7067_v60 }
 0xad7   :  { %4733 = vrcp.f32 %v7067_v60  ;;  %v4724_v41 = vpop.eup %4723  ;;  %v3362_v7 = vor.u32 1.1754944e-38, %v3361_v43  ;;  %vm3340_vm14 = vweird.f32 %v7063_v15  ;;  %v7097_v30 = vadd.f32 1.0, %v4722_v28 }
 0xad8   :  { %4735 = vrcp.f32 %v7069_v58  ;;  %v3321_v12 = vmul.f32 %v4724_v41, %v7053_v21  ;;  %vm3326_vm7 = vweird.f32 %v4724_v41  ;;  %v3347_v56 = vor.u32 1.1754944e-38, %v3346_v37 }
 0xad9   :  { %v4726_v49 = vpop.eup %4725  ;;  %vm3400_vm8 = vweird.f32 %v7067_v60  ;;  %v3389_v26 = vand.u32 2147483647, %v7069_v58  ;;  %vm7102_vm11 = vcmp.eq.f32.partialorder %v3344_v62, 8.507059e+37  ;;  %v3407_v53 = vor.u32 1.1754944e-38, %v3406_v3  ;;  %vm3327_vm6 = vmor %vm3325_vm15, %vm3326_vm7 }
 0xada   :  { %v4728_v46 = vpop.eup %4727  ;;  %v3351_v18 = vmul.f32 %v4726_v49, %v7055_v1  ;;  %v3322_v35 = vsub.f32 1.0, %v3321_v12  ;;  %vm3356_vm2 = vweird.f32 %v4726_v49  ;;  %vm3385_vm9 = vweird.f32 %v7069_v58 }
 0xadb   :  { %v4730_v34 = vpop.eup %4729  ;;  %vm7108_vm10 = vcmp.eq.f32.partialorder %v3404_v4, 8.507059e+37  ;;  %4737 = vrcp.f32 %v7097_v30  ;;  %v7115_v61 = vadd.f32 1.0, %v4728_v46  ;;  %vm7120_vm1 = vcmp.eq.f32.partialorder %v3389_v26, 8.507059e+37  ;;  %vm3357_vm4 = vmor %vm3355_vm5, %vm3356_vm2 }
 0xadc   :  { %v4732_v19 = vpop.eup %4731  ;;  %v3352_v59 = vsub.f32 1.0, %v3351_v18  ;;  %v3323_v2 = vmul.f32 %v4724_v41, %v3322_v35  ;;  %v3391_v18 = vand.u32 2147483648, %v7069_v58  ;;  %vm3370_vm7 = vweird.f32 %v7097_v30 }
 0xadd   :  { %v4734_v11 = vpop.eup %4733  ;;  %v3336_v6 = vmul.f32 %v4732_v19, %v7063_v15  ;;  %vm3341_vm12 = vweird.f32 %v4732_v19  ;;  %4739 = vrcp.f32 %v7115_v61 }
 0xade   :  { %v4736_v28 = vpop.eup %4735  ;;  %v3353_v43 = vmul.f32 %v4726_v49, %v3352_v59  ;;  %v3396_v37 = vmul.f32 %v4734_v11, %v7067_v60  ;;  %v3324_v35 = vadd.f32 %v4724_v41, %v3323_v2  ;;  %vm3401_vm3 = vweird.f32 %v4734_v11  ;;  %vm3342_vm5 = vmor %vm3340_vm14, %vm3341_vm12 }
 0xadf   :  { %v3337_v62 = vsub.f32 1.0, %v3336_v6  ;;  %v3381_v29 = vmul.f32 %v4736_v28, %v7069_v58  ;;  %vm3386_vm15 = vweird.f32 %v4736_v28  ;;  %v3392_v44 = vor.u32 1.1754944e-38, %v3391_v18 }
 0xae0   :  { %v3354_v3 = vadd.f32 %v4726_v49, %v3353_v43  ;;  %v3397_v4 = vsub.f32 1.0, %v3396_v37  ;;  %v3328_v0 = vsel %vm3327_vm6, %v4724_v41, %v3324_v35 }
 0xae1   :  { %v3338_v2 = vmul.f32 %v4732_v19, %v3337_v62  ;;  %v3382_v46 = vsub.f32 1.0, %v3381_v29  ;;  %v7129_v6 = vsel %vm7084_vm0, %v3332_v55, %v3328_v0  ;;  %v4738_v35 = vpop.eup %4737  ;;  %vm3402_vm0 = vmor %vm3400_vm8, %vm3401_vm3  ;;  %v7939_v62 = vrot.slane %v7023_v63, 1 }
 0xae2   :  { %v3358_v21 = vsel %vm3357_vm4, %v4726_v49, %v3354_v3  ;;  %v3398_v43 = vmul.f32 %v4734_v11, %v3397_v4  ;;  %v3456_v26 = vmul.f32 %v7051_v40, %v7129_v6  ;;  %v7144_v49 = vadd.f32 1.0, %v4730_v34 }
 0xae3   :  { %v7135_v41 = vsel %vm7091_vm13, %v3362_v7, %v3358_v21  ;;  %v3339_v37 = vadd.f32 %v4732_v19, %v3338_v2  ;;  %v3383_v1 = vmul.f32 %v4736_v28, %v3382_v46  ;;  %vm3387_vm13 = vmor %vm3385_vm9, %vm3386_vm15  ;;  %v4740_v12 = vpop.eup %4739  ;;  %vm3371_vm14 = vweird.f32 %v4738_v35 }
 0xae4   :  { %v3458_v29 = vmul.f32 %v3443_v42, %v7135_v41  ;;  %v3399_v0 = vadd.f32 %v4734_v11, %v3398_v43  ;;  %v3488_v32 = vadd.f32 %v3472_v16, %v3456_v26  ;;  %v3366_v42 = vmul.f32 %v4738_v35, %v7097_v30  ;;  %vm3372_vm8 = vmor %vm3370_vm7, %vm3371_vm14 }
 0xae5   :  { %v3343_v55 = vsel %vm3342_vm5, %v4732_v19, %v3339_v37  ;;  %v3384_v8 = vadd.f32 %v4736_v28, %v3383_v1  ;;  %v3426_v3 = vmul.f32 %v4740_v12, %v7115_v61  ;;  %v3444_v46 = vrot.slane %v7051_v40, 3 }
 0xae6   :  { %v3490_v15 = vadd.f32 %v3474_v45, %v3458_v29  ;;  %v7156_v7 = vsel %vm7102_vm11, %v3347_v56, %v3343_v55  ;;  %v3403_v34 = vsel %vm3402_vm0, %v4734_v11, %v3399_v0  ;;  %4741 = vtanh.f32 %v3488_v32 }
 0xae7   :  { %v3457_v16 = vmul.f32 %v3442_v33, %v7156_v7  ;;  %v7166_v60 = vsel %vm7108_vm10, %v3407_v53, %v3403_v34  ;;  %v3388_v47 = vsel %vm3387_vm13, %v4736_v28, %v3384_v8  ;;  %v3367_v19 = vsub.f32 1.0, %v3366_v42 }
 0xae8   :  { %4743 = vtanh.f32 %v3490_v15  ;;  %v3461_v45 = vmul.f32 %v3446_v36, %v7166_v60  ;;  %v7173_v58 = vsel %vm7120_vm1, %v3392_v44, %v3388_v47  ;;  %v7937_v56 = vrot.slane %v7021_v14, 1 }
 0xae9   :  { %v7938_v33 = vrot.slane %v7051_v40, 4  ;;  %v3476_v53 = vrot.slane %v7028_v39, 1  ;;  %v3376_v28 = vand.u32 2147483648, %v7097_v30  ;;  %v3368_v18 = vmul.f32 %v4738_v35, %v3367_v19 }
 0xaea   :  { %v3489_v11 = vadd.f32 %v7937_v56, %v3457_v16  ;;  %v3374_v36 = vand.u32 2147483647, %v7097_v30  ;;  %4745 = vrcp.f32 %v7144_v49  ;;  %v3493_v14 = vadd.f32 %v7939_v62, %v3461_v45 }
 0xaeb   :  { %v3460_v20 = vmul.f32 %v7938_v33, %v7173_v58  ;;  %v3369_v59 = vadd.f32 %v4738_v35, %v3368_v18  ;;  %v3377_v2 = vor.u32 1.1754944e-38, %v3376_v28  ;;  %v3427_v21 = vsub.f32 1.0, %v3426_v3 }
 0xaec   :  { %4747 = vtanh.f32 %v3489_v11  ;;  %v4742_v39 = vpop.eup %4741  ;;  %vm3375_vm2 = vcmp.eq.f32.partialorder %v3374_v36, 8.507059e+37  ;;  %v3434_v63 = vand.u32 2147483647, %v7115_v61  ;;  %v3436_v37 = vand.u32 2147483648, %v7115_v61 }
 0xaed   :  { %v3492_v4 = vadd.f32 %v3476_v53, %v3460_v20  ;;  %3520 = vrot.lane.b32.xlu0 %v4742_v39, %s4864_s13  ;;  %v3373_v26 = vsel %vm3372_vm8, %v4738_v35, %v3369_v59  ;;  %4749 = vtanh.f32 %v3493_v14  ;;  %v3428_v30 = vmul.f32 %v4740_v12, %v3427_v21 }
 0xaee   :  { %v4744_v43 = vpop.eup %4743  ;;  %v7193_v1 = vsel %vm3375_vm2, %v3377_v2, %v3373_v26  ;;  %vm3431_vm11 = vweird.f32 %v4740_v12  ;;  %v3475_v32 = vrot.slane %v7036_v22, 1  ;;  %vm3430_vm9 = vweird.f32 %v7115_v61 }
 0xaef   :  { %3524 = vrot.lane.b32.xlu2 %v4744_v43, %s4864_s13  ;;  %4751 = vtanh.f32 %v3492_v4  ;;  %v3459_v0 = vmul.f32 %v3444_v46, %v7193_v1  ;;  %v3429_v35 = vadd.f32 %v4740_v12, %v3428_v30  ;;  %vm3432_vm10 = vmor %vm3430_vm9, %vm3431_vm11  ;;  %v3437_v15 = vor.u32 1.1754944e-38, %v3436_v37 }
 0xaf0   :  { %v4746_v29 = vpop.eup %4745  ;;  %vm3435_vm6 = vcmp.eq.f32.partialorder %v3434_v63, 8.507059e+37  ;;  %v3448_v44 = vrot.slane %v7051_v40, 7  ;;  %v3479_v22 = vrot.slane %v7039_v48, 1  ;;  %v3421_v45 = vand.u32 2147483648, %v7144_v49 }
 0xaf1   :  { %v3411_v8 = vmul.f32 %v4746_v29, %v7144_v49  ;;  %v3491_v42 = vadd.f32 %v3475_v32, %v3459_v0  ;;  %v3433_v34 = vsel %vm3432_vm10, %v4740_v12, %v3429_v35  ;;  %vm3416_vm12 = vweird.f32 %v4746_v29 }
 0xaf2   :  { %v4748_v55 = vpop.eup %4747  ;;  %v3438_v47 = vsel %vm3435_vm6, %v3437_v15, %v3433_v34  ;;  %v3419_v11 = vand.u32 2147483647, %v7144_v49  ;;  %vm3415_vm1 = vweird.f32 %v7144_v49  ;;  %v3422_v28 = vor.u32 1.1754944e-38, %v3421_v45 }
 0xaf3   :  { %3522 = vrot.lane.b32.xlu1 %v4748_v55, %s4864_s13  ;;  %v3412_v16 = vsub.f32 1.0, %v3411_v8  ;;  %4753 = vtanh.f32 %v3491_v42  ;;  %v4750_v19 = vpop.eup %4749  ;;  %v3463_v61 = vmul.f32 %v3448_v44, %v3438_v47  ;;  %vm3417_vm4 = vmor %vm3415_vm1, %vm3416_vm12  ;;  %v3447_v12 = vrot.slane %v7051_v40, 6 }
 0xaf4   :  { %vm3420_vm3 = vcmp.eq.f32.partialorder %v3419_v11, 8.507059e+37  ;;  %v3478_v14 = vrot.slane %v7042_v13, 1  ;;  %v3163_v3 = vadd.f32 %v7034_v50, %v7832_v27  ;;  %v3142_v59 = vadd.f32 %v6905_v31, %v7032_v51 }
 0xaf5   :  { %v3413_v56 = vmul.f32 %v4746_v29, %v3412_v16  ;;  %v4752_v33 = vpop.eup %4751  ;;  %3530 = vrot.lane.b32.xlu0 %v4750_v19, %s4864_s13  ;;  %v3495_v20 = vadd.f32 %v3479_v22, %v3463_v61  ;;  %v3506_v13 = vsub.f32 1.0, %v7135_v41  ;;  %v3554_v46 = vmul.f32 %v7135_v41, %v6911_v17 }
 0xaf6   :  { %v4332_v39 = vmul.f32 -1.442695, %v3142_v59  ;;  %v3508_v37 = vsub.f32 1.0, %v7173_v58  ;;  %v3556_v31 = vmul.f32 %v7173_v58, %v6917_v54  ;;  %v3511_v17 = vsub.f32 1.0, %v3438_v47 }
 0xaf7   :  { %3528 = vrot.lane.b32.xlu2 %v4752_v33, %s4864_s13  ;;  %v3414_v53 = vadd.f32 %v4746_v29, %v3413_v56  ;;  %4755 = vtanh.f32 %v3495_v20  ;;  %v3559_v32 = vmul.f32 %v3438_v47, %v6930_v5  ;;  %v3504_v42 = vsub.f32 1.0, %v7129_v6 }
 0xaf8   :  { %v3552_v58 = vmul.f32 %v7129_v6, %v6932_v24  ;;  %v3505_v16 = vsub.f32 1.0, %v7156_v7  ;;  %v3553_v5 = vmul.f32 %v7156_v7, %v6934_v25  ;;  %v3509_v61 = vsub.f32 1.0, %v7166_v60 }
 0xaf9   :  { %v3418_v48 = vsel %vm3417_vm4, %v4746_v29, %v3414_v53  ;;  %v4754_v18 = vpop.eup %4753  ;;  %v3557_v24 = vmul.f32 %v7166_v60, %v6948_v38  ;;  %v3507_v53 = vsub.f32 1.0, %v7193_v1  ;;  %v3555_v38 = vmul.f32 %v7193_v1, %v6952_v23 }
 0xafa   :  { %v7208_v36 = vsel %vm3420_vm3, %v3422_v28, %v3418_v48  ;;  %vm7940_vm14 = vcmask 1041409   ;;  %vm7941_vm7 = vcmask 1042434   ;;  %vm7942_vm8 = vcmask 1043459  }
 0xafb   :  { %3526 = vrot.lane.b32.xlu1 %v4754_v18, %s4864_s13  ;;  %v3462_v62 = vmul.f32 %v3447_v12, %v7208_v36  ;;  %vm7943_vm2 = vcmask 1044484   ;;  %vm7944_vm11 = vcmask 1045509   ;;  %vm7945_vm9 = vcmask 1046534  }
 0xafc   :  { %vm7946_vm10 = vcmask 1047559   ;;  %vm7947_vm6 = vcmask 523264  }
 0xafd   :  { %v3494_v49 = vadd.f32 %v3478_v14, %v3462_v62  ;;  %3165 = vrot.lane.b32.xlu0 %v3163_v3, %s4864_s13  ;;  %v4756_v4 = vpop.eup %4755  ;;  %vm7948_vm12 = vmmov %vm7947_vm6 }
 0xafe   :  { %vm7949_vm1 = vmmov %vm7947_vm6 }
 0xaff   :  { %4757 = vtanh.f32 %v3494_v49  ;;  %3534 = vrot.lane.b32.xlu2 %v4756_v4, %s4864_s13  ;;  %v3162_v49 = vadd.f32 %v6984_v9, %v7034_v50  ;;  %v3510_v50 = vsub.f32 1.0, %v7208_v36 }
 0xb00   :  { %4759 = vpow2.f32 %v4332_v39 }
 0xb05   :  { %v4758_v40 = vpop.eup %4757 }
 0xb06   :  { %3532 = vrot.lane.b32.xlu1 %v4758_v40, %s4864_s13  ;;  %v4760_v26 = vpop.eup %4759 }
 0xb07   :  { %v3146_v63 = vadd.f32 1.0, %v4760_v26 }
 0xb09   :  { %4761 = vrcp.f32 %v3146_v63  ;;  %v3158_v33 = vand.u32 2147483648, %v3146_v63  ;;  %vm3152_vm5 = vweird.f32 %v3146_v63  ;;  %v3156_v25 = vand.u32 2147483647, %v3146_v63 }
 0xb0b   :  { %v3159_v12 = vor.u32 1.1754944e-38, %v3158_v33  ;;  %vm3157_vm13 = vcmp.eq.f32.partialorder %v3156_v25, 8.507059e+37 }
 0xb0f   :  { %v4762_v41 = vpop.eup %4761 }
 0xb10   :  { %v3148_v8 = vmul.f32 %v4762_v41, %v3146_v63  ;;  %vm3153_vm15 = vweird.f32 %v4762_v41 }
 0xb11   :  { %vm3154_vm0 = vmor %vm3152_vm5, %vm3153_vm15 }
 0xb12   :  { %v3149_v34 = vsub.f32 1.0, %v3148_v8 }
 0xb14   :  { %v3150_v45 = vmul.f32 %v4762_v41, %v3149_v34 }
 0xb16   :  { %v3151_v11 = vadd.f32 %v4762_v41, %v3150_v45 }
 0xb18   :  { %v3155_v48 = vsel %vm3154_vm0, %v4762_v41, %v3151_v11 }
 0xb19   :  { %v3160_v14 = vsel %vm3157_vm13, %v3159_v12, %v3155_v48  ;;  %v7301_v12 = vld [vmem:[#allocation2 + $0x7] ss:$8 sm:$0x3] }
 0xb1a   :  { %v3177_v33 = vmul.f32 %v3160_v14, %v6997_v52  ;;  %v7305_v52 = vld [vmem:[#allocation2 + $0x27] ss:$8 sm:$0x3] }
 0xb49   :  { %v3525_v2 = vpop.permute.xlu2 %3524 }
 0xb4a   :  { %v3546_v21 = vmul.f32 %v3525_v2, %v3506_v13 }
 0xb4c   :  { %v7223_v43 = vadd.f32 %v3554_v46, %v3546_v21 }
 0xb4e   :  { %3580 = vst [vmem:[#allocation1 + $0x2] ss:$9 sm:$0xff] %v7223_v43  ;;  %v3678_v4 = vpack.c.bf16 %v7223_v43, %v7223_v43 }
 0xb50   :  { %v3694_v2 = vunpack.c.l.b16 %v3678_v4 }
 0xb51   :  { %v3529_v30 = vpop.permute.xlu2 %3528 }
 0xb52   :  { %v3548_v51 = vmul.f32 %v3529_v30, %v3508_v37  ;;  %v3702_v30 = vrot.slane %v3694_v2, 6 }
 0xb54   :  { %v7229_v29 = vadd.f32 %v3556_v31, %v3548_v51  ;;  %v3558_v51 = vmul.f32 %v7208_v36, %v6972_v57 }
 0xb56   :  { %3584 = vst [vmem:[#allocation1 + $0x4] ss:$9 sm:$0xff] %v7229_v29  ;;  %v3680_v46 = vpack.c.bf16 %v7229_v29, %v7229_v29 }
 0xb58   :  { %v3696_v31 = vunpack.c.l.b16 %v3680_v46  ;;  %v7313_v46 = vld [vmem:[#allocation2 + $0x47] ss:$8 sm:$0x3] }
 0xb59   :  { %v3535_v0 = vpop.permute.xlu2 %3534 }
 0xb5a   :  { %v3551_v55 = vmul.f32 %v3535_v0, %v3511_v17 }
 0xb5c   :  { %v7233_v35 = vadd.f32 %v3559_v32, %v3551_v55 }
 0xb5e   :  { %3590 = vst [vmem:[#allocation1 + $0x7] ss:$9 sm:$0xff] %v7233_v35  ;;  %v3683_v41 = vpack.c.bf16 %v7233_v35, %v7233_v35 }
 0xb5f   :  { %v3521_v54 = vpop.permute.xlu0 %3520 }
 0xb60   :  { %v3544_v15 = vmul.f32 %v3521_v54, %v3504_v42  ;;  %v3706_v54 = vrot.slane %v3696_v31, 4  ;;  %v3699_v36 = vunpack.c.l.b16 %v3683_v41  ;;  %v7319_v31 = vld [vmem:[#allocation2 + $0x67] ss:$8 sm:$0x3] }
 0xb62   :  { %v7239_v44 = vadd.f32 %v3552_v58, %v3544_v15 }
 0xb64   :  { %3576 = vst [vmem:[#allocation1] ss:$9 sm:$0xff] %v7239_v44  ;;  %v3676_v59 = vpack.c.bf16 %v7239_v44, %v7239_v44 }
 0xb65   :  { %v3523_v22 = vpop.permute.xlu1 %3522 }
 0xb66   :  { %v3545_v47 = vmul.f32 %v3523_v22, %v3505_v16  ;;  %v3692_v9 = vunpack.c.l.b16 %v3676_v59  ;;  %v3712_v22 = vrot.slane %v3699_v36, 1  ;;  %v7329_v36 = vld [vmem:[#allocation2 + $0x77] ss:$8 sm:$0x3] }
 0xb67   :  { %v3531_v56 = vpop.permute.xlu0 %3530 }
 0xb68   :  { %v7245_v19 = vadd.f32 %v3553_v5, %v3545_v47  ;;  %v3549_v6 = vmul.f32 %v3531_v56, %v3509_v61 }
 0xb6a   :  { %3578 = vst [vmem:[#allocation1 + $0x1] ss:$9 sm:$0xff] %v7245_v19  ;;  %v7251_v20 = vadd.f32 %v3557_v24, %v3549_v6  ;;  %v3677_v7 = vpack.c.bf16 %v7245_v19, %v7245_v19  ;;  %v3171_v6 = vsub.f32 1.0, %v3160_v14 }
 0xb6c   :  { %3586 = vst [vmem:[#allocation1 + $0x5] ss:$9 sm:$0xff] %v7251_v20  ;;  %v3693_v18 = vunpack.c.l.b16 %v3677_v7  ;;  %v3681_v26 = vpack.c.bf16 %v7251_v20, %v7251_v20 }
 0xb6d   :  { %v3527_v28 = vpop.permute.xlu1 %3526 }
 0xb6e   :  { %v3547_v60 = vmul.f32 %v3527_v28, %v3507_v53  ;;  %v3700_v39 = vrot.slane %v3693_v18, 7  ;;  %v3697_v8 = vunpack.c.l.b16 %v3681_v26  ;;  %v7303_v18 = vld [vmem:[#allocation2 + $0x17] ss:$8 sm:$0x3] }
 0xb6f   :  { %v3166_v3 = vpop.permute.xlu0 %3165 }
 0xb70   :  { %v7259_v62 = vadd.f32 %v3555_v38, %v3547_v60  ;;  %v3168_v40 = vmul.f32 %v3166_v3, %v3160_v14  ;;  %v3701_v21 = vsel %vm7940_vm14, %v3700_v39, %v3692_v9  ;;  %v3708_v34 = vrot.slane %v3697_v8, 3 }
 0xb71   :  { %v3703_v32 = vsel %vm7941_vm7, %v3702_v30, %v3701_v21 }
 0xb72   :  { %3582 = vst [vmem:[#allocation1 + $0x3] ss:$9 sm:$0xff] %v7259_v62  ;;  %v3679_v23 = vpack.c.bf16 %v7259_v62, %v7259_v62  ;;  %v3169_v1 = vadd.f32 %v3168_v40, %v3162_v49 }
 0xb74   :  { %v3695_v13 = vunpack.c.l.b16 %v3679_v23  ;;  %4763 = vtanh.f32 %v3169_v1  ;;  %v7307_v23 = vld [vmem:[#allocation2 + $0x37] ss:$8 sm:$0x3] }
 0xb76   :  { %v3704_v63 = vrot.slane %v3695_v13, 5 }
 0xb78   :  { %v3533_v37 = vpop.permute.xlu1 %3532  ;;  %v3705_v42 = vsel %vm7942_vm8, %v3704_v63, %v3703_v32 }
 0xb79   :  { %v3550_v17 = vmul.f32 %v3533_v37, %v3510_v50  ;;  %v3707_v15 = vsel %vm7943_vm2, %v3706_v54, %v3705_v42  ;;  %v7316_v50 = vld [vmem:[#allocation2 + $0x57] ss:$8 sm:$0x3] }
 0xb7a   :  { %v4764_v0 = vpop.eup %4763  ;;  %v3709_v5 = vsel %vm7944_vm11, %v3708_v34, %v3707_v15 }
 0xb7b   :  { %v7281_v55 = vadd.f32 %v3558_v51, %v3550_v17  ;;  %3173 = vrot.lane.b32.xlu2 %v4764_v0, %s4864_s13 }
 0xb7d   :  { %3588 = vst [vmem:[#allocation1 + $0x6] ss:$9 sm:$0xff] %v7281_v55  ;;  %v3682_v57 = vpack.c.bf16 %v7281_v55, %v7281_v55 }
 0xb7f   :  { %v3698_v58 = vunpack.c.l.b16 %v3682_v57 }
 0xb81   :  { %v3710_v16 = vrot.slane %v3698_v58, 2 }
 0xb83   :  { %v3711_v47 = vsel %vm7945_vm9, %v3710_v16, %v3709_v5 }
 0xb84   :  { %v3591_v45 = vld [vmem:[#allocation1] sm:$0xff]  ;;  %v3713_v61 = vsel %vm7946_vm10, %v3712_v22, %v3711_v47 }
 0xb85   :  { %3592 = vrot.lane.b32.xlu0 %v3591_v45, %s4864_s13  ;;  %v3714_v56 = vpack.c.b16 %v3713_v61, %v3713_v61 }
 0xb87   :  { %3715 = vrot.lane.b32.xlu1 %v3714_v56, %s4864_s13 }
 0xbd5   :  { %v3174_v24 = vpop.permute.xlu2 %3173 }
 0xbd6   :  { %v3176_v11 = vmul.f32 %v3174_v24, %v3171_v6 }
 0xbd8   :  { %v7295_v25 = vadd.f32 %v3177_v33, %v3176_v11  ;;  %v3953_v33 = vrot.slane %v7301_v12, 1 }
 0xbf7   :  { %v3593_v7 = vpop.permute.xlu0 %3592 }
 0xbf8   :  { %v3595_v53 = vsel %vm7947_vm6, %v3593_v7, %v7295_v25  ;;  %v3954_v7 = vrot.slane %v7303_v18, 1 }
 0xbf9   :  { %v3596_v28 = vpack.c.bf16 %v3595_v53, %v3595_v53  ;;  %v3716_v48 = vpop.permute.xlu1 %3715 }
 0xbfa   :  { %4344 = vmatmul.msk.bf16.vlgmr.msra.gmra.mxu0 %vm7948_vm12, %v3716_v48  ;;  %4345 = vmatmul.msk.bf16.vlgmr.msra.gmra.mxu1 %vm7949_vm1, %v3716_v48 }
 0xbfb   :  { %3605 = vmatmul.bf16.vlgmr.msrb.gmra.mxu2 %v3596_v28  ;;  %3618 = vmatmul.bf16.vlgmr.msrb.gmra.mxu3 %v3596_v28  ;;  %v3955_v28 = vrot.slane %v7305_v52, 1 }
 0xc77   :  { %v3729_v38 = vpop.f32.mrf.mxu0  ;;  %v3742_v60 = vpop.f32.mrf.mxu1 }
 0xc78   :  { %v3747_v14 = vrot.slane %v3729_v38, 1  ;;  %v3748_v3 = vrot.slane %v3729_v38, 2  ;;  %v3749_v49 = vrot.slane %v3729_v38, 3  ;;  %v3750_v4 = vrot.slane %v3729_v38, 4 }
 0xc79   :  { %v3751_v40 = vrot.slane %v3729_v38, 5  ;;  %v3752_v59 = vrot.slane %v3729_v38, 6  ;;  %v3761_v1 = vadd.f32 %v3729_v38, %v7301_v12  ;;  %v3753_v51 = vrot.slane %v3729_v38, 7 }
 0xc7a   :  { %v3762_v39 = vadd.f32 %v3747_v14, %v7303_v18  ;;  %v3763_v13 = vadd.f32 %v3748_v3, %v7305_v52  ;;  %v3764_v2 = vadd.f32 %v3749_v49, %v7307_v23  ;;  %v3765_v9 = vadd.f32 %v3750_v4, %v7313_v46 }
 0xc7b   :  { %v4346_v21 = vmul.f32 -1.442695, %v3761_v1  ;;  %v3766_v30 = vadd.f32 %v3751_v40, %v7316_v50  ;;  %v3767_v32 = vadd.f32 %v3752_v59, %v7319_v31  ;;  %v3768_v15 = vadd.f32 %v3753_v51, %v7329_v36 }
 0xc7c   :  { %v4347_v26 = vmul.f32 -1.442695, %v3762_v39  ;;  %v4348_v63 = vmul.f32 -1.442695, %v3763_v13  ;;  %v4349_v37 = vmul.f32 -1.442695, %v3764_v2  ;;  %v7338_v11 = vadd.f32 %v7048_v10, %v3742_v60 }
 0xc7d   :  { %4765 = vpow2.f32 %v4346_v21  ;;  %v4350_v0 = vmul.f32 -1.442695, %v3765_v9  ;;  %v4351_v57 = vmul.f32 -1.442695, %v3766_v30  ;;  %v4352_v58 = vmul.f32 -1.442695, %v3767_v32 }
 0xc7e   :  { %v7321_v17 = vpop.f32.mrf.mxu2  ;;  %v7323_v41 = vpop.f32.mrf.mxu3  ;;  %4767 = vpow2.f32 %v4347_v26  ;;  %v4353_v56 = vmul.f32 -1.442695, %v3768_v15  ;;  %v3956_v38 = vrot.slane %v7307_v23, 1  ;;  %v3957_v10 = vrot.slane %v7313_v46, 1 }
 0xc7f   :  { %v3644_v8 = vadd.f32 %v7323_v41, %v7832_v27  ;;  %v3731_v42 = vpop.f32.mrf.mxu0  ;;  %v3744_v54 = vpop.f32.mrf.mxu1  ;;  %4769 = vpow2.f32 %v4348_v63  ;;  %v3923_v1 = vrot.slane %v7338_v11, 1  ;;  %v3924_v39 = vrot.slane %v7338_v11, 2 }
 0xc80   :  { %4771 = vpow2.f32 %v4349_v37  ;;  %v3925_v13 = vrot.slane %v7338_v11, 3  ;;  %v3926_v2 = vrot.slane %v7338_v11, 4  ;;  %v3927_v23 = vrot.slane %v7338_v11, 5 }
 0xc81   :  { %3646 = vrot.lane.b32.xlu1 %v3644_v8, %s4864_s13  ;;  %4773 = vpow2.f32 %v4350_v0  ;;  %v3928_v46 = vrot.slane %v7338_v11, 6 }
 0xc82   :  { %4775 = vpow2.f32 %v4351_v57 }
 0xc83   :  { %v4766_v34 = vpop.eup %4765  ;;  %4777 = vpow2.f32 %v4352_v58 }
 0xc84   :  { %v4768_v16 = vpop.eup %4767  ;;  %v7332_v22 = vadd.f32 1.0, %v4766_v34 }
 0xc85   :  { %v4770_v5 = vpop.eup %4769  ;;  %v7334_v61 = vadd.f32 1.0, %v4768_v16 }
 0xc86   :  { %v3608_v47 = vpop.f32.mrf.mxu2  ;;  %v3621_v45 = vpop.f32.mrf.mxu3  ;;  %4779 = vrcp.f32 %v7332_v22  ;;  %v7343_v53 = vadd.f32 1.0, %v4770_v5  ;;  %v3810_v14 = vand.u32 2147483647, %v7332_v22  ;;  %v3812_v3 = vand.u32 2147483648, %v7332_v22 }
 0xc87   :  { %v4772_v24 = vpop.eup %4771  ;;  %4781 = vrcp.f32 %v7334_v61  ;;  %v3825_v49 = vand.u32 2147483647, %v7334_v61  ;;  %v3827_v4 = vand.u32 2147483648, %v7334_v61  ;;  %vm3806_vm4 = vweird.f32 %v7332_v22 }
 0xc88   :  { %v4774_v6 = vpop.eup %4773  ;;  %v7346_v48 = vadd.f32 1.0, %v4772_v24  ;;  %4783 = vpow2.f32 %v4353_v56  ;;  %vm3821_vm3 = vweird.f32 %v7334_v61  ;;  %v3842_v21 = vand.u32 2147483648, %v7343_v53 }
 0xc89   :  { %v4776_v60 = vpop.eup %4775  ;;  %4785 = vrcp.f32 %v7343_v53  ;;  %v7355_v40 = vadd.f32 1.0, %v4774_v6  ;;  %vm7366_vm15 = vcmp.eq.f32.partialorder %v3810_v14, 8.507059e+37  ;;  %v3813_v30 = vor.u32 1.1754944e-38, %v3812_v3 }
 0xc8a   :  { %v4778_v59 = vpop.eup %4777  ;;  %4787 = vrcp.f32 %v7346_v48  ;;  %v3840_v51 = vand.u32 2147483647, %v7343_v53  ;;  %v3857_v0 = vand.u32 2147483648, %v7346_v48  ;;  %vm7373_vm5 = vcmp.eq.f32.partialorder %v3825_v49, 8.507059e+37 }
 0xc8b   :  { %v3828_v42 = vor.u32 1.1754944e-38, %v3827_v4  ;;  %4789 = vrcp.f32 %v7355_v40  ;;  %vm3836_vm0 = vweird.f32 %v7343_v53  ;;  %v3855_v58 = vand.u32 2147483647, %v7346_v48 }
 0xc8c   :  { %v4780_v9 = vpop.eup %4779  ;;  %v7380_v15 = vadd.f32 1.0, %v4776_v60  ;;  %v3843_v5 = vor.u32 1.1754944e-38, %v3842_v21  ;;  %v3872_v47 = vand.u32 2147483648, %v7355_v40  ;;  %v7383_v45 = vadd.f32 1.0, %v4778_v59 }
 0xc8d   :  { %v4782_v26 = vpop.eup %4781  ;;  %v3802_v63 = vmul.f32 %v4780_v9, %v7332_v22  ;;  %vm3807_vm13 = vweird.f32 %v4780_v9  ;;  %vm7386_vm14 = vcmp.eq.f32.partialorder %v3840_v51, 8.507059e+37  ;;  %vm3851_vm7 = vweird.f32 %v7346_v48 }
 0xc8e   :  { %v3817_v32 = vmul.f32 %v4782_v26, %v7334_v61  ;;  %v4784_v54 = vpop.eup %4783  ;;  %v3858_v14 = vor.u32 1.1754944e-38, %v3857_v0  ;;  %vm3822_vm8 = vweird.f32 %v4782_v26  ;;  %v3870_v49 = vand.u32 2147483647, %v7355_v40  ;;  %vm3808_vm11 = vmor %vm3806_vm4, %vm3807_vm13 }
 0xc8f   :  { %v3803_v57 = vsub.f32 1.0, %v3802_v63  ;;  %v4786_v34 = vpop.eup %4785  ;;  %4791 = vrcp.f32 %v7380_v15  ;;  %vm7394_vm2 = vcmp.eq.f32.partialorder %v3855_v58, 8.507059e+37  ;;  %v7398_v51 = vadd.f32 1.0, %v4784_v54  ;;  %vm3823_vm6 = vmor %vm3821_vm3, %vm3822_vm8 }
 0xc90   :  { %v3818_v16 = vsub.f32 1.0, %v3817_v32  ;;  %v3832_v24 = vmul.f32 %v4786_v34, %v7343_v53  ;;  %v4788_v3 = vpop.eup %4787  ;;  %vm3837_vm9 = vweird.f32 %v4786_v34  ;;  %vm3866_vm10 = vweird.f32 %v7355_v40 }
 0xc91   :  { %v3804_v56 = vmul.f32 %v4780_v9, %v3803_v57  ;;  %v3847_v21 = vmul.f32 %v4788_v3, %v7346_v48  ;;  %v4790_v32 = vpop.eup %4789  ;;  %v3873_v57 = vor.u32 1.1754944e-38, %v3872_v47  ;;  %4793 = vrcp.f32 %v7383_v45  ;;  %vm3838_vm3 = vmor %vm3836_vm0, %vm3837_vm9 }
 0xc92   :  { %v3819_v60 = vmul.f32 %v4782_v26, %v3818_v16  ;;  %v3833_v59 = vsub.f32 1.0, %v3832_v24  ;;  %vm3852_vm12 = vweird.f32 %v4788_v3  ;;  %vm7413_vm1 = vcmp.eq.f32.partialorder %v3870_v49, 8.507059e+37 }
 0xc93   :  { %v3805_v4 = vadd.f32 %v4780_v9, %v3804_v56  ;;  %v3848_v54 = vsub.f32 1.0, %v3847_v21  ;;  %v3862_v56 = vmul.f32 %v4790_v32, %v7355_v40  ;;  %vm3881_vm4 = vweird.f32 %v7380_v15 }
 0xc94   :  { %v3820_v0 = vadd.f32 %v4782_v26, %v3819_v60  ;;  %v3834_v58 = vmul.f32 %v4786_v34, %v3833_v59  ;;  %v3885_v49 = vand.u32 2147483647, %v7380_v15 }
 0xc95   :  { %v3809_v16 = vsel %vm3808_vm11, %v4780_v9, %v3805_v4  ;;  %v3887_v9 = vand.u32 2147483648, %v7380_v15  ;;  %v3849_v59 = vmul.f32 %v4788_v3, %v3848_v54  ;;  %v4792_v37 = vpop.eup %4791 }
 0xc96   :  { %v7411_v22 = vsel %vm7366_vm15, %v3813_v30, %v3809_v16  ;;  %v3824_v24 = vsel %vm3823_vm6, %v4782_v26, %v3820_v0  ;;  %v3835_v4 = vadd.f32 %v4786_v34, %v3834_v58  ;;  %v3863_v30 = vsub.f32 1.0, %v3862_v56 }
 0xc97   :  { %v3937_v61 = vmul.f32 %v7338_v11, %v7411_v22  ;;  %v7422_v47 = vsel %vm7373_vm5, %v3828_v42, %v3824_v24  ;;  %vm3867_vm15 = vweird.f32 %v4790_v32  ;;  %v3850_v21 = vadd.f32 %v4788_v3, %v3849_v59  ;;  %v4794_v16 = vpop.eup %4793  ;;  %vm3853_vm5 = vmor %vm3851_vm7, %vm3852_vm12 }
 0xc98   :  { %v3938_v26 = vmul.f32 %v3923_v1, %v7422_v47  ;;  %v3839_v42 = vsel %vm3838_vm3, %v4786_v34, %v3835_v4  ;;  %v3877_v0 = vmul.f32 %v4792_v37, %v7380_v15  ;;  %v3864_v53 = vmul.f32 %v4790_v32, %v3863_v30  ;;  %vm3868_vm0 = vmor %vm3866_vm10, %vm3867_vm15 }
 0xc99   :  { %v3969_v8 = vadd.f32 %v3953_v33, %v3937_v61  ;;  %v7439_v1 = vsel %vm7386_vm14, %v3843_v5, %v3839_v42  ;;  %v3888_v54 = vor.u32 1.1754944e-38, %v3887_v9  ;;  %v3854_v33 = vsel %vm3853_vm5, %v4788_v3, %v3850_v21 }
 0xc9a   :  { %v3970_v58 = vadd.f32 %v3954_v7, %v3938_v26  ;;  %v3939_v12 = vmul.f32 %v3924_v39, %v7439_v1  ;;  %v3878_v34 = vsub.f32 1.0, %v3877_v0  ;;  %v7449_v18 = vsel %vm7394_vm2, %v3858_v14, %v3854_v33 }
 0xc9b   :  { %4795 = vtanh.f32 %v3969_v8  ;;  %v3865_v7 = vadd.f32 %v4790_v32, %v3864_v53  ;;  %v3892_v5 = vmul.f32 %v4794_v16, %v7383_v45  ;;  %v3940_v6 = vmul.f32 %v3925_v13, %v7449_v18 }
 0xc9c   :  { %4797 = vtanh.f32 %v3970_v58  ;;  %v3971_v48 = vadd.f32 %v3955_v28, %v3939_v12  ;;  %v3879_v39 = vmul.f32 %v4792_v37, %v3878_v34  ;;  %vm3882_vm13 = vweird.f32 %v4792_v37 }
 0xc9d   :  { %v3869_v3 = vsel %vm3868_vm0, %v4790_v32, %v3865_v7  ;;  %v3893_v63 = vsub.f32 1.0, %v3892_v5  ;;  %v3900_v14 = vand.u32 2147483647, %v7383_v45  ;;  %v3902_v56 = vand.u32 2147483648, %v7383_v45  ;;  %vm3883_vm14 = vmor %vm3881_vm4, %vm3882_vm13 }
 0xc9e   :  { %4799 = vtanh.f32 %v3971_v48  ;;  %v3972_v52 = vadd.f32 %v3956_v38, %v3940_v6  ;;  %v7466_v28 = vsel %vm7413_vm1, %v3873_v57, %v3869_v3  ;;  %v3880_v13 = vadd.f32 %v4792_v37, %v3879_v39  ;;  %v7508_v3 = vld [vmem:[%s7567_s6] ss:$0 sm:$0xff] }
 0xc9f   :  { %v3941_v40 = vmul.f32 %v3926_v2, %v7466_v28  ;;  %v3894_v32 = vmul.f32 %v4794_v16, %v3893_v63  ;;  %vm3897_vm7 = vweird.f32 %v4794_v16  ;;  %4801 = vrcp.f32 %v7398_v51 }
 0xca0   :  { %v3884_v9 = vsel %vm3883_vm14, %v4792_v37, %v3880_v13  ;;  %vm3886_vm8 = vcmp.eq.f32.partialorder %v3885_v49, 8.507059e+37  ;;  %vm3896_vm2 = vweird.f32 %v7383_v45  ;;  %4803 = vtanh.f32 %v3972_v52 }
 0xca1   :  { %v4796_v24 = vpop.eup %4795  ;;  %v3973_v57 = vadd.f32 %v3957_v10, %v3941_v40  ;;  %v7478_v60 = vsel %vm3886_vm8, %v3888_v54, %v3884_v9  ;;  %v3895_v2 = vadd.f32 %v4794_v16, %v3894_v32  ;;  %v3958_v61 = vrot.slane %v7316_v50, 1  ;;  %vm3898_vm11 = vmor %vm3896_vm2, %vm3897_vm7 }
 0xca2   :  { %v4798_v38 = vpop.eup %4797  ;;  %4001 = vrot.lane.b32.xlu2 %v4796_v24, %s4864_s13  ;;  %v3942_v15 = vmul.f32 %v3927_v23, %v7478_v60  ;;  %v3903_v4 = vor.u32 1.1754944e-38, %v3902_v56  ;;  %vm3901_vm9 = vcmp.eq.f32.partialorder %v3900_v14, 8.507059e+37  ;;  %v3959_v49 = vrot.slane %v7319_v31, 1 }
 0xca3   :  { %4003 = vrot.lane.b32.xlu0 %v4798_v38, %s4864_s13  ;;  %4805 = vtanh.f32 %v3973_v57  ;;  %v3899_v59 = vsel %vm3898_vm11, %v4794_v16, %v3895_v2  ;;  %v3917_v16 = vand.u32 2147483648, %v7398_v51  ;;  %v3915_v53 = vand.u32 2147483647, %v7398_v51  ;;  %v7515_v2 = vld [vmem:[%s7568_s7] ss:$0 sm:$0xff] }
 0xca4   :  { %v4800_v10 = vpop.eup %4799  ;;  %v3974_v37 = vadd.f32 %v3958_v61, %v3942_v15  ;;  %v7486_v26 = vsel %vm3901_vm9, %v3903_v4, %v3899_v59  ;;  %vm3911_vm6 = vweird.f32 %v7398_v51  ;;  %v3929_v34 = vrot.slane %v7338_v11, 7 }
 0xca5   :  { %v4802_v45 = vpop.eup %4801  ;;  %4005 = vrot.lane.b32.xlu1 %v4800_v10, %s4864_s13  ;;  %v3943_v30 = vmul.f32 %v3928_v46, %v7486_v26  ;;  %v3918_v12 = vor.u32 1.1754944e-38, %v3917_v16  ;;  %vm3916_vm1 = vcmp.eq.f32.partialorder %v3915_v53, 8.507059e+37  ;;  %v3960_v6 = vrot.slane %v7329_v36, 1 }
 0xca6   :  { %4807 = vtanh.f32 %v3974_v37  ;;  %v3907_v50 = vmul.f32 %v4802_v45, %v7398_v51  ;;  %v4804_v42 = vpop.eup %4803  ;;  %vm3912_vm10 = vweird.f32 %v4802_v45  ;;  %v3623_v11 = vadd.f32 %v7508_v3, %v7321_v17 }
 0xca7   :  { %v3975_v8 = vadd.f32 %v3959_v49, %v3943_v30  ;;  %vm3913_vm12 = vmor %vm3911_vm6, %vm3912_vm10  ;;  %v3643_v15 = vadd.f32 %v7515_v2, %v7323_v41  ;;  %v3985_v59 = vsub.f32 1.0, %v7411_v22  ;;  %v4033_v37 = vmul.f32 %v7411_v22, %v7239_v44 }
 0xca8   :  { %v3908_v21 = vsub.f32 1.0, %v3907_v50  ;;  %v4343_v63 = vmul.f32 -1.442695, %v3623_v11  ;;  %v3988_v49 = vsub.f32 1.0, %v7449_v18  ;;  %v4036_v41 = vmul.f32 %v7449_v18, %v7259_v62 }
 0xca9   :  { %v4806_v0 = vpop.eup %4805  ;;  %4809 = vtanh.f32 %v3975_v8  ;;  %v4039_v44 = vmul.f32 %v7486_v26, %v7281_v55  ;;  %v3987_v62 = vsub.f32 1.0, %v7439_v1  ;;  %vm7960_vm0 = vcmask 523264  }
 0xcaa   :  { %4007 = vrot.lane.b32.xlu2 %v4804_v42, %s4864_s13  ;;  %v3909_v58 = vmul.f32 %v4802_v45, %v3908_v21  ;;  %v3991_v21 = vsub.f32 1.0, %v7486_v26  ;;  %v3989_v26 = vsub.f32 1.0, %v7466_v28  ;;  %vm7961_vm2 = vmmov %vm7960_vm0  ;;  %vm4160_vm11 = vcmask 7168  }
 0xcab   :  { %4009 = vrot.lane.b32.xlu0 %v4806_v0, %s4864_s13 }
 0xcac   :  { %v4808_v54 = vpop.eup %4807  ;;  %v3910_v31 = vadd.f32 %v4802_v45, %v3909_v58  ;;  %v3986_v58 = vsub.f32 1.0, %v7422_v47 }
 0xcad   :  { %4011 = vrot.lane.b32.xlu1 %v4808_v54, %s4864_s13  ;;  %v4034_v54 = vmul.f32 %v7422_v47, %v7245_v19  ;;  %v3990_v19 = vsub.f32 1.0, %v7478_v60 }
 0xcae   :  { %v3914_v33 = vsel %vm3913_vm12, %v4802_v45, %v3910_v31 }
 0xcaf   :  { %v7499_v7 = vsel %vm3916_vm1, %v3918_v12, %v3914_v33  ;;  %v4810_v5 = vpop.eup %4809  ;;  %v4035_v33 = vmul.f32 %v7439_v1, %v7223_v43 }
 0xcb0   :  { %v3944_v48 = vmul.f32 %v3929_v34, %v7499_v7  ;;  %v3992_v1 = vsub.f32 1.0, %v7499_v7 }
 0xcb2   :  { %4013 = vrot.lane.b32.xlu2 %v4810_v5, %s4864_s13  ;;  %v3976_v39 = vadd.f32 %v3960_v6, %v3944_v48  ;;  %v4037_v48 = vmul.f32 %v7466_v28, %v7229_v29 }
 0xcb4   :  { %4811 = vtanh.f32 %v3976_v39 }
 0xcb5   :  { %4813 = vpow2.f32 %v4343_v63 }
 0xcba   :  { %v4812_v51 = vpop.eup %4811 }
 0xcbb   :  { %4015 = vrot.lane.b32.xlu0 %v4812_v51, %s4864_s13  ;;  %v4814_v14 = vpop.eup %4813  ;;  %v4038_v51 = vmul.f32 %v7478_v60, %v7251_v20 }
 0xcbc   :  { %v3627_v56 = vadd.f32 1.0, %v4814_v14  ;;  %v4040_v14 = vmul.f32 %v7499_v7, %v7233_v35 }
 0xcbe   :  { %4815 = vrcp.f32 %v3627_v56  ;;  %v3639_v24 = vand.u32 2147483648, %v3627_v56  ;;  %vm3633_vm3 = vweird.f32 %v3627_v56  ;;  %v3637_v9 = vand.u32 2147483647, %v3627_v56 }
 0xcc0   :  { %v3640_v38 = vor.u32 1.1754944e-38, %v3639_v24  ;;  %vm3638_vm5 = vcmp.eq.f32.partialorder %v3637_v9, 8.507059e+37 }
 0xcc4   :  { %v4816_v36 = vpop.eup %4815 }
 0xcc5   :  { %v3629_v52 = vmul.f32 %v4816_v36, %v3627_v56  ;;  %vm3634_vm4 = vweird.f32 %v4816_v36 }
 0xcc6   :  { %vm3635_vm15 = vmor %vm3633_vm3, %vm3634_vm4 }
 0xcc7   :  { %v3630_v13 = vsub.f32 1.0, %v3629_v52 }
 0xcc9   :  { %v3631_v40 = vmul.f32 %v4816_v36, %v3630_v13 }
 0xccb   :  { %v3632_v32 = vadd.f32 %v4816_v36, %v3631_v40 }
 0xccd   :  { %v3636_v23 = vsel %vm3635_vm15, %v4816_v36, %v3632_v32 }
 0xcce   :  { %v3641_v57 = vsel %vm3638_vm5, %v3640_v38, %v3636_v23 }
 0xccf   :  { %v3652_v52 = vsub.f32 1.0, %v3641_v57  ;;  %v3658_v20 = vmul.f32 %v3641_v57, %v7295_v25 }
 0xcf3   :  { %v3647_v17 = vpop.permute.xlu1 %3646 }
 0xcf4   :  { %v3649_v61 = vmul.f32 %v3647_v17, %v3641_v57 }
 0xcf6   :  { %v3650_v4 = vadd.f32 %v3649_v61, %v3643_v15 }
 0xcf8   :  { %4817 = vtanh.f32 %v3650_v4  ;;  %v4391_v4 = vld [vmem:[%s7570_s9] ss:$0 sm:$0xff] }
 0xcfc   :  { %v4002_v46 = vpop.permute.xlu2 %4001 }
 0xcfd   :  { %v4025_v45 = vmul.f32 %v4002_v46, %v3985_v59 }
 0xcfe   :  { %v4818_v10 = vpop.eup %4817 }
 0xcff   :  { %3654 = vrot.lane.b32.xlu1 %v4818_v10, %s4864_s13  ;;  %v4041_v30 = vadd.f32 %v4033_v37, %v4025_v45 }
 0xd01   :  { %4057 = vst [vmem:[#allocation1] ss:$9 sm:$0xff] %v4041_v30 }
 0xd04   :  { %v4008_v50 = vpop.permute.xlu2 %4007 }
 0xd05   :  { %v4028_v8 = vmul.f32 %v4008_v50, %v3988_v49 }
 0xd07   :  { %v4044_v42 = vadd.f32 %v4036_v41, %v4028_v8 }
 0xd09   :  { %4063 = vst [vmem:[#allocation1 + $0x3] ss:$9 sm:$0xff] %v4044_v42 }
 0xd0c   :  { %v4014_v0 = vpop.permute.xlu2 %4013 }
 0xd0d   :  { %v4031_v22 = vmul.f32 %v4014_v0, %v3991_v21 }
 0xd0f   :  { %v4047_v16 = vadd.f32 %v4039_v44, %v4031_v22 }
 0xd11   :  { %4069 = vst [vmem:[#allocation1 + $0x6] ss:$9 sm:$0xff] %v4047_v16 }
 0xd15   :  { %v4004_v53 = vpop.permute.xlu0 %4003 }
 0xd16   :  { %v4026_v31 = vmul.f32 %v4004_v53, %v3986_v58 }
 0xd17   :  { %v4006_v12 = vpop.permute.xlu1 %4005 }
 0xd18   :  { %v4042_v18 = vadd.f32 %v4034_v54, %v4026_v31  ;;  %v4027_v34 = vmul.f32 %v4006_v12, %v3987_v62 }
 0xd1a   :  { %4059 = vst [vmem:[#allocation1 + $0x1] ss:$9 sm:$0xff] %v4042_v18  ;;  %v4043_v55 = vadd.f32 %v4035_v33, %v4027_v34 }
 0xd1c   :  { %4061 = vst [vmem:[#allocation1 + $0x2] ss:$9 sm:$0xff] %v4043_v55 }
 0xd1d   :  { %v4010_v5 = vpop.permute.xlu0 %4009 }
 0xd1e   :  { %v4029_v6 = vmul.f32 %v4010_v5, %v3989_v26 }
 0xd1f   :  { %v4012_v39 = vpop.permute.xlu1 %4011 }
 0xd20   :  { %v4045_v47 = vadd.f32 %v4037_v48, %v4029_v6  ;;  %v4030_v11 = vmul.f32 %v4012_v39, %v3990_v19 }
 0xd22   :  { %4065 = vst [vmem:[#allocation1 + $0x4] ss:$9 sm:$0xff] %v4045_v47  ;;  %v4046_v43 = vadd.f32 %v4038_v51, %v4030_v11 }
 0xd24   :  { %4067 = vst [vmem:[#allocation1 + $0x5] ss:$9 sm:$0xff] %v4046_v43 }
 0xd2d   :  { %v4016_v63 = vpop.permute.xlu0 %4015 }
 0xd2e   :  { %v4032_v56 = vmul.f32 %v4016_v63, %v3992_v1 }
 0xd30   :  { %v4048_v29 = vadd.f32 %v4040_v14, %v4032_v56 }
 0xd32   :  { %4071 = vst [vmem:[#allocation1 + $0x7] ss:$9 sm:$0xff] %v4048_v29 }
 0xd39   :  { %v4072_v28 = vld [vmem:[#allocation1] sm:$0xff] }
 0xd3a   :  { %4073 = vrot.lane.b32.xlu2 %v4072_v28, %s4864_s13 }
 0xd42   :  { %4144 = vrot.lane.b32.xlu2 %v4391_v4, %s4864_s13 }
 0xd71   :  { %v3655_v36 = vpop.permute.xlu1 %3654 }
 0xd72   :  { %v3657_v13 = vmul.f32 %v3655_v36, %v3652_v52 }
 0xd74   :  { %v3659_v60 = vadd.f32 %v3658_v20, %v3657_v13 }
 0xd94   :  { %v4074_v40 = vpop.permute.xlu2 %4073 }
 0xd95   :  { %v4076_v32 = vsel %vm7960_vm0, %v4074_v40, %v3659_v60 }
 0xd96   :  { %v4077_v24 = vpack.c.bf16 %v4076_v32, %v4076_v32 }
 0xd98   :  { %4086 = vmatmul.bf16.vlgmr.msrb.gmra.mxu0 %v4077_v24  ;;  %4099 = vmatmul.bf16.vlgmr.msrb.gmra.mxu1 %v4077_v24 }
 0xd9c   :  { %v4145_v58 = vpop.permute.xlu2 %4144 }
 0xe15   :  { %v4087_v9 = vpop.f32.mrf.mxu0  ;;  %v4100_v35 = vpop.f32.mrf.mxu1 }
 0xe16   :  { %v4125_v7 = vadd.f32 %v4100_v35, %v7832_v27  ;;  %v4104_v17 = vadd.f32 %v7508_v3, %v4087_v9  ;;  %v4124_v41 = vadd.f32 %v7515_v2, %v4100_v35  ;;  %v4392_v2 = vld [vmem:[#allocation3] ss:$0 sm:$0xff] }
 0xe18   :  { %4127 = vrot.lane.b32.xlu0 %v4125_v7, %s4864_s13  ;;  %v4354_v15 = vmul.f32 -1.442695, %v4104_v17 }
 0xe1a   :  { %4819 = vpow2.f32 %v4354_v15 }
 0xe1d   :  { %v4089_v23 = vpop.f32.mrf.mxu0  ;;  %v4102_v38 = vpop.f32.mrf.mxu1 }
 0xe20   :  { %v4820_v25 = vpop.eup %4819 }
 0xe21   :  { %v4108_v57 = vadd.f32 1.0, %v4820_v25 }
 0xe23   :  { %4821 = vrcp.f32 %v4108_v57  ;;  %v4120_v37 = vand.u32 2147483648, %v4108_v57  ;;  %vm4114_vm14 = vweird.f32 %v4108_v57  ;;  %v4118_v3 = vand.u32 2147483647, %v4108_v57 }
 0xe25   :  { %v4121_v30 = vor.u32 1.1754944e-38, %v4120_v37  ;;  %vm4119_vm8 = vcmp.eq.f32.partialorder %v4118_v3, 8.507059e+37 }
 0xe29   :  { %v4822_v61 = vpop.eup %4821 }
 0xe2a   :  { %v4110_v59 = vmul.f32 %v4822_v61, %v4108_v57  ;;  %vm4115_vm13 = vweird.f32 %v4822_v61 }
 0xe2b   :  { %vm4116_vm7 = vmor %vm4114_vm14, %vm4115_vm13 }
 0xe2c   :  { %v4111_v27 = vsub.f32 1.0, %v4110_v59 }
 0xe2e   :  { %v4112_v46 = vmul.f32 %v4822_v61, %v4111_v27 }
 0xe30   :  { %v4113_v10 = vadd.f32 %v4822_v61, %v4112_v46 }
 0xe32   :  { %v4117_v45 = vsel %vm4116_vm7, %v4822_v61, %v4113_v10 }
 0xe33   :  { %v4122_v50 = vsel %vm4119_vm8, %v4121_v30, %v4117_v45 }
 0xe34   :  { %v4133_v0 = vsub.f32 1.0, %v4122_v50  ;;  %v4139_v16 = vmul.f32 %v4122_v50, %v3659_v60 }
 0xe8a   :  { %v4128_v49 = vpop.permute.xlu0 %4127 }
 0xe8b   :  { %v4130_v8 = vmul.f32 %v4128_v49, %v4122_v50 }
 0xe8d   :  { %v4131_v42 = vadd.f32 %v4130_v8, %v4124_v41 }
 0xe8f   :  { %4823 = vtanh.f32 %v4131_v42 }
 0xe95   :  { %v4824_v21 = vpop.eup %4823 }
 0xe96   :  { %4135 = vrot.lane.b32.xlu1 %v4824_v21, %s4864_s13 }
 0xf08   :  { %v4136_v44 = vpop.permute.xlu1 %4135 }
 0xf09   :  { %v4138_v22 = vmul.f32 %v4136_v44, %v4133_v0 }
 0xf0b   :  { %v4140_v53 = vadd.f32 %v4139_v16, %v4138_v22 }
 0xf0d   :  { %v4147_v54 = vmul.f32 %v4145_v58, %v4140_v53 }
 0xf0f   :  { %4149 = vrot.lane.b32.xlu0 %v4147_v54, %s4864_s13 }
 0xf81   :  { %v4150_v31 = vpop.permute.xlu0 %4149 }
 0xf82   :  { %v4152_v62 = vsel %vm7961_vm2, %v4150_v31, 0.0 }
 0xf83   :  { %4153 = vadd.xlane.f32.xlu1 %v4152_v62 }
 0xff6   :  { %v4154_v18 = vpop.xlane.xlu1 %4153 }
 0xff7   :  { %v4159_v12 = vadd.f32 %v4392_v2, %v4154_v18 }
 0xff9   :  { %4161 = vst.msk [vmem:[%s7572_s11] sm:$0xff] %vm4160_vm11, %v4159_v12 }
 0xffa   :  { %4166 = vsyncpa [#allocation5], 1 }

</bundles_post_ra>
